<compile_context>
chip_gen: v6e
topology: v6e:2x2x1
jax: 0.10.0
libtpu: 0.0.40
codegen_flags: <defaults>
</compile_context>

<pallas_src>
import jax
import jax.numpy as jnp
from jax import lax
from jax.experimental import pallas as pl
from jax.experimental.pallas import tpu as pltpu

_LANE = 128


def residual_block_kernel(x_ref, w1_ref, b1_ref, w2_ref, b2_ref, o_ref, r_scr):
    """One batch element per grid step.

    x_ref : (1, H, W, C)      input, NHWC (C padded to a multiple of 128)
    w1_ref: (3, 3*C, C) bf16  3x3 conv weights; dim1 rows ordered (dw, c_in)
    b1_ref: (1, C) f32
    w2_ref: (C, C) bf16       1x1 conv weights, (C_in, C_out)
    b2_ref: (1, C) f32
    o_ref : (1, H, W, C)
    r_scr : (H, W+2, C) bf16  ReLU(x) with one zero column of pad on each side
    """
    _, H, W, C = x_ref.shape
    Ho = H - 2                                     # rows produced by the 3x3 VALID conv
    f32, bf16 = jnp.float32, jnp.bfloat16

    # Conv-output rows per inner step: target ~512 matmul rows per MXU launch.
    # TODO(synk): on v6e (128 MiB VMEM) this could be raised toward ~1024 rows.
    RB = max(1, min(Ho, max(8, 512 // W)))
    nblk = -(-Ho // RB)

    # Stage ReLU(x) once, in bf16 (matmul-ready, half the VMEM of f32), with a
    # zero column on each side of W so the three dw taps are plain slices.
    zcol = jnp.zeros((H, 1, C), bf16)
    r_scr[:, pl.ds(0, 1), :] = zcol
    r_scr[:, pl.ds(W + 1, 1), :] = zcol
    r_scr[:, pl.ds(1, W), :] = jnp.maximum(x_ref[0].astype(f32), 0.0).astype(bf16)

    # Hoisted loop invariants (one vreg each).
    b1v = b1_ref[...]                                    # (1, C)  f32
    b2v = b2_ref[...].reshape(1, 1, C)                   # (1,1,C) f32
    col = lax.broadcasted_iota(jnp.int32, (1, W, 1), 1)
    col_mask = jnp.logical_and(col >= 1, col <= W - 2)   # interior output columns

    # Border rows 0 and H-1: the 1x1-conv padding ring -> bias2 only + residual.
    b2row = b2_ref[...]                                  # (1, C), broadcasts over W
    o_ref[0, 0] = (x_ref[0, 0].astype(f32) + b2row).astype(o_ref.dtype)
    o_ref[0, H - 1] = (x_ref[0, H - 1].astype(f32) + b2row).astype(o_ref.dtype)

    def blk_body(blk, carry):
        # Conv-output rows [h0, h0+RB)  ==  final-output rows [h0+1, h0+1+RB).
        h0 = jnp.minimum(blk * RB, Ho - RB)   # clamp: last block overlaps/recomputes

        # 3x3 conv as three accumulating (RB*W, 3C) x (3C, C) bf16 matmuls.
        # Tap dw at final column wcol reads padded-scratch column wcol + dw;
        # final columns 0 and W-1 read the zero pad and are masked below.
        acc = None
        for dh in range(3):                                   # static, unrolled
            row = pl.ds(h0 + dh, RB)
            win = jnp.concatenate(
                [r_scr[row, pl.ds(dw, W), :] for dw in range(3)],
                axis=-1).reshape(RB * W, 3 * C)               # (RB*W, 3C) bf16
            part = jnp.dot(win, w1_ref[dh], preferred_element_type=f32)
            acc = part if acc is None else acc + part

        y = jnp.maximum(acc + b1v, 0.0).astype(bf16)          # bias1 + ReLU (f32 VPU)
        z = jnp.dot(y, w2_ref[...], preferred_element_type=f32)   # 1x1 conv (MXU)
        z = z.reshape(RB, W, C)

        xblk = x_ref[0, pl.ds(h0 + 1, RB)].astype(f32)        # residual slice
        out = xblk + b2v + jnp.where(col_mask, z, 0.0)
        o_ref[0, pl.ds(h0 + 1, RB)] = out.astype(o_ref.dtype)
        return carry

    if nblk == 1:
        blk_body(0, 0)                        # no loop overhead for small images
    else:
        lax.fori_loop(0, nblk, blk_body, 0, unroll=(nblk <= 4))


def residual_block_forward(x_nchw, w1_oihw, b1, w2_oihw, b2):
    """Wrapper: NCHW / OIHW (PyTorch conventions) in, NCHW out."""
    N, C, H, W = x_nchw.shape
    assert H >= 3 and W >= 3, "3x3 VALID conv needs spatial dims >= 3"
    Cp = -(-C // _LANE) * _LANE                      # pad channels to 128 lanes
    # TODO(synk): for C << 128 a lane-packing layout (fold W into the lane axis)
    # would recover the ~(128/C)^2 wasted MXU MACs; kept channel-padded here.

    x = jnp.transpose(x_nchw, (0, 2, 3, 1))          # NHWC
    w1 = jnp.transpose(w1_oihw, (2, 3, 1, 0))        # HWIO (3, 3, Cin, Cout)
    w2 = jnp.transpose(w2_oihw[:, :, 0, 0], (1, 0))  # (Cin, Cout)
    b1p, b2p = b1, b2
    if Cp != C:
        pc = Cp - C
        x = jnp.pad(x, ((0, 0), (0, 0), (0, 0), (0, pc)))
        w1 = jnp.pad(w1, ((0, 0), (0, 0), (0, pc), (0, pc)))
        w2 = jnp.pad(w2, ((0, pc), (0, pc)))
        b1p = jnp.pad(b1, (0, pc))
        b2p = jnp.pad(b2, (0, pc))

    # bf16 weights: native MXU dtype on v5e/v6e/v7x and half-size weight DMAs.
    w1f = w1.reshape(3, 3 * Cp, Cp).astype(jnp.bfloat16)   # dim1 ordered (dw, c_in)
    w2b = w2.astype(jnp.bfloat16)
    b1r = b1p.reshape(1, Cp).astype(jnp.float32)
    b2r = b2p.reshape(1, Cp).astype(jnp.float32)

    # VMEM budget: double-buffered in/out blocks + scratch + weights + headroom.
    blk_bytes = H * W * Cp * x.dtype.itemsize
    scratch_bytes = H * (W + 2) * Cp * 2
    weight_bytes = (9 * Cp * Cp + Cp * Cp) * 2 + 2 * Cp * 4
    need = 4 * blk_bytes + scratch_bytes + weight_bytes + (4 << 20)
    try:
        phys_vmem = int(pltpu.get_tpu_info().vmem_capacity_bytes)
    except Exception:
        phys_vmem = 64 << 20                         # conservative (v7x per-core)
    vmem_limit = int(min(max(need, 32 << 20), phys_vmem * 3 // 4))
    # TODO(synk): for images where `need` exceeds the cap, tile rows via a second
    # parallel grid axis with a halo BlockSpec instead of whole-image blocks.

    Ho = H - 2
    cost = pl.CostEstimate(
        flops=int(2 * N * Ho * W * Cp * (9 * Cp + Cp)),
        transcendentals=0,
        bytes_accessed=int(2 * N * H * W * Cp * x.dtype.itemsize + weight_bytes),
    )

    out_nhwc = pl.pallas_call(
        residual_block_kernel,
        out_shape=jax.ShapeDtypeStruct((N, H, W, Cp), x.dtype),
        grid=(N,),
        in_specs=[
            pl.BlockSpec((1, H, W, Cp), lambda n: (n, 0, 0, 0)),
            pl.BlockSpec((3, 3 * Cp, Cp), lambda n: (0, 0, 0)),
            pl.BlockSpec((1, Cp), lambda n: (0, 0)),
            pl.BlockSpec((Cp, Cp), lambda n: (0, 0)),
            pl.BlockSpec((1, Cp), lambda n: (0, 0)),
        ],
        out_specs=pl.BlockSpec((1, H, W, Cp), lambda n: (n, 0, 0, 0)),
        scratch_shapes=[pltpu.VMEM((H, W + 2, Cp), jnp.bfloat16)],
        compiler_params=pltpu.CompilerParams(
            dimension_semantics=("parallel",),        # megacore-shard over batch
            vmem_limit_bytes=vmem_limit,
        ),
        cost_estimate=cost,
    )(x, w1f, b1r, w2b, b2r)

    out_nhwc = out_nhwc[..., :C]                     # drop channel padding
    return jnp.transpose(out_nhwc, (0, 3, 1, 2))     # back to NCHW


def residual_block_ref(x, w1, b1, w2, b2):
    """Pure-JAX reference (lax.conv), NCHW / OIHW — mirrors the PyTorch module."""
    r = jnp.maximum(x, 0.0)
    y = lax.conv_general_dilated(r, w1, (1, 1), "VALID",
                                 dimension_numbers=("NCHW", "OIHW", "NCHW"))
    y = jnp.maximum(y + b1[None, :, None, None], 0.0)
    z = lax.conv_general_dilated(y, w2, (1, 1), [(1, 1), (1, 1)],
                                 dimension_numbers=("NCHW", "OIHW", "NCHW"))
    z = z + b2[None, :, None, None]
    return z + x


if __name__ == "__main__":
    key = jax.random.PRNGKey(0)
    kx, k1, kb1, k2, kb2 = jax.random.split(key, 5)

    N, C, H, W = 2, 4, 16, 16
    x = jax.random.normal(kx, (N, C, H, W), jnp.float32)

    # Deterministic synthetic parameters (PyTorch layouts: OIHW weights, (C,) biases).
    fan1 = float(C * 3 * 3)
    w1 = jax.random.uniform(k1, (C, C, 3, 3), jnp.float32, -1.0, 1.0) / jnp.sqrt(fan1)
    b1 = jax.random.uniform(kb1, (C,), jnp.float32, -1.0, 1.0) / jnp.sqrt(fan1)
    w2 = jax.random.uniform(k2, (C, C, 1, 1), jnp.float32, -1.0, 1.0) / jnp.sqrt(float(C))
    b2 = jax.random.uniform(kb2, (C,), jnp.float32, -1.0, 1.0) / jnp.sqrt(float(C))

    out = residual_block_forward(x, w1, b1, w2, b2)
    out = jax.block_until_ready(out)

    ref = residual_block_ref(x, w1, b1, w2, b2)
    assert out.shape == (N, C, H, W)
    # bf16 MXU operands (f32 accumulation) -> looser tolerance vs the f32 reference.
    assert jnp.allclose(out, ref, rtol=5e-2, atol=5e-2), "Pallas kernel mismatch vs reference"

    print("KERNEL_OK")
</pallas_src>

<mosaic_0001>
module attributes {stable_mosaic.version = 11 : i64} {
  func.func @residual_block_kernel(%arg0: i32, %arg1: memref<1x16x16x128xf32, #tpu.memory_space<vmem>>, %arg2: memref<3x384x128xbf16, #tpu.memory_space<vmem>>, %arg3: memref<1x128xf32, #tpu.memory_space<vmem>>, %arg4: memref<128x128xbf16, #tpu.memory_space<vmem>>, %arg5: memref<1x128xf32, #tpu.memory_space<vmem>>, %arg6: memref<1x16x16x128xf32, #tpu.memory_space<vmem>>, %arg7: memref<16x18x128xbf16, #tpu.memory_space<vmem>>) attributes {dimension_semantics = [#tpu.dimension_semantics<parallel>], iteration_bounds = array<i64: 2>, scalar_prefetch = 0 : i64, scratch_operands = 1 : i64, tpu.core_type = #tpu.core_type<tc>, window_params = [{transform_indices = @transform_0, window_bounds = array<i64: 1, 16, 16, 128>}, {pipeline_mode = #tpu.pipeline_mode<synchronous>, transform_indices = @transform_1, window_bounds = array<i64: 3, 384, 128>}, {pipeline_mode = #tpu.pipeline_mode<synchronous>, transform_indices = @transform_2, window_bounds = array<i64: 1, 128>}, {pipeline_mode = #tpu.pipeline_mode<synchronous>, transform_indices = @transform_3, window_bounds = array<i64: 128, 128>}, {pipeline_mode = #tpu.pipeline_mode<synchronous>, transform_indices = @transform_4, window_bounds = array<i64: 1, 128>}, {transform_indices = @transform_5, window_bounds = array<i64: 1, 16, 16, 128>}]} {
    %cst = arith.constant 0.000000e+00 : bf16
    %0 = vector.broadcast %cst : bf16 to vector<16x1x128xbf16>
    %c0 = arith.constant 0 : index
    %c0_0 = arith.constant 0 : index
    %c0_1 = arith.constant 0 : index
    %1 = vector.load %arg7[%c0, %c0_0, %c0_1] : memref<16x18x128xbf16, #tpu.memory_space<vmem>>, vector<16x1x128xbf16>
    tpu.vector_store %arg7[%c0, %c0_0, %c0_1], %0 {strides = array<i32>} : memref<16x18x128xbf16, #tpu.memory_space<vmem>>, vector<16x1x128xbf16>,
    %c0_2 = arith.constant 0 : index
    %c17 = arith.constant 17 : index
    %c0_3 = arith.constant 0 : index
    %2 = vector.load %arg7[%c0_2, %c17, %c0_3] : memref<16x18x128xbf16, #tpu.memory_space<vmem>>, vector<16x1x128xbf16>
    tpu.vector_store %arg7[%c0_2, %c17, %c0_3], %0 {strides = array<i32>} : memref<16x18x128xbf16, #tpu.memory_space<vmem>>, vector<16x1x128xbf16>,
    %c0_4 = arith.constant 0 : index
    %c0_5 = arith.constant 0 : index
    %c0_6 = arith.constant 0 : index
    %c0_7 = arith.constant 0 : index
    %3 = vector.load %arg1[%c0_4, %c0_5, %c0_6, %c0_7] : memref<1x16x16x128xf32, #tpu.memory_space<vmem>>, vector<1x16x16x128xf32>
    %4 = vector.shape_cast %3 : vector<1x16x16x128xf32> to vector<16x16x128xf32>
    %cst_8 = arith.constant 0.000000e+00 : f32
    %5 = vector.broadcast %cst_8 : f32 to vector<16x16x128xf32>
    %6 = arith.maximumf %4, %5 : vector<16x16x128xf32>
    %7 = arith.truncf %6 : vector<16x16x128xf32> to vector<16x16x128xbf16>
    %c0_9 = arith.constant 0 : index
    %c1 = arith.constant 1 : index
    %c0_10 = arith.constant 0 : index
    %8 = vector.load %arg7[%c0_9, %c1, %c0_10] : memref<16x18x128xbf16, #tpu.memory_space<vmem>>, vector<16x16x128xbf16>
    tpu.vector_store %arg7[%c0_9, %c1, %c0_10], %7 {strides = array<i32>} : memref<16x18x128xbf16, #tpu.memory_space<vmem>>, vector<16x16x128xbf16>,
    %c0_11 = arith.constant 0 : index
    %c0_12 = arith.constant 0 : index
    %9 = vector.load %arg3[%c0_11, %c0_12] : memref<1x128xf32, #tpu.memory_space<vmem>>, vector<1x128xf32>
    %c0_13 = arith.constant 0 : index
    %c0_14 = arith.constant 0 : index
    %10 = vector.load %arg5[%c0_13, %c0_14] : memref<1x128xf32, #tpu.memory_space<vmem>>, vector<1x128xf32>
    %11 = vector.shape_cast %10 : vector<1x128xf32> to vector<1x1x128xf32>
    %12 = tpu.iota {dimensions = array<i32: 1>} : vector<1x16x1xi32>
    %c1_i32 = arith.constant 1 : i32
    %13 = vector.broadcast %c1_i32 : i32 to vector<1x16x1xi32>
    %14 = arith.cmpi sge, %12, %13 : vector<1x16x1xi32>
    %c14_i32 = arith.constant 14 : i32
    %15 = vector.broadcast %c14_i32 : i32 to vector<1x16x1xi32>
    %16 = arith.cmpi sle, %12, %15 : vector<1x16x1xi32>
    %17 = arith.andi %14, %16 : vector<1x16x1xi1>
    %c0_15 = arith.constant 0 : index
    %c0_16 = arith.constant 0 : index
    %18 = vector.load %arg5[%c0_15, %c0_16] : memref<1x128xf32, #tpu.memory_space<vmem>>, vector<1x128xf32>
    %c0_17 = arith.constant 0 : index
    %c0_18 = arith.constant 0 : index
    %c0_19 = arith.constant 0 : index
    %c0_20 = arith.constant 0 : index
    %19 = vector.load %arg1[%c0_17, %c0_18, %c0_19, %c0_20] : memref<1x16x16x128xf32, #tpu.memory_space<vmem>>, vector<1x1x16x128xf32>
    %20 = vector.shape_cast %19 : vector<1x1x16x128xf32> to vector<16x128xf32>
    %21 = vector.broadcast %18 : vector<1x128xf32> to vector<16x128xf32>
    %22 = arith.addf %20, %21 : vector<16x128xf32>
    %c0_21 = arith.constant 0 : index
    %c0_22 = arith.constant 0 : index
    %c0_23 = arith.constant 0 : index
    %c0_24 = arith.constant 0 : index
    %23 = vector.load %arg6[%c0_21, %c0_22, %c0_23, %c0_24] : memref<1x16x16x128xf32, #tpu.memory_space<vmem>>, vector<1x1x16x128xf32>
    %24 = vector.shape_cast %23 : vector<1x1x16x128xf32> to vector<16x128xf32>
    %25 = vector.shape_cast %22 : vector<16x128xf32> to vector<1x1x16x128xf32>
    tpu.vector_store %arg6[%c0_21, %c0_22, %c0_23, %c0_24], %25 {strides = array<i32>} : memref<1x16x16x128xf32, #tpu.memory_space<vmem>>, vector<1x1x16x128xf32>,
    %c0_25 = arith.constant 0 : index
    %c15 = arith.constant 15 : index
    %c0_26 = arith.constant 0 : index
    %c0_27 = arith.constant 0 : index
    %26 = vector.load %arg1[%c0_25, %c15, %c0_26, %c0_27] : memref<1x16x16x128xf32, #tpu.memory_space<vmem>>, vector<1x1x16x128xf32>
    %27 = vector.shape_cast %26 : vector<1x1x16x128xf32> to vector<16x128xf32>
    %28 = vector.broadcast %18 : vector<1x128xf32> to vector<16x128xf32>
    %29 = arith.addf %27, %28 : vector<16x128xf32>
    %c0_28 = arith.constant 0 : index
    %c15_29 = arith.constant 15 : index
    %c0_30 = arith.constant 0 : index
    %c0_31 = arith.constant 0 : index
    %30 = vector.load %arg6[%c0_28, %c15_29, %c0_30, %c0_31] : memref<1x16x16x128xf32, #tpu.memory_space<vmem>>, vector<1x1x16x128xf32>
    %31 = vector.shape_cast %30 : vector<1x1x16x128xf32> to vector<16x128xf32>
    %32 = vector.shape_cast %29 : vector<16x128xf32> to vector<1x1x16x128xf32>
    tpu.vector_store %arg6[%c0_28, %c15_29, %c0_30, %c0_31], %32 {strides = array<i32>} : memref<1x16x16x128xf32, #tpu.memory_space<vmem>>, vector<1x1x16x128xf32>,
    %c0_i32 = arith.constant 0 : i32
    %c0_i32_32 = arith.constant 0 : i32
    %33 = arith.minsi %c0_i32, %c0_i32_32 : i32
    %c0_i32_33 = arith.constant 0 : i32
    %34 = arith.addi %33, %c0_i32_33 : i32
    %35 = arith.index_cast %34 : i32 to index
    %c0_34 = arith.constant 0 : index
    %c0_35 = arith.constant 0 : index
    %36 = vector.load %arg7[%35, %c0_34, %c0_35] : memref<16x18x128xbf16, #tpu.memory_space<vmem>>, vector<14x16x128xbf16>
    %37 = arith.index_cast %34 : i32 to index
    %c1_36 = arith.constant 1 : index
    %c0_37 = arith.constant 0 : index
    %38 = vector.load %arg7[%37, %c1_36, %c0_37] : memref<16x18x128xbf16, #tpu.memory_space<vmem>>, vector<14x16x128xbf16>
    %39 = arith.index_cast %34 : i32 to index
    %c2 = arith.constant 2 : index
    %c0_38 = arith.constant 0 : index
    %40 = vector.load %arg7[%39, %c2, %c0_38] : memref<16x18x128xbf16, #tpu.memory_space<vmem>>, vector<14x16x128xbf16>
    %41 = tpu.concatenate %36, %38, %40 in 2 : vector<14x16x128xbf16>, vector<14x16x128xbf16>, vector<14x16x128xbf16> -> vector<14x16x384xbf16>
    %42 = vector.shape_cast %41 : vector<14x16x384xbf16> to vector<224x384xbf16>
    %c0_39 = arith.constant 0 : index
    %c0_40 = arith.constant 0 : index
    %c0_41 = arith.constant 0 : index
    %43 = vector.load %arg2[%c0_39, %c0_40, %c0_41] : memref<3x384x128xbf16, #tpu.memory_space<vmem>>, vector<1x384x128xbf16>
    %44 = vector.shape_cast %43 : vector<1x384x128xbf16> to vector<384x128xbf16>
    %cst_42 = arith.constant dense<0.000000e+00> : vector<224x128xf32>
    %45 = tpu.matmul %42, %44, %cst_42 {dimension_numbers = #tpu.dot_dimension_numbers<[1], [0], [0], [1], [0, 0, 1, 1], [], []>} : vector<224x384xbf16>, vector<384x128xbf16>, vector<224x128xf32> -> vector<224x128xf32>
    %c1_i32_43 = arith.constant 1 : i32
    %46 = arith.addi %33, %c1_i32_43 : i32
    %47 = arith.index_cast %46 : i32 to index
    %c0_44 = arith.constant 0 : index
    %c0_45 = arith.constant 0 : index
    %48 = vector.load %arg7[%47, %c0_44, %c0_45] : memref<16x18x128xbf16, #tpu.memory_space<vmem>>, vector<14x16x128xbf16>
    %49 = arith.index_cast %46 : i32 to index
    %c1_46 = arith.constant 1 : index
    %c0_47 = arith.constant 0 : index
    %50 = vector.load %arg7[%49, %c1_46, %c0_47] : memref<16x18x128xbf16, #tpu.memory_space<vmem>>, vector<14x16x128xbf16>
    %51 = arith.index_cast %46 : i32 to index
    %c2_48 = arith.constant 2 : index
    %c0_49 = arith.constant 0 : index
    %52 = vector.load %arg7[%51, %c2_48, %c0_49] : memref<16x18x128xbf16, #tpu.memory_space<vmem>>, vector<14x16x128xbf16>
    %53 = tpu.concatenate %48, %50, %52 in 2 : vector<14x16x128xbf16>, vector<14x16x128xbf16>, vector<14x16x128xbf16> -> vector<14x16x384xbf16>
    %54 = vector.shape_cast %53 : vector<14x16x384xbf16> to vector<224x384xbf16>
    %c1_50 = arith.constant 1 : index
    %c0_51 = arith.constant 0 : index
    %c0_52 = arith.constant 0 : index
    %55 = vector.load %arg2[%c1_50, %c0_51, %c0_52] : memref<3x384x128xbf16, #tpu.memory_space<vmem>>, vector<1x384x128xbf16>
    %56 = vector.shape_cast %55 : vector<1x384x128xbf16> to vector<384x128xbf16>
    %cst_53 = arith.constant dense<0.000000e+00> : vector<224x128xf32>
    %57 = tpu.matmul %54, %56, %cst_53 {dimension_numbers = #tpu.dot_dimension_numbers<[1], [0], [0], [1], [0, 0, 1, 1], [], []>} : vector<224x384xbf16>, vector<384x128xbf16>, vector<224x128xf32> -> vector<224x128xf32>
    %58 = arith.addf %45, %57 : vector<224x128xf32>
    %c2_i32 = arith.constant 2 : i32
    %59 = arith.addi %33, %c2_i32 : i32
    %60 = arith.index_cast %59 : i32 to index
    %c0_54 = arith.constant 0 : index
    %c0_55 = arith.constant 0 : index
    %61 = vector.load %arg7[%60, %c0_54, %c0_55] : memref<16x18x128xbf16, #tpu.memory_space<vmem>>, vector<14x16x128xbf16>
    %62 = arith.index_cast %59 : i32 to index
    %c1_56 = arith.constant 1 : index
    %c0_57 = arith.constant 0 : index
    %63 = vector.load %arg7[%62, %c1_56, %c0_57] : memref<16x18x128xbf16, #tpu.memory_space<vmem>>, vector<14x16x128xbf16>
    %64 = arith.index_cast %59 : i32 to index
    %c2_58 = arith.constant 2 : index
    %c0_59 = arith.constant 0 : index
    %65 = vector.load %arg7[%64, %c2_58, %c0_59] : memref<16x18x128xbf16, #tpu.memory_space<vmem>>, vector<14x16x128xbf16>
    %66 = tpu.concatenate %61, %63, %65 in 2 : vector<14x16x128xbf16>, vector<14x16x128xbf16>, vector<14x16x128xbf16> -> vector<14x16x384xbf16>
    %67 = vector.shape_cast %66 : vector<14x16x384xbf16> to vector<224x384xbf16>
    %c2_60 = arith.constant 2 : index
    %c0_61 = arith.constant 0 : index
    %c0_62 = arith.constant 0 : index
    %68 = vector.load %arg2[%c2_60, %c0_61, %c0_62] : memref<3x384x128xbf16, #tpu.memory_space<vmem>>, vector<1x384x128xbf16>
    %69 = vector.shape_cast %68 : vector<1x384x128xbf16> to vector<384x128xbf16>
    %cst_63 = arith.constant dense<0.000000e+00> : vector<224x128xf32>
    %70 = tpu.matmul %67, %69, %cst_63 {dimension_numbers = #tpu.dot_dimension_numbers<[1], [0], [0], [1], [0, 0, 1, 1], [], []>} : vector<224x384xbf16>, vector<384x128xbf16>, vector<224x128xf32> -> vector<224x128xf32>
    %71 = arith.addf %58, %70 : vector<224x128xf32>
    %72 = vector.broadcast %9 : vector<1x128xf32> to vector<224x128xf32>
    %73 = arith.addf %71, %72 : vector<224x128xf32>
    %cst_64 = arith.constant 0.000000e+00 : f32
    %74 = vector.broadcast %cst_64 : f32 to vector<224x128xf32>
    %75 = arith.maximumf %73, %74 : vector<224x128xf32>
    %76 = arith.truncf %75 : vector<224x128xf32> to vector<224x128xbf16>
    %c0_65 = arith.constant 0 : index
    %c0_66 = arith.constant 0 : index
    %77 = vector.load %arg4[%c0_65, %c0_66] : memref<128x128xbf16, #tpu.memory_space<vmem>>, vector<128x128xbf16>
    %cst_67 = arith.constant dense<0.000000e+00> : vector<224x128xf32>
    %78 = tpu.matmul %76, %77, %cst_67 {dimension_numbers = #tpu.dot_dimension_numbers<[1], [0], [0], [1], [0, 0, 1, 1], [], []>} : vector<224x128xbf16>, vector<128x128xbf16>, vector<224x128xf32> -> vector<224x128xf32>
    %79 = vector.shape_cast %78 : vector<224x128xf32> to vector<14x16x128xf32>
    %c1_i32_68 = arith.constant 1 : i32
    %80 = arith.addi %33, %c1_i32_68 : i32
    %c0_69 = arith.constant 0 : index
    %81 = arith.index_cast %80 : i32 to index
    %c0_70 = arith.constant 0 : index
    %c0_71 = arith.constant 0 : index
    %82 = vector.load %arg1[%c0_69, %81, %c0_70, %c0_71] : memref<1x16x16x128xf32, #tpu.memory_space<vmem>>, vector<1x14x16x128xf32>
    %83 = vector.shape_cast %82 : vector<1x14x16x128xf32> to vector<14x16x128xf32>
    %84 = vector.broadcast %11 : vector<1x1x128xf32> to vector<14x16x128xf32>
    %85 = arith.addf %83, %84 : vector<14x16x128xf32>
    %cst_72 = arith.constant 0.000000e+00 : f32
    %86 = vector.shape_cast %17 : vector<1x16x1xi1> to vector<1x16x1xi1>
    %87 = vector.broadcast %86 : vector<1x16x1xi1> to vector<14x16x128xi1>
    %88 = vector.broadcast %cst_72 : f32 to vector<14x16x128xf32>
    %89 = arith.select %87, %79, %88 : vector<14x16x128xi1>, vector<14x16x128xf32>
    %90 = arith.addf %85, %89 : vector<14x16x128xf32>
    %c1_i32_73 = arith.constant 1 : i32
    %91 = arith.addi %33, %c1_i32_73 : i32
    %c0_74 = arith.constant 0 : index
    %92 = arith.index_cast %91 : i32 to index
    %c0_75 = arith.constant 0 : index
    %c0_76 = arith.constant 0 : index
    %93 = vector.load %arg6[%c0_74, %92, %c0_75, %c0_76] : memref<1x16x16x128xf32, #tpu.memory_space<vmem>>, vector<1x14x16x128xf32>
    %94 = vector.shape_cast %93 : vector<1x14x16x128xf32> to vector<14x16x128xf32>
    %95 = vector.shape_cast %90 : vector<14x16x128xf32> to vector<1x14x16x128xf32>
    tpu.vector_store %arg6[%c0_74, %92, %c0_75, %c0_76], %95 {strides = array<i32>} : memref<1x16x16x128xf32, #tpu.memory_space<vmem>>, vector<1x14x16x128xf32>,
    return
  }
  func.func @transform_0(%arg0: i32) -> (i32, i32, i32, i32) {
    %c0_i32 = arith.constant 0 : i32
    %c0_i32_0 = arith.constant 0 : i32
    %c0_i32_1 = arith.constant 0 : i32
    %c0_i32_2 = arith.constant 0 : i32
    return %arg0, %c0_i32, %c0_i32_0, %c0_i32_1 : i32, i32, i32, i32
  }
  func.func @transform_1(%arg0: i32) -> (i32, i32, i32) {
    %c0_i32 = arith.constant 0 : i32
    %c0_i32_0 = arith.constant 0 : i32
    %c0_i32_1 = arith.constant 0 : i32
    %c0_i32_2 = arith.constant 0 : i32
    return %c0_i32, %c0_i32_0, %c0_i32_1 : i32, i32, i32
  }
  func.func @transform_2(%arg0: i32) -> (i32, i32) {
    %c0_i32 = arith.constant 0 : i32
    %c0_i32_0 = arith.constant 0 : i32
    %c0_i32_1 = arith.constant 0 : i32
    return %c0_i32, %c0_i32_0 : i32, i32
  }
  func.func @transform_3(%arg0: i32) -> (i32, i32) {
    %c0_i32 = arith.constant 0 : i32
    %c0_i32_0 = arith.constant 0 : i32
    %c0_i32_1 = arith.constant 0 : i32
    return %c0_i32, %c0_i32_0 : i32, i32
  }
  func.func @transform_4(%arg0: i32) -> (i32, i32) {
    %c0_i32 = arith.constant 0 : i32
    %c0_i32_0 = arith.constant 0 : i32
    %c0_i32_1 = arith.constant 0 : i32
    return %c0_i32, %c0_i32_0 : i32, i32
  }
  func.func @transform_5(%arg0: i32) -> (i32, i32, i32, i32) {
    %c0_i32 = arith.constant 0 : i32
    %c0_i32_0 = arith.constant 0 : i32
    %c0_i32_1 = arith.constant 0 : i32
    %c0_i32_2 = arith.constant 0 : i32
    return %arg0, %c0_i32, %c0_i32_0, %c0_i32_1 : i32, i32, i32, i32
  }
}

</mosaic_0001>

<bundles_post_ra>
// kernel: tpu_custom_call.1
= control target key start
LH: loop header
LB: loop body
LE: loop exit
PB: predicated region body
PF: predicated region fallthrough
CT: control target
= control target key end

     0   :  { %10 = vsyncpa [#allocation4], 0  ;;  %s7158_s0 = inlined_call_operand.hbm [shape: f32[2,16,16,128], index: 0, kind: input, shape index: {}]   ;;  %s7159_s1 = inlined_call_operand.hbm [shape: bf16[3,384,128], index: 1, kind: input, shape index: {}]   ;;  %s7160_s2 = inlined_call_operand.vmem [shape: f32[1,128], index: 2, kind: input, shape index: {}]   ;;  %s7161_s3 = inlined_call_operand.hbm [shape: bf16[128,128], index: 3, kind: input, shape index: {}]   ;;  %s7162_s4 = inlined_call_operand.vmem [shape: f32[1,128], index: 4, kind: input, shape index: {}]   ;;  %s7163_s5 = inlined_call_operand.hbm [shape: f32[2,16,16,128], index: 5, kind: output, shape index: {}]  }
   0x1   :  { %12 = vsyncpa [#allocation4 + $0x1], 0 }
   0x2   :  { %13 = vsyncpa [#allocation7], 0 }
   0x3   :  { %14 = vsyncpa [#allocation5], 0 }
   0x4   :  { %16 = vsyncpa [#allocation5 + $0x1], 0  ;;  %s5789_s18 = smov 0   ;;  %s5791_s19 = smov 0  }
   0x5   :  { %s5793_s20 = smov 0   ;;  %s5795_s21 = smov 0  }
   0x6 LB: > { %s5810_s22 = sadd.s32 4294967295, %s5747_s21   ;;  %s4404_s23 = sadd.s32 4294967294, %s5747_s21   ;;  %s5747_s21 = sphi %s5795_s21, %s7193_s21   ;;  %s5743_s20 = sphi %s5793_s20, %s7192_s20   ;;  %s5739_s19 = sphi %s5791_s19, %s7191_s19   ;;  %s5735_s18 = sphi %s5789_s18, %s7190_s18  }
   0x7   : > { %p42_p0 = scmp.ne.s32.totalorder %s5739_s19, %s5735_s18  ;;  %p7164_p1 = scmp.eq.s32.totalorder %s5810_s22, 0 }
   0x8   : > { %p156_p3 = scmp.eq.s32.totalorder %s4404_s23, 1  ;;  %p4405_p5 = scmp.ge.s32.totalorder %s5747_s21, 1 }
   0x9   : > { %p5819_p4 = por %p7164_p1, %p42_p0  ;;  %p163_p7 = scmp.lt.s32.totalorder %s5747_s21, 3 }
   0xa   : > { %p5824_p6 = por %p156_p3, %p42_p0  ;;  %s5749_s27 = smov [#allocation6]  }
   0xb   : > { %s7168_s24 = scalar_select %p5819_p4, 1, 0 }
   0xc   : > { %s7169_s25 = scalar_select %p5824_p6, 1, 0 }
   0xd   : > { %p5829_p8 = pnand %p4405_p5, %p163_p7  ;;  %s175_s28 = sshll.u32 %s5749_s27, 4  ;;  %s176_s28 = int_to_ptr.vmem [resolvable:$true] %s175_s28 }
   0xe   : > { %s5750_s30 = smov [#allocation8]   ;;  %s5610_s7 = scalar_lea.vmem %s176_s28, 9216 }
   0xf   : > { %s7170_s26 = scalar_select %p5829_p8, 1, 0 }
  0x10   : > { %p5332_p9 = pneg %p5829_p8  ;;  %s191_s6 = sshll.u32 %s5750_s30, 4  ;;  %s192_s6 = int_to_ptr.vmem [resolvable:$true] %s191_s6 }
  0x11   : > { %p5611_p13 = scmp.ne.s32.totalorder %s176_s28, %s5610_s7  ;;  %p5618_p5 = scmp.lt.s32.totalorder %s176_s28, %s176_s28 }
  0x12   : > { %p5838_p11 = pnand %p5332_p9, %p7164_p1  ;;  %p5619_p7 = scmp.lt.s32.totalorder %s5610_s7, %s5610_s7 }
  0x14   : > { %p5601_p12 = pneg %p5838_p11  ;;  %p5620_p10 = por %p5619_p7, %p5618_p5 }
  0x16   : > { %p5613_p0 = pnand %p5611_p13, %p5601_p12 }
  0x18   : > { %p5614_p3 = pneg %p5613_p0 }
  0x1a   : > { %p5621_p9 = pnand %p5620_p10, %p5614_p3 }
  0x1c   : > { %5624 = shalt.err (!%p5621_p9)
}
  0x1d   : > { %s5751_s8 = smov 64   ;;  %s5752_s9 = smov 4  }
  0x1e   : > { %5335 = dma.hbm_to_vmem [thread:$0]  (!%p5838_p11), %s7159_s1, 9216, %s176_s28, [#allocation7], %s5751_s8, %s5751_s8, %s5752_s9  }
  0x1f   : > { %s5636_s12 = scalar_lea.vmem %s192_s6, 1024  ;;  %p5644_p2 = scmp.lt.s32.totalorder %s192_s6, %s192_s6 }
  0x20   : > { %p5637_p1 = scmp.ne.s32.totalorder %s192_s6, %s5636_s12  ;;  %p5645_p6 = scmp.lt.s32.totalorder %s5636_s12, %s5636_s12 }
  0x22   : > { %p5639_p13 = pnand %p5637_p1, %p5601_p12  ;;  %p5646_p5 = por %p5645_p6, %p5644_p2 }
  0x24   : > { %p5640_p0 = pneg %p5639_p13 }
  0x26   : > { %p5647_p10 = pnand %p5646_p5, %p5640_p0 }
  0x28   : > { %5650 = shalt.err (!%p5647_p10)
}
  0x29   : > { %5338 = dma.hbm_to_vmem [thread:$0]  (!%p5838_p11), %s7161_s3, 1024, %s192_s6, [#allocation7], %s5751_s8, %s5751_s8, %s5752_s9  }
  0x2a   : > { %s5861_s15 = sadd.s32 1, %s5747_s21   ;;  %s29_s16 = sadd.s32 1, %s5743_s20 }
  0x2b   : > { %s26_s17 = ssub.s32 %s5747_s21, %s5861_s15  ;;  %p36_p1 = scmp.ne.s32.totalorder %s5743_s20, %s5739_s19 }
  0x2c   : > { %p27_p2 = scmp.eq.s32.totalorder %s26_s17, 0  ;;  %p37_p6 = scmp.eq.s32.totalorder %s5747_s21, 0 }
  0x2d   : > { %p7172_p12 = scmp.eq.s32.totalorder %s5810_s22, 1  ;;  %p5349_p7 = scmp.lt.s32.totalorder %s5747_s21, 2 }
  0x2e   : > { %s5877_s27 = scalar_select %p27_p2, %s5743_s20, %s29_s16  }
  0x2f   : > { %p5871_p3 = por %p7172_p12, %p36_p1  ;;  %p38_p9 = por %p37_p6, %p36_p1 }
  0x30   : > { %s208_s28 = sand.u32 1, %s5743_s20   ;;  %s4722_s30 = sshll.u32 %s5747_s21, 12 }
  0x31   : > { %s7173_s23 = scalar_select %p5871_p3, 1, 0 }
  0x32   : > { %s4409_s29 = sshll.u32 %s208_s28, 8  ;;  %s5884_s8 = scalar_lea.hbm %s7158_s0, %s4722_s30 }
  0x33   : > { %s212_s9 = scalar_lea.vmem [#allocation3], %s4409_s29  ;;  %p5888_p11 = pnand %p5349_p7, %p38_p9 }
  0x34   : > { %s219_s10 = sshll.u32 %s212_s9, 4  ;;  %s5892_s12 = scalar_lea.sflag [#allocation4], %s208_s28  ;;  %s5886_s10 = int_to_ptr.vmem [resolvable:$true] %s219_s10 }
  0x35   : > { %s5651_s13 = scalar_lea.hbm %s5884_s8, 4096  ;;  %p5653_p0 = pneg %p5888_p11 }
  0x36   : > { %p5652_p13 = scmp.ne.s32.totalorder %s5884_s8, %s5651_s13  ;;  %s5656_s17 = scalar_lea.hbm %s7158_s0, 8192 }
  0x37   : > { %p5657_p1 = scmp.lt.s32.totalorder %s5884_s8, %s7158_s0  ;;  %p5658_p2 = scmp.lt.s32.totalorder %s5656_s17, %s5651_s13 }
  0x38   : > { %p5654_p5 = pnand %p5653_p0, %p5652_p13 }
  0x39   : > { %p5659_p6 = por %p5658_p2, %p5657_p1 }
  0x3a   : > { %p5655_p10 = pneg %p5654_p5 }
  0x3c   : > { %p5660_p12 = pnand %p5659_p6, %p5655_p10 }
  0x3e   : > { %5663 = shalt.err (!%p5660_p12)
}
  0x3f   : > { %s5664_s28 = scalar_lea.vmem %s5886_s10, 4096  ;;  %s5753_s6 = smov [#allocation3]  }
  0x40   : > { %p5665_p7 = scmp.ne.s32.totalorder %s5886_s10, %s5664_s28  ;;  %s5669_s7 = sshll.u32 %s5753_s6, 4  ;;  %s5670_s7 = int_to_ptr.vmem [resolvable:$false] %s5669_s7 }
  0x41   : > { %s5671_s9 = scalar_lea.vmem %s5670_s7, 8192  ;;  %p5672_p5 = scmp.lt.s32.totalorder %s5886_s10, %s5670_s7 }
  0x42   : > { %p5667_p9 = pnand %p5665_p7, %p5653_p0  ;;  %p5673_p3 = scmp.lt.s32.totalorder %s5671_s9, %s5664_s28 }
  0x44   : > { %p5668_p13 = pneg %p5667_p9  ;;  %p5674_p4 = por %p5673_p3, %p5672_p5 }
  0x46   : > { %p5675_p8 = pnand %p5674_p4, %p5668_p13 }
  0x48   : > { %5678 = shalt.err (!%p5675_p8)
}
  0x49   : > { %s5754_s13 = smov 128   ;;  %s5755_s14 = smov 8  }
  0x4a   : > { %5342 = dma.hbm_to_vmem [thread:$0]  (!%p5888_p11), %s5884_s8, 4096, %s5886_s10, %s5892_s12, %s5754_s13, %s5754_s13, %s5755_s14  }
  0x4b   : > { %p7175_p0 = scmp.ne.s32.totalorder %s7170_s26, 0 }
  0x4c   : > { %s5916_s16 = sand.u32 (!%p7175_p0), 1, %s5739_s19   ;;  %p7176_p4 = scmp.ne.s32.totalorder (!%p7175_p0), %s7168_s24, 0 }
  0x4d   : > { %231 = sbr.rel (%p7175_p0) target bundleno = 854 (0x356), region = 40  ;;  %s4413_s17 = sshll.u32 (!%p7175_p0), %s5916_s16, 8 }
  0x4e   : > { %s234_s29 = scalar_lea.sflag (!%p7175_p0), [#allocation4], %s5916_s16  ;;  %s5922_s30 = scalar_lea.vmem (!%p7175_p0), [#allocation3], %s4413_s17 }
  0x52   : > { %5722 = dma.done.wait (%p7176_p4), %s234_s29, 4096  }
  0x53   : > { %5724 = vsyncadd (%p7176_p4), %s234_s29, 4294963200  ;;  %p7177_p8 = scmp.eq.s32.totalorder %s5810_s22, 0 }
  0x55   : > { %5726 = dma.done.wait (%p7177_p8), [#allocation7], 10240   ;;  %p7178_p3 = pmov %p7177_p8 }
  0x56   : > { %v5393_v0 = vld [vmem:[#allocation6 + $0x138] sm:$0xff]   ;;  %v5396_v3 = vld [vmem:[#allocation6 + $0x130] sm:$0xff]   ;;  %vm274_vm0 = vsmask.f32 256  ;;  %v5399_v6 = vld [vmem:[#allocation6 + $0x128] sm:$0xff]   ;;  %vm273_vm1 = vcmask 1040384  }
  0x57   : > { %5728 = vsyncadd (%p7178_p3), [#allocation7], 4294957056  ;;  %v5394_v1 = vld [vmem:[#allocation6 + $0x178] sm:$0xff]   ;;  %4756 = vmatprep.subr.bf16.mxu0 %v5393_v0  ;;  %v5397_v4 = vld [vmem:[#allocation6 + $0x170] sm:$0xff]   ;;  %vm324_vm3 = vsmask.f32 7938 }
  0x58   : > { %v5395_v2 = vld [vmem:[#allocation6 + $0xf8] sm:$0xff]   ;;  %5144 = vmatprep.subr.bf16.mxu1 %v5394_v1  ;;  %v5398_v5 = vld [vmem:[#allocation6 + $0xf0] sm:$0xff]   ;;  %v5400_v7 = vld [vmem:[#allocation6 + $0x168] sm:$0xff]   ;;  %vm534_vm5 = vsmask.f32 4368  ;;  %vm856_vm6 = vcmask 1043456  }
  0x59   : > { %4757 = vmatpush3.bf16.msra.mxu0 %v5395_v2  ;;  %5145 = vmatpush3.bf16.msra.mxu1 %v5394_v1  ;;  %v5401_v8 = vld [vmem:[#allocation6 + $0xe8] sm:$0xff]   ;;  %v5402_v9 = vld [vmem:[#allocation6 + $0x120] sm:$0xff]   ;;  %v5405_v12 = vld [vmem:[#allocation6 + $0x118] sm:$0xff]   ;;  %vm1408_vm9 = vcmask 1046528   ;;  %vm1183_vm10 = vsmask.f32 7424 }
  0x5a   : > { %4758 = vmatprep.subr.bf16.mxu0 %v5396_v3  ;;  %5146 = vmatprep.subr.bf16.mxu1 %v5397_v4  ;;  %v5403_v10 = vld [vmem:[#allocation6 + $0x160] sm:$0xff]   ;;  %v5406_v13 = vld [vmem:[#allocation6 + $0x158] sm:$0xff]   ;;  %vm5934_vm2 = vmand %vm273_vm1, %vm274_vm0  ;;  %s6955_s11 = scalar_lea.vmem [#allocation9], %s4413_s17  ;;  %s4755_s12 = sshll.u32 %s5810_s22, 12 }
  0x5b   : > { %v5404_v11 = vld [vmem:[#allocation6 + $0xe0] sm:$0xff]   ;;  %v5407_v15 = vld [vmem:[#allocation6 + $0xd8] sm:$0xff]   ;;  %v5408_v16 = vld [vmem:[#allocation6 + $0x110] sm:$0xff]   ;;  %s4312_s28 = sshll.u32 %s6955_s11, 4  ;;  %s7111_s9 = scalar_lea.hbm %s7163_s5, %s4755_s12  ;;  %s7113_s28 = int_to_ptr.vmem [resolvable:$true] %s4312_s28 }
  0x5c   : > { %v5409_v17 = vld [vmem:[#allocation6 + $0x150] sm:$0xff]   ;;  %vm5940_vm4 = vmand %vm273_vm1, %vm324_vm3  ;;  %v5411_v20 = vld [vmem:[#allocation6 + $0x108] sm:$0xff]   ;;  %s4299_s22 = scalar_lea.sflag [#allocation5], %s5916_s16  ;;  %s5679_s13 = scalar_lea.vmem %s7113_s28, 4096 }
  0x5d   : > { %4759 = vmatpush3.bf16.msra.mxu0 %v5398_v5  ;;  %5147 = vmatpush3.bf16.msra.mxu1 %v5397_v4  ;;  %v5410_v19 = vld [vmem:[#allocation6 + $0xd0] sm:$0xff]   ;;  %v5412_v21 = vld [vmem:[#allocation6 + $0x148] sm:$0xff]   ;;  %v5414_v23 = vld [vmem:[#allocation6 + $0x100] sm:$0xff]   ;;  %p5680_p11 = scmp.ne.s32.totalorder %s7113_s28, %s5679_s13  ;;  %p7187_p10 = scmp.ne.s32.totalorder %s7173_s23, 0 }
  0x5e   : > { %4760 = vmatprep.subr.bf16.mxu0 %v5399_v6  ;;  %5148 = vmatprep.subr.bf16.mxu1 %v5400_v7  ;;  %v5413_v22 = vld [vmem:[#allocation6 + $0xc8] sm:$0xff]   ;;  %v5415_v24 = vld [vmem:[#allocation6 + $0x140] sm:$0xff]   ;;  %v329_v26 = vld [vmem:[#allocation2 + $0x14] sm:$0x1]  ;;  %s5756_s14 = smov [#allocation9]  }
  0x5f   : > { %v279_v25 = vld [vmem:[#allocation2 + $0xc] sm:$0x1]  ;;  %v376_v27 = vld [vmem:[%s5922_s30 + $0x10] sm:$0xff]  ;;  %v330_v29 = vsel %vm5940_vm4, 0, %v329_v26  ;;  %v377_v30 = vld [vmem:[%s5922_s30 + $0x18] sm:$0xff]  ;;  %p5681_p1 = pnand %p5680_p11, %p7187_p10  ;;  %s5683_s17 = sshll.u32 %s5756_s14, 4  ;;  %s5684_s17 = int_to_ptr.vmem [resolvable:$false] %s5683_s17 }
  0x60   : > { %v280_v28 = vsel %vm5934_vm2, 0, %v279_v25  ;;  %v408_v31 = vmax.f32 %v376_v27, 0.0  ;;  %v282_v32 = vld [vmem:[#allocation2 + $0x18] sm:$0x1]  ;;  %331 = vst [vmem:[#allocation2 + $0x14] sm:$0x1] %v330_v29  ;;  %vm5966_vm7 = vmand %vm856_vm6, %vm324_vm3  ;;  %p5686_p6 = scmp.lt.s32.totalorder %s7113_s28, %s5684_s17 }
  0x61   : > { %4761 = vmatpush3.bf16.msra.mxu0 %v5401_v8  ;;  %5149 = vmatpush3.bf16.msra.mxu1 %v5400_v7  ;;  %281 = vst [vmem:[#allocation2 + $0xc] sm:$0x1] %v280_v28  ;;  %v409_v33 = vmax.f32 %v377_v30, 0.0  ;;  %v283_v34 = vsel %vm5934_vm2, 0, %v282_v32  ;;  %v332_v35 = vld [vmem:[#allocation2 + $0x20] sm:$0x1]  ;;  %vm5972_vm8 = vmor %vm274_vm0, %vm534_vm5  ;;  %p5682_p2 = pneg %p5681_p1 }
  0x62   : > { %4762 = vmatprep.subr.bf16.mxu0 %v5402_v9  ;;  %5150 = vmatprep.subr.bf16.mxu1 %v5403_v10  ;;  %v378_v36 = vld [vmem:[%s5922_s30 + $0x20] sm:$0xff]  ;;  %v379_v37 = vld [vmem:[%s5922_s30 + $0x28] sm:$0xff]  ;;  %v4725_v39 = vpack.c.bf16 %v408_v31, %v408_v31  ;;  %284 = vst [vmem:[#allocation2 + $0x18] sm:$0x1] %v283_v34  ;;  %v333_v40 = vsel %vm5940_vm4, 0, %v332_v35  ;;  %v5956_v50 = vld [vmem:[#allocation6 + $0xb8] sm:$0xff]  }
  0x63   : > { %v5416_v38 = vld [vmem:[#allocation6 + $0xc0] sm:$0xff]   ;;  %v410_v41 = vmax.f32 %v378_v36, 0.0  ;;  %v411_v42 = vmax.f32 %v379_v37, 0.0  ;;  %v4726_v43 = vpack.c.bf16 %v409_v33, %v409_v33  ;;  %334 = vst [vmem:[#allocation2 + $0x20] sm:$0x1] %v333_v40  ;;  %v380_v51 = vld [vmem:[%s5922_s30 + $0x30] sm:$0xff] }
  0x64   : > { %v285_v44 = vld [vmem:[#allocation2 + $0x24] sm:$0x1]  ;;  %v335_v45 = vld [vmem:[#allocation2 + $0x2c] sm:$0x1]  ;;  %v554_v46 = vshrl.u32 %v4725_v39, 16  ;;  %v557_v47 = vshll.u32 %v4725_v39, 16 }
  0x65   : > { %4763 = vmatpush3.bf16.msra.mxu0 %v5404_v11  ;;  %5151 = vmatpush3.bf16.msra.mxu1 %v5403_v10  ;;  %v4727_v48 = vpack.c.bf16 %v410_v41, %v410_v41  ;;  %v4728_v49 = vpack.c.bf16 %v411_v42, %v411_v42  ;;  %v381_v52 = vld [vmem:[%s5922_s30 + $0x38] sm:$0xff]  ;;  %v562_v53 = vshrl.u32 %v4726_v43, 16  ;;  %v565_v54 = vshll.u32 %v4726_v43, 16  ;;  %v382_v26 = vld [vmem:[%s5922_s30 + $0x40] sm:$0xff]  ;;  %v383_v32 = vld [vmem:[%s5922_s30 + $0x48] sm:$0xff]  ;;  %s5685_s29 = scalar_lea.vmem %s5684_s17, 8192 }
  0x66   : > { %4764 = vmatprep.subr.bf16.mxu0 %v5405_v12  ;;  %5152 = vmatprep.subr.bf16.mxu1 %v5406_v13  ;;  %v286_v55 = vsel %vm5934_vm2, 0, %v285_v44  ;;  %v336_v56 = vsel %vm5940_vm4, 0, %v335_v45  ;;  %v556_v57 = vrot.slane %v554_v46, 7  ;;  %v412_v0 = vmax.f32 %v380_v51, 0.0  ;;  %v338_v25 = vld [vmem:[#allocation2 + $0x38] sm:$0x1]  ;;  %p5687_p12 = scmp.lt.s32.totalorder %s5685_s29, %s5679_s13 }
  0x67   : > { %v571_v58 = vshrl.u32 %v4727_v48, 16  ;;  %v574_v59 = vshll.u32 %v4727_v48, 16  ;;  %v579_v60 = vshrl.u32 %v4728_v49, 16  ;;  %287 = vst [vmem:[#allocation2 + $0x24] sm:$0x1] %v286_v55  ;;  %v564_v61 = vrot.slane %v562_v53, 7 }
  0x68   : > { %337 = vst [vmem:[#allocation2 + $0x2c] sm:$0x1] %v336_v56  ;;  %v582_v63 = vshll.u32 %v4728_v49, 16  ;;  %v413_v1 = vmax.f32 %v381_v52, 0.0  ;;  %v559_v3 = vor.u32 %v557_v47, %v556_v57  ;;  %v560_v4 = vrot.slane %v556_v57, 4  ;;  %v385_v39 = vld [vmem:[%s5922_s30 + $0x58] sm:$0xff]  ;;  %p5688_p7 = por %p5687_p12, %p5686_p6 }
  0x69   : > { %4765 = vmatpush3.bf16.msra.mxu0 %v5407_v15  ;;  %5153 = vmatpush3.bf16.msra.mxu1 %v5406_v13  ;;  %v865_v5 = vld [vmem:[#allocation2 + $0xc] sm:$0xf]  ;;  %v869_v6 = vld [vmem:[#allocation2 + $0x14] sm:$0x1]  ;;  %v573_v7 = vrot.slane %v571_v58, 7  ;;  %v567_v8 = vor.u32 %v565_v54, %v564_v61  ;;  %v569_v9 = vrot.slane %v564_v61, 4  ;;  %v4729_v12 = vpack.c.bf16 %v412_v0, %v412_v0 }
  0x6a   : > { %4766 = vmatprep.subr.bf16.mxu0 %v5408_v16  ;;  %5154 = vmatprep.subr.bf16.mxu1 %v5409_v17  ;;  %v581_v10 = vrot.slane %v579_v60, 7  ;;  %v872_v11 = vld [vmem:[#allocation2 + $0x18] sm:$0xf]  ;;  %v866_v13 = vsel %vm5966_vm7, %v559_v3, %v865_v5  ;;  %v291_v27 = vld [vmem:[#allocation2 + $0x3c] sm:$0x1]  ;;  %v339_v44 = vsel %vm5940_vm4, 0, %v338_v25  ;;  %p5689_p9 = pnand %p5688_p7, %p5682_p2 }
  0x6b   : > { %v576_v15 = vor.u32 %v574_v59, %v573_v7  ;;  %v577_v16 = vrot.slane %v573_v7, 4  ;;  %867 = vst [vmem:[#allocation2 + $0xc] sm:$0xf] %v866_v13  ;;  %v588_v29 = vshrl.u32 %v4729_v12, 16  ;;  %v591_v30 = vshll.u32 %v4729_v12, 16 }
  0x6c   : > { %v341_v33 = vld [vmem:[#allocation2 + $0x44] sm:$0x1]  ;;  %v294_v40 = vld [vmem:[#allocation2 + $0x48] sm:$0x1]  ;;  %v414_v45 = vmax.f32 %v382_v26, 0.0  ;;  %v415_v47 = vmax.f32 %v383_v32, 0.0 }
  0x6d   : > { %4767 = vmatpush3.bf16.msra.mxu0 %v5410_v19  ;;  %5155 = vmatpush3.bf16.msra.mxu1 %v5409_v17  ;;  %v876_v17 = vld [vmem:[#allocation2 + $0x20] sm:$0x1]  ;;  %v4730_v19 = vpack.c.bf16 %v413_v1, %v413_v1  ;;  %v873_v28 = vsel %vm5966_vm7, %v576_v15, %v872_v11  ;;  %v590_v41 = vrot.slane %v588_v29, 7  ;;  %340 = vst [vmem:[#allocation2 + $0x38] sm:$0x1] %v339_v44  ;;  %v292_v48 = vsel %vm5934_vm2, 0, %v291_v27 }
  0x6e   : > { %4768 = vmatprep.subr.bf16.mxu0 %v5411_v20  ;;  %5156 = vmatprep.subr.bf16.mxu1 %v5412_v21  ;;  %v288_v20 = vld [vmem:[#allocation2 + $0x30] sm:$0x1]  ;;  %874 = vst [vmem:[#allocation2 + $0x18] sm:$0xf] %v873_v28  ;;  %v879_v43 = vld [vmem:[#allocation2 + $0x24] sm:$0xf]  ;;  %v4731_v55 = vpack.c.bf16 %v414_v45, %v414_v45  ;;  %v4732_v56 = vpack.c.bf16 %v415_v47, %v415_v47 }
  0x6f   : > { %v596_v31 = vshrl.u32 %v4730_v19, 16  ;;  %v599_v36 = vshll.u32 %v4730_v19, 16  ;;  %v289_v37 = vsel %vm5934_vm2, 0, %v288_v20  ;;  %v883_v46 = vld [vmem:[#allocation2 + $0x2c] sm:$0x1]  ;;  %v342_v49 = vsel %vm5940_vm4, 0, %v341_v33 }
  0x70   : > { %290 = vst [vmem:[#allocation2 + $0x30] sm:$0x1] %v289_v37  ;;  %v593_v51 = vor.u32 %v591_v30, %v590_v41  ;;  %v594_v52 = vrot.slane %v590_v41, 4  ;;  %293 = vst [vmem:[#allocation2 + $0x3c] sm:$0x1] %v292_v48  ;;  %v417_v58 = vmax.f32 %v385_v39, 0.0 }
  0x71   : > { %4769 = vmatpush3.bf16.msra.mxu0 %v5413_v22  ;;  %5157 = vmatpush3.bf16.msra.mxu1 %v5412_v21  ;;  %v568_v21 = vsel %vm5972_vm8, %v560_v4, %v567_v8  ;;  %v870_v22 = vsel %vm5934_vm2, %v569_v9, %v869_v6  ;;  %v598_v42 = vrot.slane %v596_v31, 7  ;;  %343 = vst [vmem:[#allocation2 + $0x44] sm:$0x1] %v342_v49  ;;  %v295_v1 = vsel %vm5934_vm2, 0, %v294_v40  ;;  %v5444_v49 = vld [vmem:[#allocation6 + $0x38] sm:$0xff]  }
  0x72   : > { %4770 = vmatprep.subr.bf16.mxu0 %v5414_v23  ;;  %5158 = vmatprep.subr.bf16.mxu1 %v5415_v24  ;;  %v584_v23 = vor.u32 %v582_v63, %v581_v10  ;;  %868 = vst [vmem:[#allocation2 + $0x10] sm:$0xf] %v568_v21  ;;  %871 = vst [vmem:[#allocation2 + $0x14] sm:$0x1] %v870_v22  ;;  %v1514_v59 = vld [vmem:[#allocation2 + $0xc] sm:$0xf]  ;;  %v880_v63 = vsel %vm5966_vm7, %v593_v51, %v879_v43 }
  0x73   : > { %v601_v53 = vor.u32 %v599_v36, %v598_v42  ;;  %v603_v54 = vrot.slane %v598_v42, 4  ;;  %v1556_v60 = vld [vmem:[#allocation2 + $0xc] sm:$0xe]  ;;  %881 = vst [vmem:[#allocation2 + $0x24] sm:$0xf] %v880_v63  ;;  %v605_v4 = vshrl.u32 %v4731_v55, 16  ;;  %v6011_v15 = vpack.c.bf16 %v417_v58, %v417_v58 }
  0x74   : > { %v585_v34 = vsel %vm5972_vm8, %v577_v16, %v584_v23  ;;  %v608_v5 = vshll.u32 %v4731_v55, 16  ;;  %296 = vst [vmem:[#allocation2 + $0x48] sm:$0x1] %v295_v1  ;;  %v616_v29 = vshll.u32 %v4732_v56, 16  ;;  %v890_v42 = vld [vmem:[#allocation2 + $0x38] sm:$0x1] }
  0x75   : > { %4771 = vmatpush3.bf16.msra.mxu0 %v5416_v38  ;;  %5159 = vmatpush3.bf16.msra.mxu1 %v5415_v24  ;;  %v586_v24 = vrot.slane %v581_v10, 4  ;;  %v384_v38 = vld [vmem:[%s5922_s30 + $0x50] sm:$0xff]  ;;  %875 = vst [vmem:[#allocation2 + $0x1c] sm:$0xf] %v585_v34  ;;  %v602_v61 = vsel %vm5972_vm8, %v594_v52, %v601_v53  ;;  %v884_v0 = vsel %vm5934_vm2, %v603_v54, %v883_v46  ;;  %v1516_v9 = vld [vmem:[#allocation2 + $0x18] sm:$0xf] }
  0x76   : > { %5188 = vmatprep.subr.bf16.mxu0 %v5956_v50  ;;  %v416_v57 = vmax.f32 %v384_v38, 0.0  ;;  %882 = vst [vmem:[#allocation2 + $0x28] sm:$0xf] %v602_v61  ;;  %885 = vst [vmem:[#allocation2 + $0x2c] sm:$0x1] %v884_v0  ;;  %v613_v10 = vshrl.u32 %v4732_v56, 16 }
  0x77   : > { %v877_v35 = vsel %vm5934_vm2, %v586_v24, %v876_v17  ;;  %v1557_v12 = vld [vmem:[#allocation2 + $0x18] sm:$0xe]  ;;  %v607_v25 = vrot.slane %v605_v4, 7  ;;  %v886_v34 = vld [vmem:[#allocation2 + $0x30] sm:$0xf]  ;;  %v386_v63 = vld [vmem:[%s5922_s30 + $0x60] sm:$0xff] }
  0x78   : > { %878 = vst [vmem:[#allocation2 + $0x20] sm:$0x1] %v877_v35  ;;  %v6009_v13 = vpack.c.bf16 %v416_v57, %v416_v57  ;;  %v615_v28 = vrot.slane %v613_v10, 7  ;;  %v5443_v35 = vld [vmem:[#allocation6 + $0x78] sm:$0xff]   ;;  %v5430_v43 = vld [vmem:[#allocation6 + $0xb0] sm:$0xff]   ;;  %v387_v0 = vld [vmem:[%s5922_s30 + $0x68] sm:$0xff] }
  0x79   : > { %v1515_v3 = vld [vmem:[#allocation2 + $0x10] sm:$0xf]  ;;  %v5418_v7 = vld [vmem:[#allocation2 + $0x14] ss:$0 sps:$4 sm:$0x11]   ;;  %v610_v41 = vor.u32 %v608_v5, %v607_v25  ;;  %v611_v47 = vrot.slane %v607_v25, 4  ;;  %4878 = vmatprep.subr.bf16.mxu1 %v5443_v35 }
  0x7a   : > { %v4496_v6 = vcombine.low %v1514_v59, %v1515_v3  ;;  %v4524_v8 = vcombine.low %v1556_v60, %v1515_v3  ;;  %v1704_v19 = vshll.u32 %v5418_v7, 16  ;;  %v1921_v21 = vrot.slane %v5418_v7, 1  ;;  %v1518_v39 = vld [vmem:[#allocation2 + $0x24] sm:$0xf]  ;;  %v5445_v56 = vld [vmem:[#allocation6 + $0x70] sm:$0xff]  }
  0x7b   : > { %v1558_v45 = vld [vmem:[#allocation2 + $0x24] sm:$0xe]  ;;  %v618_v48 = vor.u32 %v616_v29, %v615_v28  ;;  %v620_v58 = vrot.slane %v615_v28, 4  ;;  %v887_v59 = vsel %vm5966_vm7, %v610_v41, %v886_v34  ;;  %v344_v61 = vld [vmem:[#allocation2 + $0x50] sm:$0x1]  ;;  %v633_v25 = vshll.u32 %v6011_v15, 16 }
  0x7c   : > { %v1517_v11 = vld [vmem:[#allocation2 + $0x1c] sm:$0xf]  ;;  %v1697_v16 = vshrl.u32 %v4496_v6, 16  ;;  %v1699_v17 = vshll.u32 %v4496_v6, 16  ;;  %v1920_v20 = vrot.slane %v4524_v8, 1  ;;  %v1706_v27 = vrot.slane %v1704_v19, 1 }
  0x7d   : > { %v6013_v22 = vcombine.low %v1516_v9, %v1517_v11  ;;  %v4525_v24 = vcombine.low %v1557_v12, %v1517_v11  ;;  %v1519_v40 = vld [vmem:[#allocation2 + $0x28] sm:$0xf]  ;;  %v5425_v54 = vld [vmem:[#allocation2 + $0x2c] ss:$0 sps:$4 sm:$0x11]   ;;  %v619_v57 = vsel %vm5972_vm8, %v611_v47, %v618_v48  ;;  %v891_v10 = vsel %vm5934_vm2, %v620_v58, %v890_v42  ;;  %v388_v48 = vld [vmem:[%s5922_s30 + $0x70] sm:$0xff] }
  0x7e   : > { %v1701_v26 = vrot.slane %v1699_v17, 1  ;;  %v1922_v30 = vsel %vm1408_vm9, %v1920_v20, %v1921_v21  ;;  %v6019_v46 = vcombine.low %v1518_v39, %v1519_v40  ;;  %v4526_v55 = vcombine.low %v1558_v45, %v1519_v40  ;;  %888 = vst [vmem:[#allocation2 + $0x30] sm:$0xf] %v887_v59  ;;  %889 = vst [vmem:[#allocation2 + $0x34] sm:$0xf] %v619_v57  ;;  %v5446_v9 = vld [vmem:[#allocation6 + $0xa8] sm:$0xff]  }
  0x7f   : > { %v5421_v23 = vld [vmem:[#allocation2 + $0x20] ss:$0 sps:$4 sm:$0x11]   ;;  %v1923_v31 = vrot.slane %v4525_v24, 1  ;;  %v1709_v33 = vshrl.u32 %v6013_v22, 16  ;;  %5160 = vmatprep.mubr.bf16.mxu1 %v1922_v30  ;;  %v1711_v37 = vshll.u32 %v6013_v22, 16 }
  0x80   : > { %v1924_v32 = vrot.slane %v5421_v23, 1  ;;  %v1702_v36 = vor.u32 %v1701_v26, %v1697_v16  ;;  %v1716_v38 = vshll.u32 %v5421_v23, 16  ;;  %v1721_v60 = vshrl.u32 %v6019_v46, 16  ;;  %v297_v7 = vld [vmem:[#allocation2 + $0x54] sm:$0x1] }
  0x81   : > { %v1713_v52 = vrot.slane %v1711_v37, 1  ;;  %v1926_v3 = vrot.slane %v4526_v55, 1  ;;  %v1927_v4 = vrot.slane %v5425_v54, 1  ;;  %v1723_v5 = vshll.u32 %v6019_v46, 16  ;;  %v347_v8 = vld [vmem:[#allocation2 + $0x5c] sm:$0x1] }
  0x82   : > { %v1925_v44 = vsel %vm1408_vm9, %v1923_v31, %v1924_v32  ;;  %v1707_v51 = vsel %vm1183_vm10, %v1702_v36, %v1706_v27  ;;  %v1718_v53 = vrot.slane %v1716_v38, 1  ;;  %v1728_v11 = vshll.u32 %v5425_v54, 16  ;;  %v5447_v16 = vld [vmem:[#allocation6 + $0x30] sm:$0xff]   ;;  %892 = vst [vmem:[#allocation2 + $0x38] sm:$0x1] %v891_v10 }
  0x83   : > { %5161 = vmatmul.mubr.bf16.vlgmr.msra.gmra.mxu1 %v1925_v44  ;;  %2201 = vmatprep.mubr.bf16.mxu0 %v1707_v51  ;;  %v1714_v1 = vor.u32 %v1713_v52, %v1709_v33  ;;  %v622_v12 = vshrl.u32 %v6009_v13, 16  ;;  %v1928_v19 = vsel %vm1408_vm9, %v1926_v3, %v1927_v4  ;;  %v1725_v20 = vrot.slane %v1723_v5, 1  ;;  %v893_v23 = vld [vmem:[#allocation2 + $0x3c] sm:$0xf]  ;;  %v897_v26 = vld [vmem:[#allocation2 + $0x44] sm:$0x1] }
  0x84   : > { %4879 = vmatpush3.bf16.msra.mxu1 %v5444_v49  ;;  %2202 = vmatmul.mubr.bf16.vlgmr.msra.gmra.mxu0 %v4496_v6  ;;  %v625_v6 = vshll.u32 %v6009_v13, 16  ;;  %v630_v21 = vshrl.u32 %v6011_v15, 16  ;;  %v345_v13 = vsel %vm5940_vm4, 0, %v344_v61  ;;  %v418_v29 = vmax.f32 %v386_v63, 0.0  ;;  %v389_v49 = vld [vmem:[%s5922_s30 + $0x78] sm:$0xff] }
  0x85   : > { %4880 = vmatprep.subr.bf16.mxu1 %v5445_v56  ;;  %5189 = vmatpush3.bf16.msra.mxu0 %v5956_v50  ;;  %v1719_v17 = vsel %vm1183_vm10, %v1714_v1, %v1718_v53  ;;  %v1730_v50 = vrot.slane %v1728_v11, 1  ;;  %v624_v24 = vrot.slane %v622_v12, 7  ;;  %v1726_v27 = vor.u32 %v1725_v20, %v1721_v60  ;;  %346 = vst [vmem:[#allocation2 + $0x50] sm:$0x1] %v345_v13  ;;  %v1520_v38 = vld [vmem:[#allocation2 + $0x30] sm:$0xf] }
  0x86   : > { %5190 = vmatprep.subr.bf16.mxu0 %v5430_v43  ;;  %2209 = vmatprep.mubr.bf16.mxu0 %v1719_v17  ;;  %v632_v28 = vrot.slane %v630_v21, 7  ;;  %v419_v30 = vmax.f32 %v387_v0, 0.0  ;;  %v298_v33 = vsel %vm5934_vm2, 0, %v297_v7  ;;  %v348_v34 = vsel %vm5940_vm4, 0, %v347_v8  ;;  %v1521_v39 = vld [vmem:[#allocation2 + $0x34] sm:$0xf] }
  0x87   : > { %5164 = vmatprep.mubr.bf16.mxu1 %v1928_v19  ;;  %v627_v31 = vor.u32 %v625_v6, %v624_v24  ;;  %v628_v32 = vrot.slane %v624_v24, 4  ;;  %v1731_v15 = vsel %vm1183_vm10, %v1726_v27, %v1730_v50  ;;  %v4735_v37 = vpack.c.bf16 %v418_v29, %v418_v29  ;;  %299 = vst [vmem:[#allocation2 + $0x54] sm:$0x1] %v298_v33  ;;  %v1559_v40 = vld [vmem:[#allocation2 + $0x30] sm:$0xe]  ;;  %v390_v11 = vld [vmem:[%s5922_s30 + $0x80] sm:$0xff] }
  0x88   : > { %4881 = vmatpush3.bf16.msra.mxu1 %v5447_v16  ;;  %v635_v35 = vor.u32 %v633_v25, %v632_v28  ;;  %v637_v36 = vrot.slane %v632_v28, 4  ;;  %349 = vst [vmem:[#allocation2 + $0x5c] sm:$0x1] %v348_v34  ;;  %v4736_v42 = vpack.c.bf16 %v419_v30, %v419_v30  ;;  %v4527_v44 = vcombine.low %v1559_v40, %v1521_v39  ;;  %v300_v60 = vld [vmem:[#allocation2 + $0x60] sm:$0x1]  ;;  %v391_v19 = vld [vmem:[%s5922_s30 + $0x88] sm:$0xff] }
  0x89   : > { %5191 = vmatpush3.bf16.msra.mxu0 %v5430_v43  ;;  %v894_v41 = vsel %vm5966_vm7, %v627_v31, %v893_v23  ;;  %v6049_v43 = vcombine.low %v1520_v38, %v1521_v39  ;;  %v5428_v51 = vld [vmem:[#allocation2 + $0x38] ss:$0 sps:$4 sm:$0x11]   ;;  %v639_v52 = vshrl.u32 %v4735_v37, 16  ;;  %v900_v63 = vld [vmem:[#allocation2 + $0x48] sm:$0xf] }
  0x8a   : > { %5192 = vmatprep.subr.bf16.mxu0 %v5446_v9  ;;  %v636_v45 = vsel %vm5972_vm8, %v628_v32, %v635_v35  ;;  %895 = vst [vmem:[#allocation2 + $0x3c] sm:$0xf] %v894_v41  ;;  %v898_v47 = vsel %vm5934_vm2, %v637_v36, %v897_v26  ;;  %v1929_v53 = vrot.slane %v4527_v44, 1  ;;  %v647_v54 = vshrl.u32 %v4736_v42, 16  ;;  %v350_v10 = vld [vmem:[#allocation2 + $0x68] sm:$0x1] }
  0x8b   : > { %896 = vst [vmem:[#allocation2 + $0x40] sm:$0xf] %v636_v45  ;;  %899 = vst [vmem:[#allocation2 + $0x44] sm:$0x1] %v898_v47  ;;  %v650_v55 = vshll.u32 %v4736_v42, 16  ;;  %v1930_v56 = vrot.slane %v5428_v51, 1 }
  0x8c   : > { %2210 = vmatmul.mubr.bf16.gmra.mxu0 %v6013_v22  ;;  %v642_v22 = vshll.u32 %v4735_v37, 16  ;;  %v641_v57 = vrot.slane %v639_v52, 7  ;;  %v1733_v58 = vshrl.u32 %v6049_v43, 16  ;;  %v1735_v59 = vshll.u32 %v6049_v43, 16  ;;  %v904_v8 = vld [vmem:[#allocation2 + $0x50] sm:$0x1] }
  0x8d   : > { %2217 = vmatprep.mubr.bf16.mxu0 %v1731_v15  ;;  %5193 = vmatpush3.bf16.msra.mxu0 %v5446_v9  ;;  %v649_v61 = vrot.slane %v647_v54, 7  ;;  %v1740_v0 = vshll.u32 %v5428_v51, 16  ;;  %v420_v1 = vmax.f32 %v388_v48, 0.0  ;;  %v421_v3 = vmax.f32 %v389_v49, 0.0  ;;  %v5454_v20 = vld [vmem:[#allocation6 + $0x68] sm:$0xff]  }
  0x8e   : > { %v1931_v4 = vsel %vm1408_vm9, %v1929_v53, %v1930_v56  ;;  %v644_v5 = vor.u32 %v642_v22, %v641_v57  ;;  %v645_v7 = vrot.slane %v641_v57, 4  ;;  %v1737_v9 = vrot.slane %v1735_v59, 1  ;;  %v5455_v13 = vld [vmem:[#allocation6 + $0x28] sm:$0xff]   ;;  %4882 = vmatprep.subr.bf16.mxu1 %v5454_v20  ;;  %v907_v35 = vld [vmem:[#allocation2 + $0x54] sm:$0xf] }
  0x8f   : > { %5165 = vmatmul.mubr.bf16.gmra.mxu1 %v1931_v4  ;;  %v652_v12 = vor.u32 %v650_v55, %v649_v61  ;;  %v654_v6 = vrot.slane %v649_v61, 4  ;;  %v1742_v16 = vrot.slane %v1740_v0, 1  ;;  %v4737_v17 = vpack.c.bf16 %v420_v1, %v420_v1  ;;  %v911_v38 = vld [vmem:[#allocation2 + $0x5c] sm:$0x1]  ;;  %v5456_v55 = vld [vmem:[#allocation6 + $0x60] sm:$0xff]  }
  0x90   : > { %v901_v50 = vsel %vm5966_vm7, %v644_v5, %v900_v63  ;;  %v1738_v24 = vor.u32 %v1737_v9, %v1733_v58  ;;  %v4738_v25 = vpack.c.bf16 %v421_v3, %v421_v3  ;;  %v301_v26 = vsel %vm5934_vm2, 0, %v300_v60  ;;  %4883 = vmatpush3.bf16.msra.mxu1 %v5455_v13  ;;  %v5457_v60 = vld [vmem:[#allocation6 + $0x20] sm:$0xff]   ;;  %v303_v4 = vld [vmem:[#allocation2 + $0x6c] sm:$0x1]  ;;  %v353_v5 = vld [vmem:[#allocation2 + $0x74] sm:$0x1] }
  0x91   : > { %v1522_v21 = vld [vmem:[#allocation2 + $0x3c] sm:$0xf]  ;;  %v653_v28 = vsel %vm5972_vm8, %v645_v7, %v652_v12  ;;  %902 = vst [vmem:[#allocation2 + $0x48] sm:$0xf] %v901_v50  ;;  %v905_v29 = vsel %vm5934_vm2, %v654_v6, %v904_v8  ;;  %v656_v30 = vshrl.u32 %v4737_v17, 16  ;;  %v659_v31 = vshll.u32 %v4737_v17, 16  ;;  %4884 = vmatprep.subr.bf16.mxu1 %v5456_v55 }
  0x92   : > { %v1560_v23 = vld [vmem:[#allocation2 + $0x3c] sm:$0xe]  ;;  %v1523_v27 = vld [vmem:[#allocation2 + $0x40] sm:$0xf]  ;;  %302 = vst [vmem:[#allocation2 + $0x60] sm:$0x1] %v301_v26 }
  0x93   : > { %v6071_v32 = vcombine.low %v1522_v21, %v1523_v27  ;;  %v6073_v33 = vld [vmem:[#allocation2 + $0x44] ss:$0 sps:$4 sm:$0x11]   ;;  %v4528_v34 = vcombine.low %v1560_v23, %v1523_v27  ;;  %903 = vst [vmem:[#allocation2 + $0x4c] sm:$0xf] %v653_v28  ;;  %v664_v15 = vshrl.u32 %v4738_v25, 16 }
  0x94   : > { %2218 = vmatmul.mubr.bf16.gmra.mxu0 %v6019_v46  ;;  %906 = vst [vmem:[#allocation2 + $0x50] sm:$0x1] %v905_v29  ;;  %v1743_v46 = vsel %vm1183_vm10, %v1738_v24, %v1742_v16  ;;  %v658_v36 = vrot.slane %v656_v30, 7  ;;  %v667_v37 = vshll.u32 %v4738_v25, 16  ;;  %v351_v39 = vsel %vm5940_vm4, 0, %v350_v10  ;;  %4885 = vmatpush3.bf16.msra.mxu1 %v5457_v60  ;;  %v392_v23 = vld [vmem:[%s5922_s30 + $0x90] sm:$0xff] }
  0x95   : > { %2225 = vmatprep.mubr.bf16.mxu0 %v1743_v46  ;;  %v422_v40 = vmax.f32 %v390_v11, 0.0  ;;  %v1932_v41 = vrot.slane %v4528_v34, 1  ;;  %v1933_v42 = vrot.slane %v6073_v33, 1  ;;  %v666_v44 = vrot.slane %v664_v15, 7  ;;  %352 = vst [vmem:[#allocation2 + $0x68] sm:$0x1] %v351_v39 }
  0x96   : > { %v423_v45 = vmax.f32 %v391_v19, 0.0  ;;  %v661_v47 = vor.u32 %v659_v31, %v658_v36  ;;  %v662_v48 = vrot.slane %v658_v36, 4  ;;  %v1745_v51 = vshrl.u32 %v6071_v32, 16  ;;  %v393_v50 = vld [vmem:[%s5922_s30 + $0x98] sm:$0xff]  ;;  %v394_v27 = vld [vmem:[%s5922_s30 + $0xa0] sm:$0xff]  ;;  %v395_v34 = vld [vmem:[%s5922_s30 + $0xa8] sm:$0xff] }
  0x97   : > { %v4739_v49 = vpack.c.bf16 %v422_v40, %v422_v40  ;;  %v1934_v52 = vsel %vm1408_vm9, %v1932_v41, %v1933_v42  ;;  %v669_v53 = vor.u32 %v667_v37, %v666_v44  ;;  %v671_v22 = vrot.slane %v666_v44, 4  ;;  %v306_v13 = vld [vmem:[#allocation2 + $0x78] sm:$0x1] }
  0x98   : > { %v4740_v54 = vpack.c.bf16 %v423_v45, %v423_v45  ;;  %5168 = vmatprep.mubr.bf16.mxu1 %v1934_v52  ;;  %v908_v56 = vsel %vm5966_vm7, %v661_v47, %v907_v35  ;;  %v1747_v59 = vshll.u32 %v6071_v32, 16  ;;  %v1561_v61 = vld [vmem:[#allocation2 + $0x48] sm:$0xe]  ;;  %v1752_v21 = vshll.u32 %v6073_v33, 16  ;;  %v356_v33 = vld [vmem:[#allocation2 + $0x80] sm:$0x1] }
  0x99   : > { %v673_v57 = vshrl.u32 %v4739_v49, 16  ;;  %v676_v58 = vshll.u32 %v4739_v49, 16  ;;  %v670_v63 = vsel %vm5972_vm8, %v662_v48, %v669_v53  ;;  %909 = vst [vmem:[#allocation2 + $0x54] sm:$0xf] %v908_v56  ;;  %v912_v0 = vsel %vm5934_vm2, %v671_v22, %v911_v38  ;;  %v914_v6 = vld [vmem:[#allocation2 + $0x60] sm:$0xf] }
  0x9a   : > { %v681_v1 = vshrl.u32 %v4740_v54, 16  ;;  %v684_v3 = vshll.u32 %v4740_v54, 16  ;;  %v1525_v7 = vld [vmem:[#allocation2 + $0x4c] sm:$0xf]  ;;  %910 = vst [vmem:[#allocation2 + $0x58] sm:$0xf] %v670_v63 }
  0x9b   : > { %913 = vst [vmem:[#allocation2 + $0x5c] sm:$0x1] %v912_v0  ;;  %v675_v8 = vrot.slane %v673_v57, 7  ;;  %v1749_v9 = vrot.slane %v1747_v59, 1  ;;  %v4529_v11 = vcombine.low %v1561_v61, %v1525_v7  ;;  %v1754_v29 = vrot.slane %v1752_v21, 1  ;;  %v5464_v38 = vld [vmem:[#allocation6 + $0x58] sm:$0xff]  }
  0x9c   : > { %2226 = vmatmul.mubr.bf16.gmra.mxu0 %v6049_v43  ;;  %v6089_v10 = vld [vmem:[#allocation2 + $0x50] ss:$0 sps:$4 sm:$0x11]   ;;  %v683_v12 = vrot.slane %v681_v1, 7  ;;  %v918_v19 = vld [vmem:[#allocation2 + $0x68] sm:$0x1]  ;;  %4886 = vmatprep.subr.bf16.mxu1 %v5464_v38 }
  0x9d   : > { %v678_v16 = vor.u32 %v676_v58, %v675_v8  ;;  %v679_v17 = vrot.slane %v675_v8, 4  ;;  %v1750_v20 = vor.u32 %v1749_v9, %v1745_v51  ;;  %v1935_v24 = vrot.slane %v4529_v11, 1  ;;  %v1524_v46 = vld [vmem:[#allocation2 + $0x48] sm:$0xf]  ;;  %v5465_v57 = vld [vmem:[#allocation6 + $0x18] sm:$0xff]  }
  0x9e   : > { %v1936_v43 = vrot.slane %v6089_v10, 1  ;;  %v686_v25 = vor.u32 %v684_v3, %v683_v12  ;;  %v688_v26 = vrot.slane %v683_v12, 4  ;;  %v304_v30 = vsel %vm5934_vm2, 0, %v303_v4  ;;  %4887 = vmatpush3.bf16.msra.mxu1 %v5465_v57  ;;  %v5466_v4 = vld [vmem:[#allocation6 + $0xa0] sm:$0xff]  }
  0x9f   : > { %v915_v28 = vsel %vm5966_vm7, %v678_v16, %v914_v6  ;;  %v354_v31 = vsel %vm5940_vm4, 0, %v353_v5  ;;  %305 = vst [vmem:[#allocation2 + $0x6c] sm:$0x1] %v304_v30  ;;  %v424_v37 = vmax.f32 %v392_v23, 0.0  ;;  %v1755_v40 = vsel %vm1183_vm10, %v1750_v20, %v1754_v29  ;;  %5194 = vmatprep.subr.bf16.mxu0 %v5466_v4  ;;  %v397_v30 = vld [vmem:[%s5922_s30 + $0xb8] sm:$0xff] }
  0xa0   : > { %v1937_v15 = vsel %vm1408_vm9, %v1935_v24, %v1936_v43  ;;  %v687_v35 = vsel %vm5972_vm8, %v679_v17, %v686_v25  ;;  %916 = vst [vmem:[#allocation2 + $0x60] sm:$0xf] %v915_v28  ;;  %v919_v36 = vsel %vm5934_vm2, %v688_v26, %v918_v19  ;;  %355 = vst [vmem:[#allocation2 + $0x74] sm:$0x1] %v354_v31  ;;  %v1562_v39 = vld [vmem:[#allocation2 + $0x54] sm:$0xe]  ;;  %2233 = vmatprep.mubr.bf16.mxu0 %v1755_v40 }
  0xa1   : > { %5169 = vmatmul.mubr.bf16.gmra.mxu1 %v1937_v15  ;;  %917 = vst [vmem:[#allocation2 + $0x64] sm:$0xf] %v687_v35  ;;  %920 = vst [vmem:[#allocation2 + $0x68] sm:$0x1] %v919_v36  ;;  %v425_v41 = vmax.f32 %v393_v50, 0.0  ;;  %v307_v42 = vsel %vm5934_vm2, 0, %v306_v13  ;;  %v4741_v45 = vpack.c.bf16 %v424_v37, %v424_v37  ;;  %v6115_v49 = vcombine.low %v1524_v46, %v1525_v7 }
  0xa2   : > { %v6111_v44 = vld [vmem:[#allocation2 + $0x58] sm:$0xf]  ;;  %308 = vst [vmem:[#allocation2 + $0x78] sm:$0x1] %v307_v42  ;;  %v357_v47 = vsel %vm5940_vm4, 0, %v356_v33  ;;  %v426_v48 = vmax.f32 %v394_v27, 0.0  ;;  %5195 = vmatpush3.bf16.msra.mxu0 %v5466_v4 }
  0xa3   : > { %v6117_v51 = vld [vmem:[#allocation2 + $0x5c] ss:$0 sps:$4 sm:$0x11]   ;;  %v4530_v52 = vcombine.low %v1562_v39, %v6111_v44  ;;  %v4742_v53 = vpack.c.bf16 %v425_v41, %v425_v41  ;;  %358 = vst [vmem:[#allocation2 + $0x80] sm:$0x1] %v357_v47  ;;  %v427_v22 = vmax.f32 %v395_v34, 0.0 }
  0xa4   : > { %2234 = vmatmul.mubr.bf16.gmra.mxu0 %v6071_v32  ;;  %v690_v54 = vshrl.u32 %v4741_v45, 16  ;;  %v693_v55 = vshll.u32 %v4741_v45, 16  ;;  %v4743_v56 = vpack.c.bf16 %v426_v48, %v426_v48  ;;  %v1939_v59 = vrot.slane %v6117_v51, 1  ;;  %v309_v17 = vld [vmem:[#allocation2 + $0x84] sm:$0x1]  ;;  %v396_v43 = vld [vmem:[%s5922_s30 + $0xb0] sm:$0xff] }
  0xa5   : > { %v1938_v58 = vrot.slane %v4530_v52, 1  ;;  %v698_v60 = vshrl.u32 %v4742_v53, 16  ;;  %v701_v61 = vshll.u32 %v4742_v53, 16  ;;  %v4744_v0 = vpack.c.bf16 %v427_v22, %v427_v22  ;;  %v359_v19 = vld [vmem:[#allocation2 + $0x8c] sm:$0x1]  ;;  %v398_v37 = vld [vmem:[%s5922_s30 + $0xc0] sm:$0xff] }
  0xa6   : > { %v692_v63 = vrot.slane %v690_v54, 7  ;;  %v707_v1 = vshrl.u32 %v4743_v56, 16  ;;  %v710_v3 = vshll.u32 %v4743_v56, 16  ;;  %v1757_v8 = vshrl.u32 %v6115_v49, 16  ;;  %v921_v24 = vld [vmem:[#allocation2 + $0x6c] sm:$0xf] }
  0xa7   : > { %v1940_v5 = vsel %vm1408_vm9, %v1938_v58, %v1939_v59  ;;  %v1563_v32 = vld [vmem:[#allocation2 + $0x60] sm:$0xe]  ;;  %v700_v7 = vrot.slane %v698_v60, 7  ;;  %v1759_v9 = vshll.u32 %v6115_v49, 16  ;;  %v925_v26 = vld [vmem:[#allocation2 + $0x74] sm:$0x1] }
  0xa8   : > { %5172 = vmatprep.mubr.bf16.mxu1 %v1940_v5  ;;  %v6125_v11 = vld [vmem:[#allocation2 + $0x64] sm:$0xf]  ;;  %v695_v12 = vor.u32 %v693_v55, %v692_v63  ;;  %v696_v6 = vrot.slane %v692_v63, 4  ;;  %v709_v16 = vrot.slane %v707_v1, 7  ;;  %v715_v28 = vshrl.u32 %v4744_v0, 16  ;;  %v399_v42 = vld [vmem:[%s5922_s30 + $0xc8] sm:$0xff] }
  0xa9   : > { %v6127_v20 = vld [vmem:[#allocation2 + $0x68] ss:$0 sps:$4 sm:$0x11]   ;;  %v4531_v21 = vcombine.low %v1563_v32, %v6125_v11  ;;  %v703_v23 = vor.u32 %v701_v61, %v700_v7  ;;  %v705_v50 = vrot.slane %v700_v7, 4  ;;  %v928_v29 = vld [vmem:[#allocation2 + $0x78] sm:$0xf] }
  0xaa   : > { %v922_v25 = vsel %vm5966_vm7, %v695_v12, %v921_v24  ;;  %v712_v13 = vor.u32 %v710_v3, %v709_v16  ;;  %v713_v27 = vrot.slane %v709_v16, 4  ;;  %v312_v31 = vld [vmem:[#allocation2 + $0x90] sm:$0x1]  ;;  %v362_v33 = vld [vmem:[#allocation2 + $0x98] sm:$0x1]  ;;  %v1942_v46 = vrot.slane %v6127_v20, 1 }
  0xab   : > { %v1941_v34 = vrot.slane %v4531_v21, 1  ;;  %v704_v15 = vsel %vm5972_vm8, %v696_v6, %v703_v23  ;;  %923 = vst [vmem:[#allocation2 + $0x6c] sm:$0xf] %v922_v25  ;;  %v926_v35 = vsel %vm5934_vm2, %v705_v50, %v925_v26  ;;  %v932_v36 = vld [vmem:[#allocation2 + $0x80] sm:$0x1]  ;;  %v717_v38 = vrot.slane %v715_v28, 7 }
  0xac   : > { %924 = vst [vmem:[#allocation2 + $0x70] sm:$0xf] %v704_v15  ;;  %927 = vst [vmem:[#allocation2 + $0x74] sm:$0x1] %v926_v35  ;;  %v718_v39 = vshll.u32 %v4744_v0, 16  ;;  %v929_v40 = vsel %vm5966_vm7, %v712_v13, %v928_v29  ;;  %v1761_v41 = vrot.slane %v1759_v9, 1 }
  0xad   : > { %v5467_v45 = vld [vmem:[#allocation6 + $0x50] sm:$0xff]   ;;  %v1943_v47 = vsel %vm1408_vm9, %v1941_v34, %v1942_v46  ;;  %930 = vst [vmem:[#allocation2 + $0x78] sm:$0xf] %v929_v40  ;;  %v1764_v48 = vshll.u32 %v6089_v10, 16  ;;  %v310_v52 = vsel %vm5934_vm2, 0, %v309_v17  ;;  %v360_v53 = vsel %vm5940_vm4, 0, %v359_v19 }
  0xae   : > { %v5468_v22 = vld [vmem:[#allocation6 + $0x10] sm:$0xff]   ;;  %5173 = vmatmul.mubr.bf16.gmra.mxu1 %v1943_v47  ;;  %v720_v54 = vor.u32 %v718_v39, %v717_v38  ;;  %v722_v55 = vrot.slane %v717_v38, 4  ;;  %v1762_v56 = vor.u32 %v1761_v41, %v1757_v8  ;;  %311 = vst [vmem:[#allocation2 + $0x84] sm:$0x1] %v310_v52  ;;  %361 = vst [vmem:[#allocation2 + $0x8c] sm:$0x1] %v360_v53  ;;  %4888 = vmatprep.subr.bf16.mxu1 %v5467_v45 }
  0xaf   : > { %v428_v57 = vmax.f32 %v396_v43, 0.0  ;;  %v1526_v58 = vld [vmem:[#allocation2 + $0x54] sm:$0xf]  ;;  %v1766_v59 = vrot.slane %v1764_v48, 1  ;;  %v429_v60 = vmax.f32 %v397_v30, 0.0  ;;  %v313_v10 = vsel %vm5934_vm2, 0, %v312_v31  ;;  %4889 = vmatpush3.bf16.msra.mxu1 %v5468_v22 }
  0xb0   : > { %v363_v61 = vsel %vm5940_vm4, 0, %v362_v33  ;;  %v721_v63 = vsel %vm5972_vm8, %v713_v27, %v720_v54  ;;  %v933_v0 = vsel %vm5934_vm2, %v722_v55, %v932_v36  ;;  %314 = vst [vmem:[#allocation2 + $0x90] sm:$0x1] %v313_v10  ;;  %v430_v3 = vmax.f32 %v398_v37, 0.0  ;;  %v365_v41 = vld [vmem:[#allocation2 + $0xa4] sm:$0x1] }
  0xb1   : > { %v4745_v1 = vpack.c.bf16 %v428_v57, %v428_v57  ;;  %364 = vst [vmem:[#allocation2 + $0x98] sm:$0x1] %v363_v61  ;;  %931 = vst [vmem:[#allocation2 + $0x7c] sm:$0xf] %v721_v63  ;;  %v1767_v4 = vsel %vm1183_vm10, %v1762_v56, %v1766_v59  ;;  %v4746_v5 = vpack.c.bf16 %v429_v60, %v429_v60  ;;  %v431_v32 = vmax.f32 %v399_v42, 0.0  ;;  %v400_v42 = vld [vmem:[%s5922_s30 + $0xd0] sm:$0xff] }
  0xb2   : > { %934 = vst [vmem:[#allocation2 + $0x80] sm:$0x1] %v933_v0  ;;  %v6159_v7 = vcombine.low %v1526_v58, %v6111_v44  ;;  %v1564_v8 = vld [vmem:[#allocation2 + $0x6c] sm:$0xe]  ;;  %2241 = vmatprep.mubr.bf16.mxu0 %v1767_v4  ;;  %v4747_v6 = vpack.c.bf16 %v430_v3, %v430_v3  ;;  %v401_v22 = vld [vmem:[%s5922_s30 + $0xd8] sm:$0xff]  ;;  %v402_v10 = vld [vmem:[%s5922_s30 + $0xe0] sm:$0xff] }
  0xb3   : > { %v724_v9 = vshrl.u32 %v4745_v1, 16  ;;  %v727_v12 = vshll.u32 %v4745_v1, 16  ;;  %v6161_v16 = vld [vmem:[#allocation2 + $0x70] sm:$0xf]  ;;  %v732_v17 = vshrl.u32 %v4746_v5, 16  ;;  %v735_v19 = vshll.u32 %v4746_v5, 16  ;;  %2242 = vmatmul.mubr.bf16.gmra.mxu0 %v6115_v49 }
  0xb4   : > { %v6164_v21 = vld [vmem:[#allocation2 + $0x74] ss:$0 sps:$4 sm:$0x11]   ;;  %v4532_v23 = vcombine.low %v1564_v8, %v6161_v16  ;;  %v4748_v24 = vpack.c.bf16 %v431_v32, %v431_v32  ;;  %v1769_v44 = vshrl.u32 %v6159_v7, 16  ;;  %v1565_v43 = vld [vmem:[#allocation2 + $0x78] sm:$0xe] }
  0xb5   : > { %v726_v50 = vrot.slane %v724_v9, 7  ;;  %v734_v25 = vrot.slane %v732_v17, 7  ;;  %v935_v26 = vld [vmem:[#allocation2 + $0x84] sm:$0xf]  ;;  %v741_v13 = vshrl.u32 %v4747_v6, 16  ;;  %v1945_v28 = vrot.slane %v6164_v21, 1 }
  0xb6   : > { %v1944_v27 = vrot.slane %v4532_v23, 1  ;;  %v939_v31 = vld [vmem:[#allocation2 + $0x8c] sm:$0x1]  ;;  %v315_v49 = vld [vmem:[#allocation2 + $0x9c] sm:$0x1]  ;;  %v744_v15 = vshll.u32 %v4747_v6, 16 }
  0xb7   : > { %v729_v29 = vor.u32 %v727_v12, %v726_v50  ;;  %v730_v30 = vrot.slane %v726_v50, 4  ;;  %v737_v33 = vor.u32 %v735_v19, %v734_v25  ;;  %v739_v34 = vrot.slane %v734_v25, 4  ;;  %v942_v35 = vld [vmem:[#allocation2 + $0x90] sm:$0xf]  ;;  %v5475_v54 = vld [vmem:[#allocation6 + $0x48] sm:$0xff]   ;;  %v5477_v23 = vld [vmem:[#allocation6 + $0x40] sm:$0xff]  }
  0xb8   : > { %v743_v46 = vrot.slane %v741_v13, 7  ;;  %v1946_v36 = vsel %vm1408_vm9, %v1944_v27, %v1945_v28  ;;  %v6170_v37 = vld [vmem:[#allocation2 + $0x7c] sm:$0xf]  ;;  %v749_v39 = vshrl.u32 %v4748_v24, 16  ;;  %v752_v40 = vshll.u32 %v4748_v24, 16  ;;  %v5476_v61 = vld [vmem:[#allocation6 + $0x8] sm:$0xff]   ;;  %4890 = vmatprep.subr.bf16.mxu1 %v5475_v54 }
  0xb9   : > { %v936_v38 = vsel %vm5966_vm7, %v729_v29, %v935_v26  ;;  %5176 = vmatprep.mubr.bf16.mxu1 %v1946_v36  ;;  %v6175_v45 = vld [vmem:[#allocation2 + $0x80] ss:$0 sps:$4 sm:$0x11]   ;;  %v4533_v47 = vcombine.low %v1565_v43, %v6170_v37  ;;  %v738_v48 = vsel %vm5972_vm8, %v730_v30, %v737_v33  ;;  %v940_v52 = vsel %vm5934_vm2, %v739_v34, %v939_v31  ;;  %v946_v53 = vld [vmem:[#allocation2 + $0x98] sm:$0x1]  ;;  %v403_v4 = vld [vmem:[%s5922_s30 + $0xe8] sm:$0xff] }
  0xba   : > { %937 = vst [vmem:[#allocation2 + $0x84] sm:$0xf] %v936_v38  ;;  %938 = vst [vmem:[#allocation2 + $0x88] sm:$0xf] %v738_v48  ;;  %v746_v55 = vor.u32 %v744_v15, %v743_v46  ;;  %v747_v56 = vrot.slane %v743_v46, 4  ;;  %v751_v57 = vrot.slane %v749_v39, 7  ;;  %4891 = vmatpush3.bf16.msra.mxu1 %v5476_v61 }
  0xbb   : > { %941 = vst [vmem:[#allocation2 + $0x8c] sm:$0x1] %v940_v52  ;;  %v1771_v58 = vshll.u32 %v6159_v7, 16  ;;  %v318_v59 = vld [vmem:[#allocation2 + $0xa8] sm:$0x1]  ;;  %v1947_v63 = vrot.slane %v4533_v47, 1  ;;  %4892 = vmatprep.subr.bf16.mxu1 %v5477_v23 }
  0xbc   : > { %v368_v60 = vld [vmem:[#allocation2 + $0xb0] sm:$0x1]  ;;  %v1948_v0 = vrot.slane %v6175_v45, 1  ;;  %v1776_v1 = vshll.u32 %v6117_v51, 16  ;;  %v316_v3 = vsel %vm5934_vm2, 0, %v315_v49  ;;  %v754_v5 = vor.u32 %v752_v40, %v751_v57  ;;  %v5478_v26 = vld [vmem:[#allocation6] sm:$0xff]  }
  0xbd   : > { %v756_v32 = vrot.slane %v751_v57, 4  ;;  %v943_v8 = vsel %vm5966_vm7, %v746_v55, %v942_v35  ;;  %v1773_v9 = vrot.slane %v1771_v58, 1  ;;  %317 = vst [vmem:[#allocation2 + $0x9c] sm:$0x1] %v316_v3  ;;  %v1528_v12 = vld [vmem:[#allocation2 + $0x60] sm:$0xf] }
  0xbe   : > { %v1949_v6 = vsel %vm1408_vm9, %v1947_v63, %v1948_v0  ;;  %944 = vst [vmem:[#allocation2 + $0x90] sm:$0xf] %v943_v8  ;;  %v1778_v17 = vrot.slane %v1776_v1, 1  ;;  %v366_v51 = vsel %vm5940_vm4, 0, %v365_v41  ;;  %v432_v19 = vmax.f32 %v400_v42, 0.0  ;;  %4893 = vmatpush3.bf16.msra.mxu1 %v5478_v26 }
  0xbf   : > { %5177 = vmatmul.mubr.bf16.gmra.mxu1 %v1949_v6  ;;  %v755_v50 = vsel %vm5972_vm8, %v747_v56, %v754_v5  ;;  %v947_v24 = vsel %vm5934_vm2, %v756_v32, %v946_v53  ;;  %v1774_v43 = vor.u32 %v1773_v9, %v1769_v44  ;;  %367 = vst [vmem:[#allocation2 + $0xa4] sm:$0x1] %v366_v51  ;;  %v433_v25 = vmax.f32 %v401_v22, 0.0  ;;  %v1530_v36 = vld [vmem:[#allocation2 + $0x6c] sm:$0xf]  ;;  %v5481_v53 = vld [vmem:[#allocation6 + $0x98] sm:$0xff]  }
  0xc0   : > { %945 = vst [vmem:[#allocation2 + $0x94] sm:$0xf] %v755_v50  ;;  %948 = vst [vmem:[#allocation2 + $0x98] sm:$0x1] %v947_v24  ;;  %v4749_v13 = vpack.c.bf16 %v432_v19, %v432_v19  ;;  %v319_v27 = vsel %vm5934_vm2, 0, %v318_v59  ;;  %v369_v28 = vsel %vm5940_vm4, 0, %v368_v60  ;;  %v6209_v35 = vcombine.low %v1528_v12, %v6125_v11  ;;  %5196 = vmatprep.subr.bf16.mxu0 %v5481_v53 }
  0xc1   : > { %v434_v29 = vmax.f32 %v402_v10, 0.0  ;;  %v1566_v30 = vld [vmem:[#allocation2 + $0x84] sm:$0xe]  ;;  %v1779_v31 = vsel %vm1183_vm10, %v1774_v43, %v1778_v17  ;;  %v4750_v49 = vpack.c.bf16 %v433_v25, %v433_v25  ;;  %320 = vst [vmem:[#allocation2 + $0xa8] sm:$0x1] %v319_v27  ;;  %v435_v44 = vmax.f32 %v403_v4, 0.0  ;;  %5197 = vmatpush3.bf16.msra.mxu0 %v5481_v53 }
  0xc2   : > { %370 = vst [vmem:[#allocation2 + $0xb0] sm:$0x1] %v369_v28  ;;  %v6206_v33 = vld [vmem:[#allocation2 + $0x88] sm:$0xf]  ;;  %2249 = vmatprep.mubr.bf16.mxu0 %v1779_v31  ;;  %v758_v34 = vshrl.u32 %v4749_v13, 16  ;;  %v761_v46 = vshll.u32 %v4749_v13, 16  ;;  %v6221_v3 = vcombine.low %v1530_v36, %v6161_v16 }
  0xc3   : > { %v4751_v15 = vpack.c.bf16 %v434_v29, %v434_v29  ;;  %v6211_v38 = vld [vmem:[#allocation2 + $0x8c] ss:$0 sps:$4 sm:$0x11]   ;;  %v4534_v39 = vcombine.low %v1566_v30, %v6206_v33  ;;  %v766_v40 = vshrl.u32 %v4750_v49, 16  ;;  %2250 = vmatmul.mubr.bf16.gmra.mxu0 %v6159_v7  ;;  %v769_v42 = vshll.u32 %v4750_v49, 16  ;;  %v5484_v7 = vld [vmem:[#allocation6 + $0x90] sm:$0xff]  }
  0xc4   : > { %v760_v41 = vrot.slane %v758_v34, 7  ;;  %v949_v47 = vld [vmem:[#allocation2 + $0x9c] sm:$0xf]  ;;  %v4752_v48 = vpack.c.bf16 %v435_v44, %v435_v44  ;;  %v1951_v54 = vrot.slane %v6211_v38, 1  ;;  %v1781_v56 = vshrl.u32 %v6209_v35, 16  ;;  %v374_v12 = vld [vmem:[%s5922_s30] sm:$0xff]  ;;  %5198 = vmatprep.subr.bf16.mxu0 %v5484_v7 }
  0xc5   : > { %v775_v52 = vshrl.u32 %v4751_v15, 16  ;;  %v1950_v22 = vrot.slane %v4534_v39, 1  ;;  %v1567_v55 = vld [vmem:[#allocation2 + $0x90] sm:$0xe]  ;;  %v778_v11 = vshll.u32 %v4751_v15, 16  ;;  %v768_v59 = vrot.slane %v766_v40, 7  ;;  %5199 = vmatpush3.bf16.msra.mxu0 %v5484_v7 }
  0xc6   : > { %v763_v57 = vor.u32 %v761_v46, %v760_v41  ;;  %v764_v58 = vrot.slane %v760_v41, 4  ;;  %v953_v60 = vld [vmem:[#allocation2 + $0xa4] sm:$0x1]  ;;  %v783_v0 = vshrl.u32 %v4752_v48, 16  ;;  %v786_v1 = vshll.u32 %v4752_v48, 16  ;;  %v375_v30 = vld [vmem:[%s5922_s30 + $0x8] sm:$0xff] }
  0xc7   : > { %v777_v10 = vrot.slane %v775_v52, 7  ;;  %v1952_v61 = vsel %vm1408_vm9, %v1950_v22, %v1951_v54  ;;  %v6218_v63 = vld [vmem:[#allocation2 + $0x94] sm:$0xf]  ;;  %v6223_v4 = vld [vmem:[#allocation2 + $0x98] ss:$0 sps:$4 sm:$0x11]   ;;  %v771_v32 = vor.u32 %v769_v42, %v768_v59 }
  0xc8   : > { %5180 = vmatprep.mubr.bf16.mxu1 %v1952_v61  ;;  %v4535_v5 = vcombine.low %v1567_v55, %v6218_v63  ;;  %v773_v8 = vrot.slane %v768_v59, 4  ;;  %v956_v9 = vld [vmem:[#allocation2 + $0xa8] sm:$0xf]  ;;  %v950_v6 = vsel %vm5966_vm7, %v763_v57, %v949_v47  ;;  %v785_v19 = vrot.slane %v783_v0, 7  ;;  %v276_v16 = vld [vmem:[#allocation2] sm:$0x1] }
  0xc9   : > { %v780_v17 = vor.u32 %v778_v11, %v777_v10  ;;  %v781_v51 = vrot.slane %v777_v10, 4  ;;  %v960_v23 = vld [vmem:[#allocation2 + $0xb0] sm:$0x1]  ;;  %v1954_v24 = vrot.slane %v6223_v4, 1  ;;  %v772_v43 = vsel %vm5972_vm8, %v764_v58, %v771_v32  ;;  %951 = vst [vmem:[#allocation2 + $0x9c] sm:$0xf] %v950_v6 }
  0xca   : > { %v1953_v50 = vrot.slane %v4535_v5, 1  ;;  %v954_v25 = vsel %vm5934_vm2, %v773_v8, %v953_v60  ;;  %v326_v26 = vld [vmem:[#allocation2 + $0x8] sm:$0x1]  ;;  %952 = vst [vmem:[#allocation2 + $0xa0] sm:$0xf] %v772_v43  ;;  %v788_v13 = vor.u32 %v786_v1, %v785_v19  ;;  %v790_v27 = vrot.slane %v785_v19, 4 }
  0xcb   : > { %955 = vst [vmem:[#allocation2 + $0xa4] sm:$0x1] %v954_v25  ;;  %v957_v28 = vsel %vm5966_vm7, %v780_v17, %v956_v9  ;;  %v1783_v29 = vshll.u32 %v6209_v35, 16  ;;  %v1532_v31 = vld [vmem:[#allocation2 + $0x78] sm:$0xf]  ;;  %v1788_v44 = vshll.u32 %v6127_v20, 16 }
  0xcc   : > { %v1955_v49 = vsel %vm1408_vm9, %v1953_v50, %v1954_v24  ;;  %958 = vst [vmem:[#allocation2 + $0xa8] sm:$0xf] %v957_v28  ;;  %v277_v34 = vsel %vm5934_vm2, 0, %v276_v16  ;;  %v327_v46 = vsel %vm5940_vm4, 0, %v326_v26  ;;  %v5489_v15 = vld [vmem:[#allocation6 + $0x88] sm:$0xff]   ;;  %v789_v36 = vsel %vm5972_vm8, %v781_v51, %v788_v13  ;;  %v5494_v57 = vld [vmem:[#allocation6 + $0x80] sm:$0xff]  }
  0xcd   : > { %5181 = vmatmul.mubr.bf16.gmra.mxu1 %v1955_v49  ;;  %v961_v39 = vsel %vm5934_vm2, %v790_v27, %v960_v23  ;;  %v1785_v40 = vrot.slane %v1783_v29, 1  ;;  %278 = vst [vmem:[#allocation2] sm:$0x1] %v277_v34  ;;  %328 = vst [vmem:[#allocation2 + $0x8] sm:$0x1] %v327_v46  ;;  %v406_v41 = vmax.f32 %v374_v12, 0.0  ;;  %5200 = vmatprep.subr.bf16.mxu0 %v5489_v15 }
  0xce   : > { %959 = vst [vmem:[#allocation2 + $0xac] sm:$0xf] %v789_v36  ;;  %962 = vst [vmem:[#allocation2 + $0xb0] sm:$0x1] %v961_v39  ;;  %v1790_v20 = vrot.slane %v1788_v44, 1  ;;  %v407_v42 = vmax.f32 %v375_v30, 0.0  ;;  %v6250_v48 = vcombine.low %v1532_v31, %v6170_v37  ;;  %5201 = vmatpush3.bf16.msra.mxu0 %v5489_v15 }
  0xcf   : > { %v1795_v47 = vshll.u32 %v6221_v3, 16  ;;  %v1786_v52 = vor.u32 %v1785_v40, %v1781_v56  ;;  %v4723_v53 = vpack.c.bf16 %v406_v41, %v406_v41  ;;  %v1793_v22 = vshrl.u32 %v6221_v3, 16  ;;  %v1534_v58 = vld [vmem:[#allocation2 + $0x84] sm:$0xf]  ;;  %5202 = vmatprep.subr.bf16.mxu0 %v5494_v57  ;;  %v1003_v8 = vld [vmem:[#allocation2 + $0xc] sm:$0xf] }
  0xd0   : > { %v4724_v54 = vpack.c.bf16 %v407_v42, %v407_v42  ;;  %v1800_v11 = vshll.u32 %v6164_v21, 16  ;;  %v1568_v59 = vld [vmem:[#allocation2 + $0x9c] sm:$0xe]  ;;  %v1805_v37 = vshrl.u32 %v6250_v48, 16  ;;  %v6264_v9 = vld [vmem:[#allocation2 + $0x10] sm:$0xf]  ;;  %v6271_v43 = vcombine.low %v1534_v58, %v6206_v33 }
  0xd1   : > { %v1797_v55 = vrot.slane %v1795_v47, 1  ;;  %v1791_v60 = vsel %vm1183_vm10, %v1786_v52, %v1790_v20  ;;  %v537_v10 = vshrl.u32 %v4723_v53, 16  ;;  %v540_v7 = vshll.u32 %v4723_v53, 16  ;;  %v6258_v61 = vld [vmem:[#allocation2 + $0xa0] sm:$0xf]  ;;  %v5501_v46 = vld [vmem:[#allocation6 + $0x1f8] sm:$0xff]  }
  0xd2   : > { %2257 = vmatprep.mubr.bf16.mxu0 %v1791_v60  ;;  %v545_v56 = vshrl.u32 %v4724_v54, 16  ;;  %v548_v0 = vshll.u32 %v4724_v54, 16  ;;  %v6260_v1 = vld [vmem:[#allocation2 + $0xa4] ss:$0 sps:$4 sm:$0x11]   ;;  %v4536_v5 = vcombine.low %v1568_v59, %v6258_v61  ;;  %v1807_v12 = vshll.u32 %v6250_v48, 16  ;;  %5203 = vmatpush3.bf16.msra.mxu0 %v5494_v57 }
  0xd3   : > { %v539_v21 = vrot.slane %v537_v10, 7  ;;  %2258 = vmatmul.mubr.bf16.gmra.mxu0 %v6209_v35  ;;  %v1798_v32 = vor.u32 %v1797_v55, %v1793_v22  ;;  %v1569_v6 = vld [vmem:[#allocation2 + $0xa8] sm:$0xe]  ;;  %v1802_v19 = vrot.slane %v1800_v11, 1  ;;  %v1957_v16 = vrot.slane %v6260_v1, 1  ;;  %5000 = vmatprep.subr.bf16.mxu0 %v5501_v46  ;;  %v6292_v20 = vld [vmem:[#allocation6 + $0x238] sm:$0xff]  }
  0xd4   : > { %v547_v17 = vrot.slane %v545_v56, 7  ;;  %v858_v51 = vld [vmem:[#allocation2] sm:$0xf]  ;;  %v1956_v23 = vrot.slane %v4536_v5, 1  ;;  %v862_v27 = vld [vmem:[#allocation2 + $0x8] sm:$0x1]  ;;  %v6284_v34 = vcombine.low %v1003_v8, %v6264_v9  ;;  %5232 = vmatprep.subr.bf16.mxu1 %v6292_v20 }
  0xd5   : > { %v6268_v50 = vld [vmem:[#allocation2 + $0xac] sm:$0xf]  ;;  %v542_v24 = vor.u32 %v540_v7, %v539_v21  ;;  %v6273_v35 = vld [vmem:[#allocation2 + $0xb0] ss:$0 sps:$4 sm:$0x11]   ;;  %v543_v26 = vrot.slane %v539_v21, 4  ;;  %v1803_v31 = vsel %vm1183_vm10, %v1798_v32, %v1802_v19 }
  0xd6   : > { %v4537_v25 = vcombine.low %v1569_v6, %v6268_v50  ;;  %v550_v13 = vor.u32 %v548_v0, %v547_v17  ;;  %v1958_v28 = vsel %vm1408_vm9, %v1956_v23, %v1957_v16  ;;  %v552_v29 = vrot.slane %v547_v17, 4  ;;  %2265 = vmatprep.mubr.bf16.mxu0 %v1803_v31  ;;  %v6289_v40 = vld [vmem:[#allocation2 + $0x14] ss:$0 sps:$4 sm:$0x11]   ;;  %v1536_v42 = vld [vmem:[#allocation2 + $0x90] sm:$0xf] }
  0xd7   : > { %v859_v30 = vsel %vm5966_vm7, %v542_v24, %v858_v51  ;;  %5184 = vmatprep.mubr.bf16.mxu1 %v1958_v28  ;;  %v1960_v33 = vrot.slane %v6273_v35, 1  ;;  %v1809_v36 = vrot.slane %v1807_v12, 1  ;;  %v1812_v41 = vshll.u32 %v6175_v45, 16  ;;  %v1005_v52 = vld [vmem:[#allocation2 + $0x18] sm:$0xf] }
  0xd8   : > { %v1959_v49 = vrot.slane %v4537_v25, 1  ;;  %v551_v44 = vsel %vm5972_vm8, %v543_v26, %v550_v13  ;;  %860 = vst [vmem:[#allocation2] sm:$0xf] %v859_v30  ;;  %v863_v15 = vsel %vm5934_vm2, %v552_v29, %v862_v27  ;;  %v6295_v53 = vld [vmem:[#allocation2 + $0x1c] sm:$0xf]  ;;  %v1199_v22 = vshll.u32 %v6284_v34, 16 }
  0xd9   : > { %861 = vst [vmem:[#allocation2 + $0x4] sm:$0xf] %v551_v44  ;;  %864 = vst [vmem:[#allocation2 + $0x8] sm:$0x1] %v863_v15  ;;  %v1810_v47 = vor.u32 %v1809_v36, %v1805_v37  ;;  %v1814_v54 = vrot.slane %v1812_v41, 1  ;;  %v1817_v55 = vshrl.u32 %v6271_v43, 16  ;;  %v6303_v57 = vcombine.low %v1536_v42, %v6218_v63 }
  0xda   : > { %v1961_v39 = vsel %vm1408_vm9, %v1959_v49, %v1960_v33  ;;  %v1819_v11 = vshll.u32 %v6271_v43, 16  ;;  %v1824_v45 = vshll.u32 %v6211_v38, 16  ;;  %v1538_v58 = vld [vmem:[#allocation2 + $0x9c] sm:$0xf]  ;;  %v6307_v10 = vcombine.low %v1005_v52, %v6295_v53  ;;  %v1540_v8 = vld [vmem:[#allocation2 + $0xa8] sm:$0xf] }
  0xdb   : > { %5185 = vmatmul.mubr.bf16.gmra.mxu1 %v1961_v39  ;;  %2266 = vmatmul.mubr.bf16.gmra.mxu0 %v6221_v3  ;;  %v1815_v3 = vsel %vm1183_vm10, %v1810_v47, %v1814_v54  ;;  %v1197_v56 = vshrl.u32 %v6284_v34, 16  ;;  %v1201_v0 = vrot.slane %v1199_v22, 1  ;;  %v1204_v38 = vshll.u32 %v6289_v40, 16  ;;  %v6319_v12 = vld [vmem:[#allocation2 + $0x20] ss:$0 sps:$4 sm:$0x11]  }
  0xdc   : > { %v1821_v59 = vrot.slane %v1819_v11, 1  ;;  %2273 = vmatprep.mubr.bf16.mxu0 %v1815_v3  ;;  %v1826_v7 = vrot.slane %v1824_v45, 1  ;;  %v6314_v63 = vcombine.low %v1538_v58, %v6258_v61  ;;  %v1829_v17 = vshrl.u32 %v6303_v57, 16  ;;  %v1007_v24 = vld [vmem:[#allocation2 + $0x24] sm:$0xf] }
  0xdd   : > { %v1831_v51 = vshll.u32 %v6303_v57, 16  ;;  %v1836_v19 = vshll.u32 %v6223_v4, 16  ;;  %v1202_v25 = vor.u32 %v1201_v0, %v1197_v56  ;;  %v1206_v26 = vrot.slane %v1204_v38, 1  ;;  %v6328_v30 = vld [vmem:[#allocation2 + $0x28] sm:$0xf] }
  0xde   : > { %v1822_v5 = vor.u32 %v1821_v59, %v1817_v55  ;;  %v1211_v13 = vshll.u32 %v6307_v10, 16  ;;  %v1843_v4 = vshll.u32 %v6314_v63, 16  ;;  %v6332_v33 = vcombine.low %v1540_v8, %v6268_v50  ;;  %v6344_v22 = vld [vmem:[#allocation2 + $0x2c] ss:$0 sps:$4 sm:$0x11]  }
  0xdf   : > { %v1001_v60 = vld [vmem:[#allocation2] sm:$0xf]  ;;  %v1833_v27 = vrot.slane %v1831_v51, 1  ;;  %v1838_v31 = vrot.slane %v1836_v19, 1  ;;  %v1216_v46 = vshll.u32 %v6319_v12, 16  ;;  %v1207_v15 = vsel %vm1183_vm10, %v1202_v25, %v1206_v26 }
  0xe0   : > { %v6309_v37 = vld [vmem:[#allocation2 + $0x4] sm:$0xf]  ;;  %v6317_v32 = vld [vmem:[#allocation2 + $0x8] ss:$0 sps:$4 sm:$0x11]   ;;  %v1827_v6 = vsel %vm1183_vm10, %v1822_v5, %v1826_v7  ;;  %v1213_v36 = vrot.slane %v1211_v13, 1  ;;  %v6338_v39 = vcombine.low %v1007_v24, %v6328_v30 }
  0xe1   : > { %v4454_v21 = vcombine.low %v1001_v60, %v6309_v37  ;;  %v1192_v61 = vshll.u32 %v6317_v32, 16  ;;  %v1834_v49 = vor.u32 %v1833_v27, %v1829_v17  ;;  %v1841_v41 = vshrl.u32 %v6314_v63, 16  ;;  %v1009_v45 = vld [vmem:[#allocation2 + $0x30] sm:$0xf]  ;;  %v6348_v58 = vld [vmem:[#allocation2 + $0x34] sm:$0xf] }
  0xe2   : > { %v1845_v52 = vrot.slane %v1843_v4, 1  ;;  %v1848_v50 = vshll.u32 %v6260_v1, 16  ;;  %v1218_v55 = vrot.slane %v1216_v46, 1  ;;  %v1223_v11 = vshll.u32 %v6338_v39, 16  ;;  %v5515_v1 = vld [vmem:[#allocation6 + $0x230] sm:$0xff]  }
  0xe3   : > { %v1185_v23 = vshrl.u32 %v4454_v21, 16  ;;  %v1187_v16 = vshll.u32 %v4454_v21, 16  ;;  %2274 = vmatmul.mubr.bf16.gmra.mxu0 %v6250_v48  ;;  %v1194_v29 = vrot.slane %v1192_v61, 1  ;;  %v1209_v48 = vshrl.u32 %v6307_v10, 16  ;;  %v6365_v19 = vld [vmem:[#allocation2 + $0x40] sm:$0xf] }
  0xe4   : > { %2281 = vmatprep.mubr.bf16.mxu0 %v1827_v6  ;;  %v1839_v47 = vsel %vm1183_vm10, %v1834_v49, %v1838_v31  ;;  %v1846_v3 = vor.u32 %v1845_v52, %v1841_v41  ;;  %v1850_v59 = vrot.slane %v1848_v50, 1  ;;  %v1855_v60 = vshll.u32 %v6332_v33, 16  ;;  %v6362_v51 = vld [vmem:[#allocation2 + $0x38] ss:$0 sps:$4 sm:$0x11]   ;;  %v5525_v41 = vld [vmem:[#allocation6 + $0x228] sm:$0xff]  }
  0xe5   : > { %v1189_v28 = vrot.slane %v1187_v16, 1  ;;  %v1214_v54 = vor.u32 %v1213_v36, %v1209_v48  ;;  %v1228_v7 = vshll.u32 %v6344_v22, 16  ;;  %v1221_v56 = vshrl.u32 %v6338_v39, 16  ;;  %v1043_v25 = vld [vmem:[#allocation2] sm:$0xe] }
  0xe6   : > { %v1225_v0 = vrot.slane %v1223_v11, 1  ;;  %v6356_v38 = vcombine.low %v1009_v45, %v6348_v58  ;;  %v1851_v5 = vsel %vm1183_vm10, %v1846_v3, %v1850_v59  ;;  %v1857_v8 = vrot.slane %v1855_v60, 1  ;;  %v1044_v4 = vld [vmem:[#allocation2 + $0xc] sm:$0xe] }
  0xe7   : > { %v1190_v44 = vor.u32 %v1189_v28, %v1185_v23  ;;  %v1860_v6 = vshll.u32 %v6273_v35, 16  ;;  %v1230_v17 = vrot.slane %v1228_v7, 1  ;;  %v1240_v35 = vshll.u32 %v6362_v51, 16  ;;  %v6382_v36 = vld [vmem:[#allocation2 + $0x4c] sm:$0xf] }
  0xe8   : > { %v1226_v23 = vor.u32 %v1225_v0, %v1221_v56  ;;  %v1235_v16 = vshll.u32 %v6356_v38, 16  ;;  %v4482_v28 = vcombine.low %v1043_v25, %v6309_v37  ;;  %v1410_v46 = vrot.slane %v6317_v32, 1  ;;  %v1045_v37 = vld [vmem:[#allocation2 + $0x18] sm:$0xe]  ;;  %v1046_v7 = vld [vmem:[#allocation2 + $0x24] sm:$0xe] }
  0xe9   : > { %v1195_v42 = vsel %vm1183_vm10, %v1190_v44, %v1194_v29  ;;  %v1862_v24 = vrot.slane %v1860_v6, 1  ;;  %v6376_v29 = vld [vmem:[#allocation2 + $0x44] ss:$0 sps:$4 sm:$0x11]   ;;  %v1242_v31 = vrot.slane %v1240_v35, 1  ;;  %v4484_v11 = vcombine.low %v1045_v37, %v6295_v53  ;;  %v5510_v35 = vld [vmem:[#allocation6 + $0x1e8] sm:$0xff]  }
  0xea   : > { %2635 = vmatprep.mubr.bf16.mxu1 %v1195_v42  ;;  %v1231_v13 = vsel %vm1183_vm10, %v1226_v23, %v1230_v17  ;;  %v1409_v48 = vrot.slane %v4482_v28, 1  ;;  %v6392_v32 = vld [vmem:[#allocation2 + $0x50] ss:$0 sps:$4 sm:$0x11]   ;;  %v1413_v3 = vrot.slane %v6289_v40, 1  ;;  %v4485_v40 = vcombine.low %v1046_v7, %v6328_v30 }
  0xeb   : > { %2636 = vmatmul.mubr.bf16.vlgmr.msra.gmra.mxu1 %v4454_v21  ;;  %2282 = vmatmul.mubr.bf16.gmra.mxu0 %v6271_v43  ;;  %v1219_v43 = vsel %vm1183_vm10, %v1214_v54, %v1218_v55  ;;  %v1853_v21 = vshrl.u32 %v6332_v33, 16  ;;  %v1015_v55 = vld [vmem:[#allocation2 + $0x54] sm:$0xf]  ;;  %v1415_v53 = vrot.slane %v4484_v11, 1  ;;  %v1047_v56 = vld [vmem:[#allocation2 + $0x30] sm:$0xe] }
  0xec   : > { %2643 = vmatprep.mubr.bf16.mxu1 %v1207_v15  ;;  %2289 = vmatprep.mubr.bf16.mxu0 %v1839_v47  ;;  %v1013_v15 = vld [vmem:[#allocation2 + $0x48] sm:$0xf]  ;;  %v4483_v47 = vcombine.low %v1044_v4, %v6264_v9  ;;  %v1411_v54 = vsel %vm1408_vm9, %v1409_v48, %v1410_v46  ;;  %v6397_v9 = vld [vmem:[#allocation2 + $0x58] sm:$0xf]  ;;  %v1264_v0 = vshll.u32 %v6392_v32, 16  ;;  %v4486_v23 = vcombine.low %v1047_v56, %v6348_v58 }
  0xed   : > { %5233 = vmatpush3.bf16.msra.mxu1 %v6292_v20  ;;  %v1011_v20 = vld [vmem:[#allocation2 + $0x3c] sm:$0xf]  ;;  %v1858_v61 = vor.u32 %v1857_v8, %v1853_v21  ;;  %v6389_v50 = vcombine.low %v1013_v15, %v6382_v36  ;;  %v5507_v8 = vld [vmem:[#allocation6 + $0x1f0] sm:$0xff]   ;;  %v1017_v30 = vld [vmem:[#allocation2 + $0x60] sm:$0xf]  ;;  %v1419_v58 = vrot.slane %v6344_v22, 1 }
  0xee   : > { %5234 = vmatprep.subr.bf16.mxu1 %v5515_v1  ;;  %v6370_v26 = vcombine.low %v1011_v20, %v6365_v19  ;;  %v1412_v45 = vrot.slane %v4483_v47, 1  ;;  %v5502_v21 = vld [vmem:[#allocation6 + $0x1b8] sm:$0xff]   ;;  %v6416_v25 = vld [vmem:[#allocation2 + $0x64] sm:$0xf]  ;;  %v5540_v15 = vld [vmem:[#allocation6 + $0x210] sm:$0xff]   ;;  %v1425_v11 = vrot.slane %v6376_v29, 1 }
  0xef   : > { %v1863_v27 = vsel %vm1183_vm10, %v1858_v61, %v1862_v24  ;;  %v1257_v20 = vshrl.u32 %v6389_v50, 16  ;;  %v5509_v24 = vld [vmem:[#allocation6 + $0x1b0] sm:$0xff]   ;;  %v6423_v46 = vcombine.low %v1017_v30, %v6416_v25  ;;  %v1051_v7 = vld [vmem:[#allocation2 + $0x60] sm:$0xe] }
  0xf0   : > { %v1247_v49 = vshll.u32 %v6370_v26, 16  ;;  %v1245_v42 = vshrl.u32 %v6370_v26, 16 }
  0xf1   : > { %5235 = vmatpush3.bf16.msra.mxu1 %v5515_v1  ;;  %v1259_v1 = vshll.u32 %v6389_v50, 16  ;;  %v1281_v56 = vshrl.u32 %v6423_v46, 16 }
  0xf2   : > { %v1249_v52 = vrot.slane %v1247_v49, 1  ;;  %5236 = vmatprep.subr.bf16.mxu1 %v5525_v41  ;;  %v1422_v49 = vrot.slane %v6362_v51, 1 }
  0xf3   : > { %2644 = vmatmul.mubr.bf16.gmra.mxu1 %v6284_v34  ;;  %2290 = vmatmul.mubr.bf16.gmra.mxu0 %v6303_v57  ;;  %v1233_v34 = vshrl.u32 %v6356_v38, 16  ;;  %v1237_v57 = vrot.slane %v1235_v16, 1  ;;  %v1261_v17 = vrot.slane %v1259_v1, 1  ;;  %v1050_v1 = vld [vmem:[#allocation2 + $0x54] sm:$0xe] }
  0xf4   : > { %2651 = vmatprep.mubr.bf16.mxu1 %v1219_v43  ;;  %2297 = vmatprep.mubr.bf16.mxu0 %v1851_v5  ;;  %v1250_v59 = vor.u32 %v1249_v52, %v1245_v42  ;;  %v6402_v43 = vcombine.low %v1015_v55, %v6397_v9  ;;  %v1414_v5 = vsel %vm1408_vm9, %v1412_v45, %v1413_v3  ;;  %v5514_v42 = vld [vmem:[#allocation6 + $0x1a8] sm:$0xff]   ;;  %v5518_v45 = vld [vmem:[#allocation6 + $0x1a0] sm:$0xff]  }
  0xf5   : > { %v1238_v44 = vor.u32 %v1237_v57, %v1233_v34  ;;  %5237 = vmatpush3.bf16.msra.mxu1 %v5525_v41  ;;  %v1266_v34 = vrot.slane %v1264_v0, 1  ;;  %v1048_v57 = vld [vmem:[#allocation2 + $0x3c] sm:$0xe]  ;;  %v1262_v28 = vor.u32 %v1261_v17, %v1257_v20  ;;  %v1019_v3 = vld [vmem:[#allocation2 + $0x6c] sm:$0xf]  ;;  %v5530_v20 = vld [vmem:[#allocation6 + $0x1d0] sm:$0xff]  }
  0xf6   : > { %v1271_v16 = vshll.u32 %v6402_v43, 16  ;;  %v4487_v22 = vcombine.low %v1048_v57, %v6365_v19  ;;  %v6431_v19 = vld [vmem:[#allocation2 + $0x68] ss:$0 sps:$4 sm:$0x11]  }
  0xf7   : > { %v1267_v41 = vsel %vm1183_vm10, %v1262_v28, %v1266_v34  ;;  %v1434_v34 = vrot.slane %v6431_v19, 1  ;;  %v5537_v57 = vld [vmem:[#allocation6 + $0x1c8] sm:$0xff]  }
  0xf8   : > { %v1273_v48 = vrot.slane %v1271_v16, 1  ;;  %v1424_v55 = vrot.slane %v4487_v22, 1  ;;  %v1021_v16 = vld [vmem:[#allocation2 + $0x78] sm:$0xf]  ;;  %v5539_v22 = vld [vmem:[#allocation6 + $0x188] sm:$0xff]  }
  0xfa   : > { %v1426_v0 = vsel %vm1408_vm9, %v1424_v55, %v1425_v11  ;;  %v1054_v55 = vld [vmem:[#allocation2 + $0x84] sm:$0xe]  ;;  %v1055_v11 = vld [vmem:[#allocation2 + $0x90] sm:$0xe] }
  0xfb   : > { %2652 = vmatmul.mubr.bf16.gmra.mxu1 %v6307_v10  ;;  %2298 = vmatmul.mubr.bf16.gmra.mxu0 %v6314_v63  ;;  %v1252_v10 = vshll.u32 %v6376_v29, 16  ;;  %v1243_v63 = vsel %vm1183_vm10, %v1238_v44, %v1242_v31  ;;  %v1421_v31 = vrot.slane %v4486_v23, 1  ;;  %v1049_v44 = vld [vmem:[#allocation2 + $0x48] sm:$0xe]  ;;  %v1288_v29 = vshll.u32 %v6431_v19, 16 }
  0xfc   : > { %2659 = vmatprep.mubr.bf16.mxu1 %v1231_v13  ;;  %2305 = vmatprep.mubr.bf16.mxu0 %v1863_v27  ;;  %v1418_v13 = vrot.slane %v4485_v40, 1  ;;  %v5538_v27 = vld [vmem:[#allocation6 + $0x218] sm:$0xff]   ;;  %v5512_v23 = vld [vmem:[#allocation2 + $0x74] ss:$0 sps:$4 sm:$0x11]  }
  0xfd   : > { %v1254_v60 = vrot.slane %v1252_v10, 1  ;;  %v1423_v51 = vsel %vm1408_vm9, %v1421_v31, %v1422_v49  ;;  %v4488_v10 = vcombine.low %v1049_v44, %v6382_v36  ;;  %v5523_v36 = vld [vmem:[#allocation6 + $0x1d8] sm:$0xff]   ;;  %v1290_v17 = vrot.slane %v1288_v29, 1 }
  0xfe   : > { %v1420_v37 = vsel %vm1408_vm9, %v1418_v13, %v1419_v58  ;;  %v5524_v40 = vld [vmem:[#allocation6 + $0x198] sm:$0xff]   ;;  %v1052_v13 = vld [vmem:[#allocation2 + $0x6c] sm:$0xe]  ;;  %v5531_v58 = vld [vmem:[#allocation6 + $0x190] sm:$0xff]  }
  0xff   : > { %v1255_v6 = vsel %vm1183_vm10, %v1250_v59, %v1254_v60  ;;  %v6435_v59 = vld [vmem:[#allocation2 + $0x70] sm:$0xf]  ;;  %v1427_v60 = vrot.slane %v4488_v10, 1  ;;  %v1437_v10 = vrot.slane %v5512_v23, 1 }
 0x103   : > { %2660 = vmatmul.mubr.bf16.gmra.mxu1 %v6338_v39  ;;  %2306 = vmatmul.mubr.bf16.gmra.mxu0 %v6332_v33  ;;  %v1416_v39 = vrot.slane %v6319_v12, 1  ;;  %v5532_v33 = vld [vmem:[#allocation6 + $0x220] sm:$0xff]   ;;  %v6411_v12 = vld [vmem:[#allocation2 + $0x5c] ss:$0 sps:$4 sm:$0x11]  }
 0x104   : > { %2667 = vmatprep.mubr.bf16.mxu1 %v1243_v63  ;;  %5204 = vmatprep.mubr.bf16.mxu0 %v1411_v54  ;;  %v1276_v4 = vshll.u32 %v6411_v12, 16  ;;  %v5517_v63 = vld [vmem:[#allocation6 + $0x1e0] sm:$0xff]   ;;  %v1283_v54 = vshll.u32 %v6423_v46, 16  ;;  %v1431_v30 = vrot.slane %v6411_v12, 1  ;;  %v4491_v12 = vcombine.low %v1052_v13, %v6435_v59 }
 0x105   : > { %5238 = vmatprep.subr.bf16.mxu1 %v5532_v33  ;;  %v1417_v61 = vsel %vm1408_vm9, %v1415_v53, %v1416_v39  ;;  %v5547_v53 = vld [vmem:[#allocation6 + $0x208] sm:$0xff]  }
 0x106   : > { %5239 = vmatpush3.bf16.msra.mxu1 %v5532_v33  ;;  %v1278_v47 = vrot.slane %v1276_v4, 1  ;;  %v1285_v33 = vrot.slane %v1283_v54, 1 }
 0x107   : > { %5240 = vmatprep.subr.bf16.mxu1 %v5538_v27 }
 0x10a   : > { %5241 = vmatpush3.bf16.msra.mxu1 %v5538_v27  ;;  %v1300_v27 = vshll.u32 %v5512_v23, 16 }
 0x10b   : > { %2668 = vmatmul.mubr.bf16.gmra.mxu1 %v6356_v38  ;;  %5205 = vmatmul.mubr.bf16.vlgmr.msra.gmra.mxu0 %v1414_v5  ;;  %v1269_v38 = vshrl.u32 %v6402_v43, 16  ;;  %v4489_v5 = vcombine.low %v1050_v1, %v6397_v9  ;;  %v1286_v9 = vor.u32 %v1285_v33, %v1281_v56  ;;  %v1026_v1 = vld [vmem:[#allocation2 + $0x94] sm:$0xf] }
 0x10c   : > { %2675 = vmatprep.mubr.bf16.mxu1 %v1255_v6  ;;  %5001 = vmatpush3.bf16.msra.mxu0 %v5502_v21  ;;  %v5548_v21 = vld [vmem:[#allocation6 + $0x200] sm:$0xff]   ;;  %v4490_v6 = vcombine.low %v1051_v7, %v6416_v25 }
 0x10d   : > { %5208 = vmatprep.mubr.bf16.mxu0 %v1417_v61  ;;  %5002 = vmatprep.subr.bf16.mxu0 %v5507_v8  ;;  %v1274_v52 = vor.u32 %v1273_v48, %v1269_v38  ;;  %v1022_v61 = vld [vmem:[#allocation2 + $0x7c] sm:$0xf]  ;;  %v1291_v31 = vsel %vm1183_vm10, %v1286_v9, %v1290_v17 }
 0x10e   : > { %5242 = vmatprep.subr.bf16.mxu1 %v5540_v15  ;;  %v1433_v25 = vrot.slane %v4490_v6, 1  ;;  %v6452_v28 = vcombine.low %v1021_v16, %v1022_v61  ;;  %v1025_v6 = vld [vmem:[#allocation2 + $0x90] sm:$0xf]  ;;  %v1056_v16 = vld [vmem:[#allocation2 + $0x9c] sm:$0xe] }
 0x10f   : > { %5243 = vmatpush3.bf16.msra.mxu1 %v5540_v15  ;;  %v1279_v39 = vsel %vm1183_vm10, %v1274_v52, %v1278_v47  ;;  %v5520_v15 = vld [vmem:[#allocation2 + $0x80] ss:$0 sps:$4 sm:$0x11]   ;;  %v1024_v47 = vld [vmem:[#allocation2 + $0x88] sm:$0xf]  ;;  %v6483_v13 = vcombine.low %v1025_v6, %v1026_v1 }
 0x110   : > { %5003 = vmatpush3.bf16.msra.mxu0 %v5509_v24  ;;  %5244 = vmatprep.subr.bf16.mxu1 %v5547_v53  ;;  %v1430_v24 = vrot.slane %v4489_v5, 1  ;;  %v1435_v44 = vsel %vm1408_vm9, %v1433_v25, %v1434_v34  ;;  %v1440_v52 = vrot.slane %v5520_v15, 1  ;;  %v6472_v5 = vld [vmem:[#allocation2 + $0x98] ss:$0 sps:$4 sm:$0x11]  }
 0x111   : > { %5004 = vmatprep.subr.bf16.mxu0 %v5510_v35  ;;  %v1446_v9 = vrot.slane %v6472_v5, 1 }
 0x112   : > { %v1432_v49 = vsel %vm1408_vm9, %v1430_v24, %v1431_v30  ;;  %v6480_v30 = vld [vmem:[#allocation2 + $0x28] sm:$0xf] }
 0x113   : > { %2676 = vmatmul.mubr.bf16.gmra.mxu1 %v6370_v26  ;;  %5209 = vmatmul.mubr.bf16.gmra.mxu0 %v1420_v37  ;;  %v1428_v26 = vrot.slane %v6392_v32, 1  ;;  %v6444_v32 = vcombine.low %v1019_v3, %v6435_v59  ;;  %v5545_v37 = vld [vmem:[#allocation6 + $0x1c0] sm:$0xff]   ;;  %v2894_v3 = vld [vmem:[#allocation2 + $0x18] sm:$0xf]  ;;  %v1305_v59 = vshrl.u32 %v6452_v28, 16 }
 0x114   : > { %2683 = vmatprep.mubr.bf16.mxu1 %v1267_v41  ;;  %5212 = vmatprep.mubr.bf16.mxu0 %v1423_v51  ;;  %v1302_v41 = vrot.slane %v1300_v27, 1  ;;  %v1307_v51 = vshll.u32 %v6452_v28, 16 }
 0x115   : > { %5005 = vmatpush3.bf16.msra.mxu0 %v5514_v42  ;;  %v1429_v8 = vsel %vm1408_vm9, %v1427_v60, %v1428_v26  ;;  %5245 = vmatpush3.bf16.msra.mxu1 %v5547_v53  ;;  %v1295_v35 = vshll.u32 %v6444_v32, 16  ;;  %v1293_v38 = vshrl.u32 %v6444_v32, 16  ;;  %v1023_v42 = vld [vmem:[#allocation2 + $0x84] sm:$0xf]  ;;  %v1312_v60 = vshll.u32 %v5520_v15, 16 }
 0x116   : > { %5006 = vmatprep.subr.bf16.mxu0 %v5517_v63  ;;  %5246 = vmatprep.subr.bf16.mxu1 %v5548_v21  ;;  %v1436_v63 = vrot.slane %v4491_v12, 1  ;;  %v6464_v26 = vcombine.low %v1023_v42, %v1024_v47  ;;  %v4493_v53 = vcombine.low %v1054_v55, %v1024_v47  ;;  %v1331_v15 = vshll.u32 %v6483_v13, 16  ;;  %v2898_v42 = vld [vmem:[#allocation2 + $0x30] sm:$0xf] }
 0x117   : > { %v1297_v4 = vrot.slane %v1295_v35, 1  ;;  %v1336_v55 = vshll.u32 %v6472_v5, 16  ;;  %v405_v5 = vld [vmem:[%s5922_s30 + $0xf8] sm:$0xff] }
 0x118   : > { %v1438_v7 = vsel %vm1408_vm9, %v1436_v63, %v1437_v10  ;;  %v1317_v35 = vshrl.u32 %v6464_v26, 16  ;;  %v6498_v10 = vld [vmem:[#allocation2 + $0x34] sm:$0xf] }
 0x119   : > { %5007 = vmatpush3.bf16.msra.mxu0 %v5518_v45  ;;  %5247 = vmatpush3.bf16.msra.mxu1 %v5548_v21  ;;  %v1298_v19 = vor.u32 %v1297_v4, %v1293_v38  ;;  %v5546_v45 = vld [vmem:[#allocation6 + $0x180] sm:$0xff]  }
 0x11a   : > { %5008 = vmatprep.subr.bf16.mxu0 %v5523_v36  ;;  %v1309_v36 = vrot.slane %v1307_v51, 1 }
 0x11b   : > { %2684 = vmatmul.mubr.bf16.gmra.mxu1 %v6389_v50  ;;  %5213 = vmatmul.mubr.bf16.gmra.mxu0 %v1426_v0  ;;  %v1053_v50 = vld [vmem:[#allocation2 + $0x78] sm:$0xe]  ;;  %v1303_v29 = vsel %vm1183_vm10, %v1298_v19, %v1302_v41  ;;  %v5527_v0 = vld [vmem:[#allocation2 + $0x8c] ss:$0 sps:$4 sm:$0x11]   ;;  %v404_v19 = vld [vmem:[%s5922_s30 + $0xf0] sm:$0xff] }
 0x11c   : > { %2691 = vmatprep.mubr.bf16.mxu1 %v1279_v39  ;;  %5216 = vmatprep.mubr.bf16.mxu0 %v1429_v8  ;;  %v4492_v48 = vcombine.low %v1053_v50, %v1022_v61  ;;  %v4494_v39 = vcombine.low %v1055_v11, %v1026_v1  ;;  %v1310_v21 = vor.u32 %v1309_v36, %v1305_v59  ;;  %v1314_v8 = vrot.slane %v1312_v60, 1  ;;  %v6477_v61 = vld [vmem:[#allocation2 + $0x20] ss:$0 sps:$4 sm:$0x11]  }
 0x11d   : > { %5009 = vmatpush3.bf16.msra.mxu0 %v5524_v40  ;;  %v1319_v40 = vshll.u32 %v6464_v26, 16  ;;  %v1443_v17 = vrot.slane %v5527_v0, 1  ;;  %v1324_v34 = vshll.u32 %v5527_v0, 16  ;;  %v3084_v38 = vshll.u32 %v6477_v61, 16  ;;  %v6518_v0 = vld [vmem:[#allocation2 + $0x40] sm:$0xf] }
 0x11e   : > { %5010 = vmatprep.subr.bf16.mxu0 %v5530_v20  ;;  %v1439_v54 = vrot.slane %v4492_v48, 1  ;;  %v1442_v20 = vrot.slane %v4493_v53, 1  ;;  %v1445_v23 = vrot.slane %v4494_v39, 1  ;;  %v1315_v50 = vsel %vm1183_vm10, %v1310_v21, %v1314_v8  ;;  %v6521_v8 = vld [vmem:[#allocation2 + $0x38] ss:$0 sps:$4 sm:$0x11]  }
 0x11f   : > { %v1321_v25 = vrot.slane %v1319_v40, 1  ;;  %v3086_v63 = vrot.slane %v3084_v38, 1  ;;  %v6511_v36 = vcombine.low %v2898_v42, %v6498_v10  ;;  %v436_v60 = vmax.f32 %v404_v19, 0.0  ;;  %v371_v38 = vld [vmem:[#allocation2 + $0xbc] sm:$0x1] }
 0x120   : > { %v1441_v56 = vsel %vm1408_vm9, %v1439_v54, %v1440_v52  ;;  %v1447_v27 = vsel %vm1408_vm9, %v1445_v23, %v1446_v9  ;;  %v1329_v54 = vshrl.u32 %v6483_v13, 16  ;;  %v1338_v21 = vrot.slane %v1336_v55, 1  ;;  %v2902_v42 = vld [vmem:[#allocation2 + $0x48] sm:$0xf] }
 0x121   : > { %5011 = vmatpush3.bf16.msra.mxu0 %v5531_v58  ;;  %v1028_v58 = vld [vmem:[#allocation2 + $0xa0] sm:$0xf]  ;;  %v1322_v48 = vor.u32 %v1321_v25, %v1317_v35  ;;  %v4753_v40 = vpack.c.bf16 %v436_v60, %v436_v60  ;;  %v3103_v23 = vshll.u32 %v6511_v36, 16  ;;  %v437_v9 = vmax.f32 %v405_v5, 0.0 }
 0x122   : > { %5012 = vmatprep.subr.bf16.mxu0 %v5537_v57  ;;  %v1444_v57 = vsel %vm1408_vm9, %v1442_v20, %v1443_v17  ;;  %v3108_v35 = vshll.u32 %v6521_v8, 16 }
 0x123   : > { %2692 = vmatmul.mubr.bf16.gmra.mxu1 %v6402_v43  ;;  %5217 = vmatmul.mubr.bf16.gmra.mxu0 %v1432_v49  ;;  %v6461_v43 = vld [vmem:[#allocation2 + $0x1c] sm:$0xf]  ;;  %v792_v25 = vshrl.u32 %v4753_v40, 16  ;;  %v795_v19 = vshll.u32 %v4753_v40, 16 }
 0x124   : > { %2699 = vmatprep.mubr.bf16.mxu1 %v1291_v31  ;;  %5220 = vmatprep.mubr.bf16.mxu0 %v1435_v44  ;;  %v6470_v33 = vcombine.low %v2894_v3, %v6461_v43  ;;  %v4495_v31 = vcombine.low %v1056_v16, %v1028_v58  ;;  %v6493_v44 = vld [vmem:[#allocation2 + $0xa4] ss:$0 sps:$4 sm:$0x11]   ;;  %v1333_v3 = vrot.slane %v1331_v15, 1 }
 0x125   : > { %5013 = vmatpush3.bf16.msra.mxu0 %v5539_v22  ;;  %v1326_v22 = vrot.slane %v1324_v34, 1  ;;  %v1449_v51 = vrot.slane %v6493_v44, 1  ;;  %v6538_v15 = vld [vmem:[#allocation2 + $0x44] ss:$0 sps:$4 sm:$0x11]  }
 0x126   : > { %5014 = vmatprep.subr.bf16.mxu0 %v5545_v37  ;;  %v3079_v24 = vshll.u32 %v6470_v33, 16  ;;  %v3077_v49 = vshrl.u32 %v6470_v33, 16  ;;  %v1027_v37 = vld [vmem:[#allocation2 + $0x9c] sm:$0xf]  ;;  %v1448_v41 = vrot.slane %v4495_v31, 1  ;;  %v1334_v6 = vor.u32 %v1333_v3, %v1329_v54 }
 0x127   : > { %v6505_v11 = vcombine.low %v1027_v37, %v1028_v58  ;;  %v2936_v31 = vld [vmem:[#allocation2 + $0x18] sm:$0xe]  ;;  %v3110_v37 = vrot.slane %v3108_v35, 1  ;;  %v3120_v54 = vshll.u32 %v6538_v15, 16 }
 0x128   : > { %v3081_v12 = vrot.slane %v3079_v24, 1  ;;  %v1450_v59 = vsel %vm1408_vm9, %v1448_v41, %v1449_v51  ;;  %v1339_v34 = vsel %vm1183_vm10, %v1334_v6, %v1338_v21 }
 0x129   : > { %5015 = vmatpush3.bf16.msra.mxu0 %v5546_v45  ;;  %v6507_v45 = vld [vmem:[#allocation2 + $0x2c] ss:$0 sps:$4 sm:$0x11]   ;;  %v1341_v16 = vshrl.u32 %v6505_v11, 16 }
 0x12a   : > { %v3082_v47 = vor.u32 %v3081_v12, %v3077_v49  ;;  %v3096_v39 = vshll.u32 %v6507_v45, 16 }
 0x12b   : > { %2700 = vmatmul.mubr.bf16.gmra.mxu1 %v6423_v46  ;;  %5221 = vmatmul.mubr.bf16.gmra.mxu0 %v1438_v7  ;;  %v2896_v46 = vld [vmem:[#allocation2 + $0x24] sm:$0xf] }
 0x12c   : > { %2707 = vmatprep.mubr.bf16.mxu1 %v1303_v29  ;;  %5224 = vmatprep.mubr.bf16.mxu0 %v1441_v56  ;;  %v6491_v4 = vcombine.low %v2896_v46, %v6480_v30  ;;  %v3087_v1 = vsel %vm1183_vm10, %v3082_v47, %v3086_v63  ;;  %v1343_v29 = vshll.u32 %v6505_v11, 16  ;;  %v2900_v56 = vld [vmem:[#allocation2 + $0x3c] sm:$0xf]  ;;  %v3098_v17 = vrot.slane %v3096_v39, 1  ;;  %v6541_v47 = vld [vmem:[#allocation2 + $0x4c] sm:$0xf] }
 0x12d   : > { %v1348_v46 = vshll.u32 %v6493_v44, 16  ;;  %v6554_v21 = vcombine.low %v2902_v42, %v6541_v47 }
 0x12e   : > { %v3091_v52 = vshll.u32 %v6491_v4, 16  ;;  %v3089_v7 = vshrl.u32 %v6491_v4, 16  ;;  %v1345_v24 = vrot.slane %v1343_v29, 1 }
 0x130   : > { %v3093_v53 = vrot.slane %v3091_v52, 1  ;;  %v1346_v44 = vor.u32 %v1345_v24, %v1341_v16  ;;  %v794_v52 = vrot.slane %v792_v25, 7  ;;  %v3301_v24 = vrot.slane %v6477_v61, 1 }
 0x132   : > { %v3094_v20 = vor.u32 %v3093_v53, %v3089_v7  ;;  %v798_v29 = vrot.slane %v794_v52, 4  ;;  %v797_v40 = vor.u32 %v795_v19, %v794_v52 }
 0x133   : > { %2708 = vmatmul.mubr.bf16.gmra.mxu1 %v6444_v32  ;;  %5225 = vmatmul.mubr.bf16.gmra.mxu0 %v1444_v57  ;;  %v1327_v32 = vsel %vm1183_vm10, %v1322_v48, %v1326_v22  ;;  %v3105_v57 = vrot.slane %v3103_v23, 1  ;;  %v4754_v48 = vpack.c.bf16 %v437_v9, %v437_v9  ;;  %v1350_v22 = vrot.slane %v1348_v46, 1  ;;  %v2937_v9 = vld [vmem:[#allocation2 + $0x24] sm:$0xe] }
 0x134   : > { %2715 = vmatprep.mubr.bf16.mxu1 %v1315_v50  ;;  %5228 = vmatprep.mubr.bf16.mxu0 %v1447_v27  ;;  %v3099_v58 = vsel %vm1183_vm10, %v3094_v20, %v3098_v17  ;;  %v3101_v50 = vshrl.u32 %v6511_v36, 16  ;;  %v321_v27 = vld [vmem:[#allocation2 + $0xb4] sm:$0x1]  ;;  %v6561_v46 = vld [vmem:[#allocation2 + $0x50] ss:$0 sps:$4 sm:$0x11]  }
 0x135   : > { %v322_v63 = vsel %vm5934_vm2, 0, %v321_v27  ;;  %v803_v60 = vshll.u32 %v4754_v48, 16  ;;  %v1351_v53 = vsel %vm1183_vm10, %v1346_v44, %v1350_v22 }
 0x136   : > { %323 = vst [vmem:[#allocation2 + $0xb4] sm:$0x1] %v322_v63 }
 0x13b   : > { %2716 = vmatmul.mubr.bf16.gmra.mxu1 %v6452_v28  ;;  %5229 = vmatmul.mubr.bf16.gmra.mxu0 %v1450_v59  ;;  %v6525_v28 = vcombine.low %v2900_v56, %v6518_v0  ;;  %v800_v59 = vshrl.u32 %v4754_v48, 16  ;;  %v4615_v48 = vcombine.low %v2937_v9, %v6480_v30 }
 0x13c   : > { %2723 = vmatprep.mubr.bf16.mxu1 %v1327_v32  ;;  %3581 = vmatprep.mubr.bf16.mxu0 %v3087_v1  ;;  %v4614_v1 = vcombine.low %v2936_v31, %v6461_v43 }
 0x13d   : > { %v3115_v49 = vshll.u32 %v6525_v28, 16  ;;  %v3113_v41 = vshrl.u32 %v6525_v28, 16  ;;  %v802_v56 = vrot.slane %v800_v59, 7 }
 0x13e   : > { %v3300_v43 = vrot.slane %v4614_v1, 1  ;;  %v6592_v1 = vld [vmem:[#allocation2 + $0x5c] ss:$0 sps:$4 sm:$0x11]  }
 0x13f   : > { %v3117_v32 = vrot.slane %v3115_v49, 1  ;;  %v805_v17 = vor.u32 %v803_v60, %v802_v56  ;;  %v807_v23 = vrot.slane %v802_v56, 4  ;;  %v2904_v49 = vld [vmem:[#allocation2 + $0x54] sm:$0xf] }
 0x140   : > { %v3302_v22 = vsel %vm1408_vm9, %v3300_v43, %v3301_v24 }
 0x141   : > { %v806_v25 = vsel %vm5972_vm8, %v798_v29, %v805_v17 }
 0x142   : > { %966 = vst [vmem:[#allocation2 + $0xb8] sm:$0xf] %v806_v25 }
 0x143   : > { %v6534_v12 = vpop.f32.mrf.mxu1  ;;  %2724 = vmatmul.mubr.bf16.gmra.mxu1 %v6464_v26  ;;  %3582 = vmatmul.mubr.bf16.vlgmr.msra.gmra.mxu0 %v6470_v33  ;;  %v3106_v26 = vor.u32 %v3105_v57, %v3101_v50  ;;  %v372_v33 = vsel %vm5940_vm4, 0, %v371_v38  ;;  %v3118_v50 = vor.u32 %v3117_v32, %v3113_v41  ;;  %v3127_v57 = vshll.u32 %v6554_v21, 16  ;;  %v6570_v38 = vld [vmem:[#allocation2 + $0x58] sm:$0xf] }
 0x144   : > { %2731 = vmatprep.mubr.bf16.mxu1 %v1339_v34  ;;  %3589 = vmatprep.mubr.bf16.mxu0 %v3099_v58  ;;  %v4772_v51 = vpop.f32.mrf.mxu0  ;;  %373 = vst [vmem:[#allocation2 + $0xbc] sm:$0x1] %v372_v33  ;;  %v963_v34 = vld [vmem:[#allocation2 + $0xb4] sm:$0xf]  ;;  %v2938_v58 = vld [vmem:[#allocation2 + $0x30] sm:$0xe]  ;;  %v6584_v14 = vcombine.low %v2904_v49, %v6570_v38 }
 0x145   : > { %v2348_v3 = vpop.f32.mrf.mxu1  ;;  %v3111_v18 = vsel %vm1183_vm10, %v3106_v26, %v3110_v37  ;;  %v4616_v62 = vcombine.low %v2938_v58, %v6498_v10  ;;  %v3125_v37 = vshrl.u32 %v6554_v21, 16  ;;  %v3132_v41 = vshll.u32 %v6561_v46, 16 }
 0x146   : > { %v4773_v55 = vpop.f32.mrf.mxu0  ;;  %v3129_v63 = vrot.slane %v3127_v57, 1  ;;  %v3303_v10 = vrot.slane %v4615_v48, 1  ;;  %v3304_v33 = vrot.slane %v6507_v45, 1  ;;  %v5568_v57 = vld [vmem:[#allocation2 + $0x68] ss:$0 sps:$4 sm:$0x11]  }
 0x147   : > { %v4774_v7 = vadd.f32 %v4773_v55, %v4772_v51  ;;  %v5163_v6 = vpop.f32.mrf.mxu1  ;;  %v3306_v32 = vrot.slane %v4616_v62, 1  ;;  %v2940_v55 = vld [vmem:[#allocation2 + $0x48] sm:$0xe]  ;;  %v3134_v60 = vrot.slane %v3132_v41, 1 }
 0x148   : > { %v4775_v39 = vpop.f32.mrf.mxu0  ;;  %v3130_v59 = vor.u32 %v3129_v63, %v3125_v37  ;;  %v3305_v29 = vsel %vm1408_vm9, %v3303_v10, %v3304_v33 }
 0x149   : > { %v6551_v5 = vadd.f32 %v4774_v7, %v2348_v3  ;;  %v6568_v31 = vpop.f32.mrf.mxu1 }
 0x14a   : > { %v4776_v20 = vpop.f32.mrf.mxu0 }
 0x14b   : > { %2732 = vmatmul.mubr.bf16.gmra.mxu1 %v6483_v13  ;;  %3590 = vmatmul.mubr.bf16.gmra.mxu0 %v6491_v4  ;;  %v6558_v16 = vadd.f32 %v4776_v20, %v4775_v39  ;;  %v3122_v13 = vrot.slane %v3120_v54, 1  ;;  %v964_v4 = vsel %vm5966_vm7, %v797_v40, %v963_v34  ;;  %v967_v27 = vld [vmem:[#allocation2 + $0xbc] sm:$0x1]  ;;  %v3307_v54 = vrot.slane %v6521_v8, 1  ;;  %v2907_v39 = vld [vmem:[#allocation2 + $0x64] sm:$0xf] }
 0x14c   : > { %2739 = vmatprep.mubr.bf16.mxu1 %v1351_v53  ;;  %3597 = vmatprep.mubr.bf16.mxu0 %v3111_v18  ;;  %v4778_v35 = vpop.f32.mrf.mxu0  ;;  %965 = vst [vmem:[#allocation2 + $0xb4] sm:$0xf] %v964_v4  ;;  %v968_v2 = vsel %vm5934_vm2, %v807_v23, %v967_v27  ;;  %v4618_v40 = vcombine.low %v2940_v55, %v6541_v47  ;;  %v3137_v20 = vshrl.u32 %v6584_v14, 16  ;;  %v3310_v34 = vrot.slane %v6538_v15, 1 }
 0x14d   : > { %969 = vst [vmem:[#allocation2 + $0xbc] sm:$0x1] %v968_v2  ;;  %v3123_v42 = vsel %vm1183_vm10, %v3118_v50, %v3122_v13  ;;  %v3308_v18 = vsel %vm1408_vm9, %v3306_v32, %v3307_v54  ;;  %v3135_v23 = vsel %vm1183_vm10, %v3130_v59, %v3134_v60  ;;  %v3313_v47 = vrot.slane %v6561_v46, 1  ;;  %v2941_v13 = vld [vmem:[#allocation2 + $0x54] sm:$0xe] }
 0x14e   : > { %v4779_v61 = vpop.f32.mrf.mxu0  ;;  %v3312_v50 = vrot.slane %v4618_v40, 1  ;;  %v2942_v2 = vld [vmem:[#allocation2 + $0x60] sm:$0xe]  ;;  %v3319_v60 = vrot.slane %v5568_v57, 1 }
 0x14f   : > { %v4780_v44 = vadd.f32 %v4779_v61, %v4778_v35  ;;  %v6586_v30 = vpop.f32.mrf.mxu1 }
 0x150   : > { %v4781_v51 = vpop.f32.mrf.mxu0  ;;  %v3314_v37 = vsel %vm1408_vm9, %v3312_v50, %v3313_v47 }
 0x151   : > { %v6581_v52 = vadd.f32 %v6534_v12, %v4780_v44  ;;  %v2939_v12 = vld [vmem:[#allocation2 + $0x3c] sm:$0xe]  ;;  %v2364_v45 = vpop.f32.mrf.mxu1  ;;  %v2908_v44 = vld [vmem:[#allocation2 + $0x6c] sm:$0xf] }
 0x152   : > { %v4782_v26 = vpop.f32.mrf.mxu0  ;;  %v4617_v8 = vcombine.low %v2939_v12, %v6518_v0  ;;  %v3316_v12 = vrot.slane %v6592_v1, 1 }
 0x153   : > { %2740 = vmatmul.mubr.bf16.gmra.mxu1 %v6505_v11  ;;  %3598 = vmatmul.mubr.bf16.gmra.mxu0 %v6511_v36  ;;  %v4783_v19 = vadd.f32 %v4782_v26, %v4781_v51  ;;  %v3139_v11 = vshll.u32 %v6584_v14, 16  ;;  %v2906_v36 = vld [vmem:[#allocation2 + $0x60] sm:$0xf]  ;;  %v5167_v35 = vpop.f32.mrf.mxu1  ;;  %v3156_v51 = vshll.u32 %v5568_v57, 16 }
 0x154   : > { %5248 = vmatprep.mubr.bf16.mxu1 %v3302_v22  ;;  %3605 = vmatprep.mubr.bf16.mxu0 %v3123_v42  ;;  %v4784_v3 = vpop.f32.mrf.mxu0  ;;  %v6606_v24 = vcombine.low %v2906_v36, %v2907_v39  ;;  %v3309_v0 = vrot.slane %v4617_v8, 1  ;;  %v4619_v22 = vcombine.low %v2941_v13, %v6570_v38  ;;  %v4620_v42 = vcombine.low %v2942_v2, %v2907_v39  ;;  %v2911_v8 = vld [vmem:[#allocation2 + $0x7c] sm:$0xf] }
 0x155   : > { %v6594_v7 = vadd.f32 %v5163_v6, %v4783_v19  ;;  %v3144_v6 = vshll.u32 %v6592_v1, 16  ;;  %v3141_v43 = vrot.slane %v3139_v11, 1  ;;  %v6614_v48 = vpop.f32.mrf.mxu1  ;;  %v2943_v11 = vld [vmem:[#allocation2 + $0x6c] sm:$0xe] }
 0x156   : > { %v4785_v53 = vpop.f32.mrf.mxu0  ;;  %v3151_v49 = vshll.u32 %v6606_v24, 16  ;;  %v3311_v46 = vsel %vm1408_vm9, %v3309_v0, %v3310_v34  ;;  %v3149_v41 = vshrl.u32 %v6606_v24, 16  ;;  %v3315_v38 = vrot.slane %v4619_v22, 1 }
 0x157   : > { %v4786_v56 = vadd.f32 %v4785_v53, %v4784_v3  ;;  %v3142_v27 = vor.u32 %v3141_v43, %v3137_v20  ;;  %v3146_v61 = vrot.slane %v3144_v6, 1  ;;  %v3318_v59 = vrot.slane %v4620_v42, 1 }
 0x158   : > { %v4787_v17 = vpop.f32.mrf.mxu0  ;;  %v3153_v10 = vrot.slane %v3151_v49, 1  ;;  %v3158_v53 = vrot.slane %v3156_v51, 1  ;;  %v3317_v1 = vsel %vm1408_vm9, %v3315_v38, %v3316_v12  ;;  %v2915_v12 = vld [vmem:[#allocation2 + $0x94] sm:$0xf] }
 0x159   : > { %v6604_v9 = vadd.f32 %v4786_v56, %v2364_v45  ;;  %v3147_v26 = vsel %vm1183_vm10, %v3142_v27, %v3146_v61  ;;  %v5574_v61 = vld [vmem:[#allocation2 + $0x80] ss:$0 sps:$4 sm:$0x11]  }
 0x15a   : > { %v4788_v25 = vpop.f32.mrf.mxu0  ;;  %v3154_v45 = vor.u32 %v3153_v10, %v3149_v41  ;;  %v2946_v41 = vld [vmem:[#allocation2 + $0x90] sm:$0xe]  ;;  %v3180_v42 = vshll.u32 %v5574_v61, 16 }
 0x15b   : > { %5249 = vmatmul.mubr.bf16.vlgmr.msra.gmra.mxu1 %v3305_v29  ;;  %3606 = vmatmul.mubr.bf16.gmra.mxu0 %v6525_v28  ;;  %v6611_v58 = vadd.f32 %v4788_v25, %v4787_v17  ;;  %v2909_v28 = vld [vmem:[#allocation2 + $0x70] sm:$0xf]  ;;  %v2910_v29 = vld [vmem:[#allocation2 + $0x78] sm:$0xf]  ;;  %v3320_v17 = vsel %vm1408_vm9, %v3318_v59, %v3319_v60  ;;  %v4624_v59 = vcombine.low %v2946_v41, %v2915_v12 }
 0x15c   : > { %5252 = vmatprep.mubr.bf16.mxu1 %v3308_v18  ;;  %3613 = vmatprep.mubr.bf16.mxu0 %v3135_v23  ;;  %v4790_v4 = vpop.f32.mrf.mxu0  ;;  %v6624_v19 = vcombine.low %v2908_v44, %v2909_v28  ;;  %v2944_v18 = vld [vmem:[#allocation2 + $0x78] sm:$0xe]  ;;  %v4621_v20 = vcombine.low %v2943_v11, %v2909_v28  ;;  %v6638_v25 = vcombine.low %v2910_v29, %v2911_v8  ;;  %v2913_v44 = vld [vmem:[#allocation2 + $0x88] sm:$0xf]  ;;  %v3182_v11 = vrot.slane %v3180_v42, 1 }
 0x15d   : > { %v3159_v0 = vsel %vm1183_vm10, %v3154_v45, %v3158_v53  ;;  %v4622_v50 = vcombine.low %v2944_v18, %v2911_v8 }
 0x15e   : > { %v4791_v15 = vpop.f32.mrf.mxu0  ;;  %v3163_v39 = vshll.u32 %v6624_v19, 16  ;;  %v3161_v23 = vshrl.u32 %v6624_v19, 16  ;;  %v3321_v49 = vrot.slane %v4621_v20, 1  ;;  %v3175_v2 = vshll.u32 %v6638_v25, 16 }
 0x15f   : > { %v4792_v62 = vadd.f32 %v4791_v15, %v4790_v4  ;;  %v2912_v15 = vld [vmem:[#allocation2 + $0x84] sm:$0xf]  ;;  %v3324_v22 = vrot.slane %v4622_v50, 1  ;;  %v3173_v51 = vshrl.u32 %v6638_v25, 16 }
 0x160   : > { %v4793_v63 = vpop.f32.mrf.mxu0  ;;  %v3165_v34 = vrot.slane %v3163_v39, 1  ;;  %v6653_v10 = vcombine.low %v2912_v15, %v2913_v44 }
 0x161   : > { %v6622_v33 = vadd.f32 %v6586_v30, %v4792_v62  ;;  %v6626_v32 = vpop.f32.mrf.mxu1  ;;  %v3325_v62 = vrot.slane %v5574_v61, 1 }
 0x162   : > { %v4794_v54 = vpop.f32.mrf.mxu0  ;;  %v3166_v28 = vor.u32 %v3165_v34, %v3161_v23  ;;  %v3187_v8 = vshll.u32 %v6653_v10, 16 }
 0x163   : > { %5253 = vmatmul.mubr.bf16.gmra.mxu1 %v3311_v46  ;;  %3614 = vmatmul.mubr.bf16.gmra.mxu0 %v6554_v21  ;;  %v4795_v55 = vadd.f32 %v4794_v54, %v4793_v63  ;;  %v2380_v3 = vpop.f32.mrf.mxu1  ;;  %v5571_v21 = vld [vmem:[#allocation2 + $0x74] ss:$0 sps:$4 sm:$0x11]   ;;  %v5577_v54 = vld [vmem:[#allocation2 + $0x8c] ss:$0 sps:$4 sm:$0x11]  }
 0x164   : > { %5256 = vmatprep.mubr.bf16.mxu1 %v3314_v37  ;;  %3621 = vmatprep.mubr.bf16.mxu0 %v3147_v26  ;;  %v4796_v30 = vpop.f32.mrf.mxu0  ;;  %v3168_v43 = vshll.u32 %v5571_v21, 16  ;;  %v3322_v4 = vrot.slane %v5571_v21, 1  ;;  %v2945_v37 = vld [vmem:[#allocation2 + $0x84] sm:$0xe]  ;;  %v3177_v26 = vrot.slane %v3175_v2, 1  ;;  %v3328_v29 = vrot.slane %v5577_v54, 1 }
 0x165   : > { %v6630_v36 = vadd.f32 %v5167_v35, %v4795_v55  ;;  %v6634_v40 = vpop.f32.mrf.mxu1  ;;  %v4623_v38 = vcombine.low %v2945_v37, %v2913_v44  ;;  %v2914_v21 = vld [vmem:[#allocation2 + $0x90] sm:$0xf]  ;;  %v3189_v15 = vrot.slane %v3187_v8, 1 }
 0x166   : > { %v4797_v56 = vpop.f32.mrf.mxu0  ;;  %v3170_v46 = vrot.slane %v3168_v43, 1  ;;  %v3323_v63 = vsel %vm1408_vm9, %v3321_v49, %v3322_v4  ;;  %v3178_v45 = vor.u32 %v3177_v26, %v3173_v51  ;;  %v3185_v43 = vshrl.u32 %v6653_v10, 16  ;;  %v6671_v4 = vld [vmem:[#allocation2 + $0xa4] ss:$0 sps:$4 sm:$0x11]  }
 0x167   : > { %v4798_v6 = vadd.f32 %v4797_v56, %v4796_v30  ;;  %v6644_v57 = vpop.f32.mrf.mxu1  ;;  %v6660_v30 = vld [vmem:[#allocation2 + $0x98] ss:$0 sps:$4 sm:$0x11]   ;;  %v3327_v39 = vrot.slane %v4623_v38, 1  ;;  %v3330_v56 = vrot.slane %v4624_v59, 1  ;;  %v3334_v42 = vrot.slane %v6671_v4, 1 }
 0x168   : > { %v4799_v35 = vpop.f32.mrf.mxu0  ;;  %v3171_v55 = vsel %vm1183_vm10, %v3166_v28, %v3170_v46  ;;  %v3331_v18 = vrot.slane %v6660_v30, 1  ;;  %v2919_v49 = vld [vmem:[#allocation2 + $0xac] sm:$0xf]  ;;  %v6680_v37 = vld [vmem:[#allocation2 + $0xb0] ss:$0 sps:$4 sm:$0x11]   ;;  %v3190_v26 = vor.u32 %v3189_v15, %v3185_v43 }
 0x169   : > { %v6641_v47 = vadd.f32 %v4798_v6, %v2380_v3  ;;  %v3326_v3 = vsel %vm1408_vm9, %v3324_v22, %v3325_v62  ;;  %v2948_v6 = vld [vmem:[#allocation2 + $0xa8] sm:$0xe]  ;;  %v3329_v34 = vsel %vm1408_vm9, %v3327_v39, %v3328_v29  ;;  %v3337_v38 = vrot.slane %v6680_v37, 1 }
 0x16a   : > { %v4800_v13 = vpop.f32.mrf.mxu0  ;;  %v3332_v44 = vsel %vm1408_vm9, %v3330_v56, %v3331_v18  ;;  %v4626_v28 = vcombine.low %v2948_v6, %v2919_v49 }
 0x16b   : > { %5257 = vmatmul.mubr.bf16.gmra.mxu1 %v3317_v1  ;;  %3622 = vmatmul.mubr.bf16.gmra.mxu0 %v6584_v14  ;;  %v6646_v27 = vadd.f32 %v4800_v13, %v4799_v35  ;;  %v2917_v1 = vld [vmem:[#allocation2 + $0xa0] sm:$0xf]  ;;  %v3192_v35 = vshll.u32 %v5577_v54, 16  ;;  %v6669_v13 = vcombine.low %v2914_v21, %v2915_v12  ;;  %v2949_v12 = vld [vmem:[#allocation2 + $0xb4] sm:$0xe] }
 0x16c   : > { %3629 = vmatprep.mubr.bf16.mxu0 %v3159_v0  ;;  %5260 = vmatprep.mubr.bf16.mxu1 %v3320_v17  ;;  %v3183_v0 = vsel %vm1183_vm10, %v3178_v45, %v3182_v11  ;;  %v3336_v54 = vrot.slane %v4626_v28, 1  ;;  %v3204_v11 = vshll.u32 %v6660_v30, 16 }
 0x16d   : > { %v3194_v41 = vrot.slane %v3192_v35, 1  ;;  %v3199_v51 = vshll.u32 %v6669_v13, 16  ;;  %v3197_v59 = vshrl.u32 %v6669_v13, 16 }
 0x16e   : > { %v6649_v14 = vpop.f32.mrf.mxu1  ;;  %v3338_v56 = vsel %vm1408_vm9, %v3336_v54, %v3337_v38  ;;  %v3206_v43 = vrot.slane %v3204_v11, 1  ;;  %v2920_v54 = vld [vmem:[#allocation2 + $0xb4] sm:$0xf] }
 0x16f   : > { %v3195_v29 = vsel %vm1183_vm10, %v3190_v26, %v3194_v41  ;;  %v3201_v8 = vrot.slane %v3199_v51, 1 }
 0x170   : > { %v6658_v60 = vpop.f32.mrf.mxu1 }
 0x172   : > { %v6664_v17 = vpop.f32.mrf.mxu1 }
 0x173   : > { %3630 = vmatmul.mubr.bf16.gmra.mxu0 %v6606_v24  ;;  %5261 = vmatmul.mubr.bf16.gmra.mxu1 %v3323_v63  ;;  %v4802_v53 = vpop.f32.mrf.mxu0  ;;  %v2947_v24 = vld [vmem:[#allocation2 + $0x9c] sm:$0xe] }
 0x174   : > { %3637 = vmatprep.mubr.bf16.mxu0 %v3171_v55  ;;  %5264 = vmatprep.mubr.bf16.mxu1 %v3326_v3  ;;  %v4625_v61 = vcombine.low %v2947_v24, %v2917_v1  ;;  %v6677_v22 = vpop.f32.mrf.mxu1  ;;  %v2916_v55 = vld [vmem:[#allocation2 + $0x9c] sm:$0xf] }
 0x175   : > { %v4803_v20 = vpop.f32.mrf.mxu0  ;;  %v6698_v21 = vcombine.low %v2916_v55, %v2917_v1 }
 0x176   : > { %v4804_v23 = vadd.f32 %v4803_v20, %v4802_v53  ;;  %v6693_v53 = vld [vmem:[#allocation2 + $0xbc] ss:$0 sps:$4 sm:$0x11]  }
 0x177   : > { %v4805_v50 = vpop.f32.mrf.mxu0  ;;  %v3340_v24 = vrot.slane %v6693_v53, 1  ;;  %v3211_v35 = vshll.u32 %v6698_v21, 16 }
 0x178   : > { %v6674_v2 = vadd.f32 %v6626_v32, %v4804_v23  ;;  %v3333_v32 = vrot.slane %v4625_v61, 1  ;;  %v3202_v23 = vor.u32 %v3201_v8, %v3197_v59 }
 0x179   : > { %v4806_v46 = vpop.f32.mrf.mxu0 }
 0x17a   : > { %v4807_v62 = vadd.f32 %v4806_v46, %v4805_v50  ;;  %v3335_v45 = vsel %vm1408_vm9, %v3333_v32, %v3334_v42  ;;  %v3207_v28 = vsel %vm1183_vm10, %v3202_v23, %v3206_v43  ;;  %v3213_v46 = vrot.slane %v3211_v35, 1 }
 0x17b   : > { %3638 = vmatmul.mubr.bf16.gmra.mxu0 %v6624_v19  ;;  %5265 = vmatmul.mubr.bf16.gmra.mxu1 %v3329_v34  ;;  %v2921_v19 = vld [vmem:[#allocation2 + $0xb8] sm:$0xf]  ;;  %v3240_v35 = vshll.u32 %v6693_v53, 16 }
 0x17c   : > { %3645 = vmatprep.mubr.bf16.mxu0 %v3183_v0  ;;  %5268 = vmatprep.mubr.bf16.mxu1 %v3332_v44  ;;  %v6685_v63 = vadd.f32 %v6634_v40, %v4807_v62  ;;  %v4627_v39 = vcombine.low %v2949_v12, %v2921_v19  ;;  %v2918_v0 = vld [vmem:[#allocation2 + $0xa8] sm:$0xf]  ;;  %v3216_v62 = vshll.u32 %v6671_v4, 16  ;;  %v3228_v12 = vshll.u32 %v6680_v37, 16 }
 0x17d   : > { %v4598_v41 = vcombine.low %v2918_v0, %v2919_v49  ;;  %v6724_v59 = vcombine.low %v2920_v54, %v2921_v19 }
 0x17e   : > { %v3339_v30 = vrot.slane %v4627_v39, 1  ;;  %v3218_v42 = vrot.slane %v3216_v62, 1  ;;  %v3230_v8 = vrot.slane %v3228_v12, 1 }
 0x17f   : > { %v6688_v3 = vpop.f32.mrf.mxu1  ;;  %v3223_v26 = vshll.u32 %v4598_v41, 16  ;;  %v3221_v4 = vshrl.u32 %v4598_v41, 16  ;;  %v3233_v23 = vshrl.u32 %v6724_v59, 16 }
 0x180   : > { %v3341_v61 = vsel %vm1408_vm9, %v3339_v30, %v3340_v24  ;;  %v5592_v24 = vld [vmem:[#allocation8 + $0x30] sm:$0xff]  }
 0x181   : > { %v6695_v40 = vpop.f32.mrf.mxu1  ;;  %v3225_v49 = vrot.slane %v3223_v26, 1 }
 0x183   : > { %3646 = vmatmul.mubr.bf16.gmra.mxu0 %v6638_v25  ;;  %v4808_v18 = vpop.f32.mrf.mxu0  ;;  %5269 = vmatmul.mubr.bf16.gmra.mxu1 %v3335_v45  ;;  %v6703_v20 = vpop.f32.mrf.mxu1  ;;  %v3209_v25 = vshrl.u32 %v6698_v21, 16  ;;  %v5591_v45 = vld [vmem:[#allocation8 + $0x38] sm:$0xff]  }
 0x184   : > { %3653 = vmatprep.mubr.bf16.mxu0 %v3195_v29  ;;  %5272 = vmatprep.mubr.bf16.mxu1 %v3338_v56  ;;  %v3226_v29 = vor.u32 %v3225_v49, %v3221_v4  ;;  %v3235_v56 = vshll.u32 %v6724_v59, 16 }
 0x185   : > { %v4809_v6 = vpop.f32.mrf.mxu0  ;;  %v6711_v15 = vpop.f32.mrf.mxu1  ;;  %v3214_v32 = vor.u32 %v3213_v46, %v3209_v25  ;;  %5276 = vmatprep.subr.bf16.mxu1 %v5591_v45  ;;  %v5593_v25 = vld [vmem:[#allocation8 + $0x28] sm:$0xff]  }
 0x186   : > { %v4810_v1 = vadd.f32 %v4809_v6, %v4808_v18  ;;  %5277 = vmatpush3.bf16.msra.mxu1 %v5591_v45  ;;  %v3237_v43 = vrot.slane %v3235_v56, 1 }
 0x187   : > { %v4811_v34 = vpop.f32.mrf.mxu0  ;;  %v3219_v55 = vsel %vm1183_vm10, %v3214_v32, %v3218_v42  ;;  %5278 = vmatprep.subr.bf16.mxu1 %v5592_v24  ;;  %v5594_v42 = vld [vmem:[#allocation8 + $0x20] sm:$0xff]  }
 0x188   : > { %v6707_v50 = vadd.f32 %v4810_v1, %v6658_v60 }
 0x189   : > { %v4812_v44 = vpop.f32.mrf.mxu0 }
 0x18a   : > { %v6715_v51 = vadd.f32 %v4812_v44, %v4811_v34  ;;  %5279 = vmatpush3.bf16.msra.mxu1 %v5592_v24  ;;  %v3238_v44 = vor.u32 %v3237_v43, %v3233_v23  ;;  %v5598_v24 = vld [vmem:[#allocation8] sm:$0xff]  }
 0x18b   : > { %3654 = vmatmul.mubr.bf16.gmra.mxu0 %v6653_v10  ;;  %5273 = vmatmul.mubr.bf16.gmra.mxu1 %v3341_v61 }
 0x18c   : > { %3661 = vmatprep.mubr.bf16.mxu0 %v3207_v28  ;;  %v3242_v28 = vrot.slane %v3240_v35, 1  ;;  %5280 = vmatprep.subr.bf16.mxu1 %v5593_v25 }
 0x18d   : > { %v6718_v60 = vpop.f32.mrf.mxu1 }
 0x18e   : > { %5281 = vmatpush3.bf16.msra.mxu1 %v5593_v25  ;;  %v3243_v26 = vsel %vm1183_vm10, %v3238_v44, %v3242_v28 }
 0x18f   : > { %v6720_v38 = vpop.f32.mrf.mxu1  ;;  %5282 = vmatprep.subr.bf16.mxu1 %v5594_v42 }
 0x191   : > { %v6726_v11 = vpop.f32.mrf.mxu1 }
 0x192   : > { %5283 = vmatpush3.bf16.msra.mxu1 %v5594_v42 }
 0x193   : > { %v4814_v10 = vpop.f32.mrf.mxu0  ;;  %3662 = vmatmul.mubr.bf16.gmra.mxu0 %v6669_v13  ;;  %v6730_v37 = vpop.f32.mrf.mxu1  ;;  %v3231_v13 = vsel %vm1183_vm10, %v3226_v29, %v3230_v8  ;;  %v5597_v29 = vld [vmem:[#allocation8 + $0x8] sm:$0xff]  }
 0x194   : > { %3669 = vmatprep.mubr.bf16.mxu0 %v3219_v55  ;;  %v5595_v55 = vld [vmem:[#allocation8 + $0x18] sm:$0xff]  }
 0x195   : > { %v4815_v39 = vpop.f32.mrf.mxu0  ;;  %5284 = vmatprep.subr.bf16.mxu1 %v5595_v55 }
 0x196   : > { %v4816_v18 = vadd.f32 %v4815_v39, %v4814_v10  ;;  %5285 = vmatpush3.bf16.msra.mxu1 %v5595_v55  ;;  %v5596_v39 = vld [vmem:[#allocation8 + $0x10] sm:$0xff]  }
 0x197   : > { %v4817_v30 = vpop.f32.mrf.mxu0  ;;  %5286 = vmatprep.subr.bf16.mxu1 %v5596_v39 }
 0x198   : > { %v6733_v19 = vadd.f32 %v6649_v14, %v4816_v18 }
 0x199   : > { %v4818_v6 = vpop.f32.mrf.mxu0 }
 0x19a   : > { %v4819_v1 = vadd.f32 %v4818_v6, %v4817_v30  ;;  %5287 = vmatpush3.bf16.msra.mxu1 %v5596_v39 }
 0x19b   : > { %v6738_v0 = vpop.f32.mrf.mxu1  ;;  %v4820_v34 = vpop.f32.mrf.mxu0  ;;  %3670 = vmatmul.mubr.bf16.gmra.mxu0 %v6698_v21  ;;  %5288 = vmatprep.subr.bf16.mxu1 %v5597_v29 }
 0x19c   : > { %v6742_v14 = vadd.f32 %v6664_v17, %v4819_v1  ;;  %3677 = vmatprep.mubr.bf16.mxu0 %v3231_v13 }
 0x19d   : > { %v4821_v61 = vpop.f32.mrf.mxu0  ;;  %v6744_v62 = vpop.f32.mrf.mxu1 }
 0x19e   : > { %v4822_v46 = vadd.f32 %v4821_v61, %v4820_v34  ;;  %5289 = vmatpush3.bf16.msra.mxu1 %v5597_v29 }
 0x19f   : > { %v4823_v53 = vpop.f32.mrf.mxu0  ;;  %v6752_v54 = vpop.f32.mrf.mxu1  ;;  %5290 = vmatprep.subr.bf16.mxu1 %v5598_v24 }
 0x1a0   : > { %v6747_v32 = vadd.f32 %v4822_v46, %v6695_v40 }
 0x1a1   : > { %v4824_v21 = vpop.f32.mrf.mxu0  ;;  %v6754_v10 = vpop.f32.mrf.mxu1 }
 0x1a2   : > { %v6750_v17 = vadd.f32 %v4824_v21, %v4823_v53  ;;  %5291 = vmatpush3.bf16.msra.mxu1 %v5598_v24 }
 0x1a3   : > { %v4826_v12 = vpop.f32.mrf.mxu0  ;;  %3678 = vmatmul.mubr.bf16.gmra.mxu0 %v4598_v41 }
 0x1a4   : > { %3685 = vmatprep.mubr.bf16.mxu0 %v3243_v26 }
 0x1a5   : > { %v4827_v4 = vpop.f32.mrf.mxu0 }
 0x1a6   : > { %v4828_v49 = vadd.f32 %v4827_v4, %v4826_v12 }
 0x1a7   : > { %v4829_v40 = vpop.f32.mrf.mxu0 }
 0x1a8   : > { %v6757_v45 = vadd.f32 %v6688_v3, %v4828_v49 }
 0x1a9   : > { %v4830_v8 = vpop.f32.mrf.mxu0 }
 0x1aa   : > { %v4831_v56 = vadd.f32 %v4830_v8, %v4829_v40 }
 0x1ab   : > { %v4894_v18 = vpop.f32.mrf.mxu1  ;;  %v4832_v41 = vpop.f32.mrf.mxu0  ;;  %3686 = vmatmul.mubr.bf16.gmra.mxu0 %v6724_v59 }
 0x1ac   : > { %v6761_v30 = vadd.f32 %v6703_v20, %v4831_v56  ;;  %v2352_v20 = vadd.f32 %v6558_v16, %v6568_v31 }
 0x1ad   : > { %v4895_v6 = vpop.f32.mrf.mxu1  ;;  %v4833_v13 = vpop.f32.mrf.mxu0 }
 0x1ae   : > { %v4896_v23 = vadd.f32 %v4895_v6, %v4894_v18  ;;  %v4834_v3 = vadd.f32 %v4833_v13, %v4832_v41 }
 0x1af   : > { %v4897_v43 = vpop.f32.mrf.mxu1  ;;  %v4835_v35 = vpop.f32.mrf.mxu0 }
 0x1b0   : > { %v6764_v1 = vadd.f32 %v4834_v3, %v6720_v38  ;;  %v6767_v34 = vadd.f32 %v4896_v23, %v6551_v5 }
 0x1b1   : > { %v4898_v59 = vpop.f32.mrf.mxu1  ;;  %v4836_v25 = vpop.f32.mrf.mxu0 }
 0x1b2   : > { %v4899_v61 = vadd.f32 %v4898_v59, %v4897_v43  ;;  %v6771_v44 = vadd.f32 %v4836_v25, %v4835_v35  ;;  %v2368_v35 = vadd.f32 %v6611_v58, %v6614_v48 }
 0x1b3   : > { %v4900_v28 = vpop.f32.mrf.mxu1  ;;  %v4838_v46 = vpop.f32.mrf.mxu0 }
 0x1b4   : > { %v2641_v53 = vadd.f32 %v4899_v61, %v2352_v20 }
 0x1b5   : > { %v4901_v42 = vpop.f32.mrf.mxu1  ;;  %v4839_v21 = vpop.f32.mrf.mxu0 }
 0x1b6   : > { %v4902_v38 = vadd.f32 %v4901_v42, %v4900_v28  ;;  %v4840_v26 = vadd.f32 %v4839_v21, %v4838_v46 }
 0x1b7   : > { %v4903_v12 = vpop.f32.mrf.mxu1  ;;  %v4841_v5 = vpop.f32.mrf.mxu0 }
 0x1b8   : > { %v6774_v55 = vadd.f32 %v6718_v60, %v4840_v26  ;;  %v2646_v4 = vadd.f32 %v4902_v38, %v6581_v52 }
 0x1b9   : > { %v4904_v49 = vpop.f32.mrf.mxu1  ;;  %v4842_v16 = vpop.f32.mrf.mxu0 }
 0x1ba   : > { %v4905_v31 = vadd.f32 %v4904_v49, %v4903_v12  ;;  %v4843_v40 = vadd.f32 %v4842_v16, %v4841_v5 }
 0x1bb   : > { %v4906_v39 = vpop.f32.mrf.mxu1  ;;  %v4844_v29 = vpop.f32.mrf.mxu0 }
 0x1bc   : > { %v6778_v8 = vadd.f32 %v6726_v11, %v4843_v40  ;;  %v2649_v56 = vadd.f32 %v4905_v31, %v6594_v7 }
 0x1bd   : > { %v4907_v18 = vpop.f32.mrf.mxu1  ;;  %v4845_v41 = vpop.f32.mrf.mxu0 }
 0x1be   : > { %v4908_v24 = vadd.f32 %v4907_v18, %v4906_v39  ;;  %v4846_v6 = vadd.f32 %v4845_v41, %v4844_v29 }
 0x1bf   : > { %v4909_v13 = vpop.f32.mrf.mxu1  ;;  %v4847_v60 = vpop.f32.mrf.mxu0 }
 0x1c0   : > { %v6782_v23 = vadd.f32 %v4846_v6, %v6744_v62  ;;  %v2654_v52 = vadd.f32 %v4908_v24, %v6604_v9 }
 0x1c1   : > { %v4910_v3 = vpop.f32.mrf.mxu1  ;;  %v4848_v43 = vpop.f32.mrf.mxu0 }
 0x1c2   : > { %v4911_v11 = vadd.f32 %v4910_v3, %v4909_v13  ;;  %v6787_v59 = vadd.f32 %v4848_v43, %v4847_v60 }
 0x1c3   : > { %v4912_v7 = vpop.f32.mrf.mxu1  ;;  %v4850_v25 = vpop.f32.mrf.mxu0 }
 0x1c4   : > { %v2657_v20 = vadd.f32 %v4911_v11, %v2368_v35 }
 0x1c5   : > { %v4913_v61 = vpop.f32.mrf.mxu1  ;;  %v4851_v28 = vpop.f32.mrf.mxu0 }
 0x1c6   : > { %v4914_v46 = vadd.f32 %v4913_v61, %v4912_v7  ;;  %v4852_v42 = vadd.f32 %v4851_v28, %v4850_v25 }
 0x1c7   : > { %v4915_v21 = vpop.f32.mrf.mxu1  ;;  %v4853_v62 = vpop.f32.mrf.mxu0 }
 0x1c8   : > { %v6790_v38 = vadd.f32 %v6738_v0, %v4852_v42  ;;  %v2662_v9 = vadd.f32 %v4914_v46, %v6622_v33 }
 0x1c9   : > { %v4916_v26 = vpop.f32.mrf.mxu1  ;;  %v4854_v12 = vpop.f32.mrf.mxu0 }
 0x1ca   : > { %v4917_v58 = vadd.f32 %v4916_v26, %v4915_v21  ;;  %v4855_v48 = vadd.f32 %v4854_v12, %v4853_v62 }
 0x1cb   : > { %v4918_v5 = vpop.f32.mrf.mxu1  ;;  %v5206_v49 = vpop.f32.mrf.mxu0 }
 0x1cc   : > { %v6794_v16 = vadd.f32 %v6752_v54, %v4855_v48  ;;  %v6796_v31 = vadd.f32 %v5206_v49, %v2646_v4  ;;  %v2665_v40 = vadd.f32 %v4917_v58, %v6630_v36  ;;  %v2384_v54 = vadd.f32 %v6646_v27, %v6644_v57 }
 0x1cd   : > { %v4919_v39 = vpop.f32.mrf.mxu1  ;;  %v2782_v29 = vpop.f32.mrf.mxu0 }
 0x1ce   : > { %v4920_v18 = vadd.f32 %v4919_v39, %v4918_v5  ;;  %v6800_v0 = vadd.f32 %v2782_v29, %v6767_v34  ;;  %v2400_v29 = vadd.f32 %v6715_v51, %v6677_v22 }
 0x1cf   : > { %v4921_v33 = vpop.f32.mrf.mxu1  ;;  %v5207_v41 = vpop.f32.mrf.mxu0 }
 0x1d0   : > { %v6802_v24 = vadd.f32 %v5207_v41, %v2649_v56  ;;  %v2670_v6 = vadd.f32 %v4920_v18, %v6641_v47 }
 0x1d1   : > { %v4922_v13 = vpop.f32.mrf.mxu1  ;;  %v2785_v60 = vpop.f32.mrf.mxu0 }
 0x1d2   : > { %v4923_v4 = vadd.f32 %v4922_v13, %v4921_v33  ;;  %v6807_v3 = vadd.f32 %v2785_v60, %v2641_v53 }
 0x1d3   : > { %v4924_v36 = vpop.f32.mrf.mxu1  ;;  %v5210_v43 = vpop.f32.mrf.mxu0 }
 0x1d4   : > { %v6809_v35 = vadd.f32 %v5210_v43, %v2662_v9  ;;  %v2673_v34 = vadd.f32 %v4923_v4, %v2384_v54 }
 0x1d5   : > { %v4925_v11 = vpop.f32.mrf.mxu1  ;;  %v2798_v7 = vpop.f32.mrf.mxu0 }
 0x1d6   : > { %v4926_v25 = vadd.f32 %v4925_v11, %v4924_v36  ;;  %v6811_v56 = vadd.f32 %v2798_v7, %v2654_v52 }
 0x1d7   : > { %v4927_v61 = vpop.f32.mrf.mxu1  ;;  %v5211_v47 = vpop.f32.mrf.mxu0 }
 0x1d8   : > { %v6813_v28 = vadd.f32 %v5211_v47, %v2665_v40  ;;  %v2678_v46 = vadd.f32 %v4926_v25, %v6674_v2 }
 0x1d9   : > { %v4928_v57 = vpop.f32.mrf.mxu1  ;;  %v2801_v27 = vpop.f32.mrf.mxu0 }
 0x1da   : > { %v4929_v53 = vadd.f32 %v4928_v57, %v4927_v61  ;;  %v6816_v42 = vadd.f32 %v2801_v27, %v2657_v20 }
 0x1db   : > { %v4930_v21 = vpop.f32.mrf.mxu1  ;;  %v5214_v62 = vpop.f32.mrf.mxu0 }
 0x1dc   : > { %v6818_v9 = vadd.f32 %v5214_v62, %v2678_v46  ;;  %v2681_v26 = vadd.f32 %v4929_v53, %v6685_v63 }
 0x1dd   : > { %v4931_v12 = vpop.f32.mrf.mxu1  ;;  %v2814_v52 = vpop.f32.mrf.mxu0 }
 0x1de   : > { %v4932_v58 = vadd.f32 %v4931_v12, %v4930_v21  ;;  %v6821_v48 = vadd.f32 %v2814_v52, %v2670_v6  ;;  %v2416_v52 = vadd.f32 %v6750_v17, %v6711_v15 }
 0x1df   : > { %v4933_v5 = vpop.f32.mrf.mxu1  ;;  %v5215_v49 = vpop.f32.mrf.mxu0 }
 0x1e0   : > { %v6823_v40 = vadd.f32 %v5215_v49, %v2681_v26  ;;  %v2686_v2 = vadd.f32 %v4932_v58, %v6707_v50 }
 0x1e1   : > { %v4934_v39 = vpop.f32.mrf.mxu1  ;;  %v2817_v20 = vpop.f32.mrf.mxu0 }
 0x1e2   : > { %v4935_v18 = vadd.f32 %v4934_v39, %v4933_v5  ;;  %v6828_v33 = vadd.f32 %v2817_v20, %v2673_v34 }
 0x1e3   : > { %v4936_v63 = vpop.f32.mrf.mxu1  ;;  %v5218_v41 = vpop.f32.mrf.mxu0 }
 0x1e4   : > { %v2689_v13 = vadd.f32 %v4935_v18, %v2400_v29 }
 0x1e5   : > { %v4937_v60 = vpop.f32.mrf.mxu1  ;;  %v2830_v6 = vpop.f32.mrf.mxu0 }
 0x1e6   : > { %v4938_v54 = vadd.f32 %v4937_v60, %v4936_v63  ;;  %v6830_v4 = vadd.f32 %v2830_v6, %v2686_v2 }
 0x1e7   : > { %v4939_v36 = vpop.f32.mrf.mxu1  ;;  %v5219_v43 = vpop.f32.mrf.mxu0 }
 0x1e8   : > { %v2694_v50 = vadd.f32 %v4938_v54, %v6733_v19 }
 0x1e9   : > { %v4940_v11 = vpop.f32.mrf.mxu1  ;;  %v2833_v7 = vpop.f32.mrf.mxu0 }
 0x1ea   : > { %v4941_v25 = vadd.f32 %v4940_v11, %v4939_v36  ;;  %v6833_v61 = vadd.f32 %v5218_v41, %v2694_v50  ;;  %v6835_v22 = vadd.f32 %v2833_v7, %v2689_v13 }
 0x1eb   : > { %v4942_v51 = vpop.f32.mrf.mxu1  ;;  %v5222_v34 = vpop.f32.mrf.mxu0 }
 0x1ec   : > { %v2697_v47 = vadd.f32 %v4941_v25, %v6742_v14 }
 0x1ed   : > { %v4943_v46 = vpop.f32.mrf.mxu1  ;;  %v2846_v57 = vpop.f32.mrf.mxu0 }
 0x1ee   : > { %v4944_v27 = vadd.f32 %v4943_v46, %v4942_v51  ;;  %v6838_v53 = vadd.f32 %v5219_v43, %v2697_v47 }
 0x1ef   : > { %v4945_v21 = vpop.f32.mrf.mxu1  ;;  %v5223_v62 = vpop.f32.mrf.mxu0 }
 0x1f0   : > { %v2702_v19 = vadd.f32 %v4944_v27, %v6747_v32 }
 0x1f1   : > { %v4946_v26 = vpop.f32.mrf.mxu1  ;;  %v2849_v12 = vpop.f32.mrf.mxu0 }
 0x1f2   : > { %v4947_v58 = vadd.f32 %v4946_v26, %v4945_v21  ;;  %v6843_v5 = vadd.f32 %v2846_v57, %v2702_v19  ;;  %v2432_v57 = vadd.f32 %v6771_v44, %v6730_v37 }
 0x1f3   : > { %v4948_v49 = vpop.f32.mrf.mxu1  ;;  %v5226_v2 = vpop.f32.mrf.mxu0 }
 0x1f4   : > { %v2705_v14 = vadd.f32 %v4947_v58, %v2416_v52 }
 0x1f5   : > { %v4949_v39 = vpop.f32.mrf.mxu1  ;;  %v2862_v20 = vpop.f32.mrf.mxu0 }
 0x1f6   : > { %v4950_v29 = vadd.f32 %v4949_v39, %v4948_v49  ;;  %v6845_v18 = vadd.f32 %v2849_v12, %v2705_v14 }
 0x1f7   : > { %v4951_v63 = vpop.f32.mrf.mxu1  ;;  %v5227_v41 = vpop.f32.mrf.mxu0 }
 0x1f8   : > { %v2710_v32 = vadd.f32 %v4950_v29, %v6757_v45 }
 0x1f9   : > { %v4952_v13 = vpop.f32.mrf.mxu1  ;;  %v2865_v60 = vpop.f32.mrf.mxu0 }
 0x1fa   : > { %v4953_v6 = vadd.f32 %v4952_v13, %v4951_v63  ;;  %v6848_v54 = vadd.f32 %v5222_v34, %v2710_v32 }
 0x1fb   : > { %v4954_v15 = vpop.f32.mrf.mxu1  ;;  %v5230_v17 = vpop.f32.mrf.mxu0 }
 0x1fc   : > { %v2713_v36 = vadd.f32 %v4953_v6, %v6761_v30 }
 0x1fd   : > { %v4955_v43 = vpop.f32.mrf.mxu1  ;;  %v2878_v50 = vpop.f32.mrf.mxu0 }
 0x1fe   : > { %v4956_v11 = vadd.f32 %v4955_v43, %v4954_v15  ;;  %v6851_v7 = vadd.f32 %v5223_v62, %v2713_v36 }
 0x1ff   : > { %v4957_v25 = vpop.f32.mrf.mxu1  ;;  %v5231_v51 = vpop.f32.mrf.mxu0 }
 0x200   : > { %v2718_v47 = vadd.f32 %v4956_v11, %v6764_v1 }
 0x201   : > { %v4958_v46 = vpop.f32.mrf.mxu1  ;;  %v2881_v45 = vpop.f32.mrf.mxu0 }
 0x202   : > { %v4959_v34 = vadd.f32 %v4958_v46, %v4957_v25  ;;  %v6856_v27 = vadd.f32 %v2862_v20, %v2718_v47  ;;  %v2448_v25 = vadd.f32 %v6787_v59, %v6754_v10 }
 0x203   : > { %v4960_v21 = vpop.f32.mrf.mxu1  ;;  %v5016_v19 = vpop.f32.mrf.mxu0 }
 0x204   : > { %v2721_v30 = vadd.f32 %v4959_v34, %v2432_v57 }
 0x205   : > { %v4961_v26 = vpop.f32.mrf.mxu1  ;;  %v5017_v12 = vpop.f32.mrf.mxu0 }
 0x206   : > { %v4962_v52 = vadd.f32 %v4961_v26, %v4960_v21  ;;  %v6858_v62 = vadd.f32 %v2865_v60, %v2721_v30  ;;  %v5018_v59 = vadd.f32 %v5017_v12, %v5016_v19 }
 0x207   : > { %v4963_v58 = vpop.f32.mrf.mxu1  ;;  %v5019_v49 = vpop.f32.mrf.mxu0 }
 0x208   : > { %v2726_v1 = vadd.f32 %v4962_v52, %v6774_v55 }
 0x209   : > { %v4964_v14 = vpop.f32.mrf.mxu1  ;;  %v5020_v39 = vpop.f32.mrf.mxu0 }
 0x20a   : > { %v4965_v29 = vadd.f32 %v4964_v14, %v4963_v58  ;;  %v6861_v63 = vadd.f32 %v5226_v2, %v2726_v1 }
 0x20b   : > { %v4966_v37 = vpop.f32.mrf.mxu1  ;;  %v5022_v44 = vpop.f32.mrf.mxu0 }
 0x20c   : > { %v2729_v20 = vadd.f32 %v4965_v29, %v6778_v8 }
 0x20d   : > { %v4967_v32 = vpop.f32.mrf.mxu1  ;;  %v5023_v13 = vpop.f32.mrf.mxu0 }
 0x20e   : > { %v4968_v6 = vadd.f32 %v4967_v32, %v4966_v37  ;;  %v6864_v15 = vadd.f32 %v5227_v41, %v2729_v20  ;;  %v5024_v58 = vadd.f32 %v5023_v13, %v5022_v44 }
 0x20f   : > { %v4969_v60 = vpop.f32.mrf.mxu1  ;;  %v5025_v36 = vpop.f32.mrf.mxu0 }
 0x210   : > { %v2734_v43 = vadd.f32 %v4968_v6, %v6782_v23 }
 0x211   : > { %v4970_v11 = vpop.f32.mrf.mxu1  ;;  %v5026_v55 = vpop.f32.mrf.mxu0 }
 0x212   : > { %v4971_v2 = vadd.f32 %v4970_v11, %v4969_v60  ;;  %v6869_v47 = vadd.f32 %v2878_v50, %v2734_v43  ;;  %v5027_v6 = vadd.f32 %v5026_v55, %v5025_v36 }
 0x213   : > { %v4972_v46 = vpop.f32.mrf.mxu1  ;;  %v5028_v57 = vpop.f32.mrf.mxu0 }
 0x214   : > { %v2737_v8 = vadd.f32 %v4971_v2, %v2448_v25  ;;  %v5021_v25 = vadd.f32 %v5020_v39, %v5019_v49 }
 0x215   : > { %v4973_v34 = vpop.f32.mrf.mxu1  ;;  %v5029_v21 = vpop.f32.mrf.mxu0 }
 0x216   : > { %v4974_v30 = vadd.f32 %v4973_v34, %v4972_v46  ;;  %v6871_v41 = vadd.f32 %v2881_v45, %v2737_v8  ;;  %v5030_v39 = vadd.f32 %v5029_v21, %v5028_v57 }
 0x217   : > { %v4975_v26 = vpop.f32.mrf.mxu1  ;;  %v5031_v52 = vpop.f32.mrf.mxu0 }
 0x218   : > { %v2742_v23 = vadd.f32 %v4974_v30, %v6790_v38 }
 0x219   : > { %v4976_v1 = vpop.f32.mrf.mxu1  ;;  %v5032_v14 = vpop.f32.mrf.mxu0 }
 0x21a   : > { %v6874_v29 = vadd.f32 %v5230_v17, %v2742_v23  ;;  %v4977_v10 = vadd.f32 %v4976_v1, %v4975_v26  ;;  %v5033_v23 = vadd.f32 %v5032_v14, %v5031_v52 }
 0x21b   : > { %v5250_v50 = vpop.f32.mrf.mxu1  ;;  %v5034_v37 = vpop.f32.mrf.mxu0 }
 0x21c   : > { %v2745_v20 = vadd.f32 %v4977_v10, %v6794_v16  ;;  %v3737_v32 = vadd.f32 %v5250_v50, %v5024_v58  ;;  %v6884_v16 = vld [vmem:[%s7160_s2] ss:$0 sm:$0xff] }
 0x21d   : > { %v3728_v60 = vpop.f32.mrf.mxu1  ;;  %v5035_v45 = vpop.f32.mrf.mxu0 }
 0x21e   : > { %v6877_v43 = vadd.f32 %v5231_v51, %v2745_v20  ;;  %v3729_v11 = vadd.f32 %v5018_v59, %v3728_v60  ;;  %v3841_v38 = vadd.f32 %v3737_v32, %v6796_v31  ;;  %v5036_v19 = vadd.f32 %v5035_v45, %v5034_v37 }
 0x21f   : > { %v5251_v44 = vpop.f32.mrf.mxu1  ;;  %v5037_v13 = vpop.f32.mrf.mxu0 }
 0x220   : > { %v3839_v17 = vadd.f32 %v3729_v11, %v6800_v0  ;;  %v3740_v2 = vadd.f32 %v5251_v44, %v5027_v6  ;;  %v3875_v51 = vadd.f32 %v6884_v16, %v3841_v38 }
 0x221   : > { %v3731_v12 = vpop.f32.mrf.mxu1  ;;  %v5038_v36 = vpop.f32.mrf.mxu0 }
 0x222   : > { %v3732_v55 = vadd.f32 %v5021_v25, %v3731_v12  ;;  %v3842_v49 = vadd.f32 %v3740_v2, %v6802_v24  ;;  %v3873_v8 = vadd.f32 %v6884_v16, %v3839_v17  ;;  %v5039_v58 = vadd.f32 %v5038_v36, %v5037_v13 }
 0x223   : > { %v5254_v31 = vpop.f32.mrf.mxu1  ;;  %v5040_v46 = vpop.f32.mrf.mxu0  ;;  %v3903_v59 = vmax.f32 %v3875_v51, 0.0 }
 0x224   : > { %v3840_v0 = vadd.f32 %v3732_v55, %v6807_v3  ;;  %v3876_v34 = vadd.f32 %v6884_v16, %v3842_v49  ;;  %v3753_v30 = vadd.f32 %v5254_v31, %v5036_v19  ;;  %v3901_v20 = vmax.f32 %v3873_v8, 0.0 }
 0x225   : > { %v3744_v26 = vpop.f32.mrf.mxu1  ;;  %v5041_v1 = vpop.f32.mrf.mxu0 }
 0x226   : > { %v3874_v10 = vadd.f32 %v6884_v16, %v3840_v0  ;;  %v3904_v50 = vmax.f32 %v3876_v34, 0.0  ;;  %v3745_v37 = vadd.f32 %v5030_v39, %v3744_v26  ;;  %v3845_v57 = vadd.f32 %v3753_v30, %v6809_v35 }
 0x227   : > { %v5255_v24 = vpop.f32.mrf.mxu1  ;;  %v5043_v21 = vpop.f32.mrf.mxu0  ;;  %v5042_v25 = vadd.f32 %v5041_v1, %v5040_v46 }
 0x228   : > { %v3902_v32 = vmax.f32 %v3874_v10, 0.0  ;;  %v3930_v6 = vpack.c.bf16 %v3904_v50, %v3903_v59  ;;  %v3843_v3 = vadd.f32 %v3745_v37, %v6811_v56  ;;  %v3756_v45 = vadd.f32 %v5255_v24, %v5039_v58 }
 0x229   : > { %v3747_v60 = vpop.f32.mrf.mxu1  ;;  %v5044_v11 = vpop.f32.mrf.mxu0  ;;  %v3879_v38 = vadd.f32 %v6884_v16, %v3845_v57 }
 0x22a   : > { %v3929_v52 = vpack.c.bf16 %v3902_v32, %v3901_v20  ;;  %v3748_v14 = vadd.f32 %v5033_v23, %v3747_v60  ;;  %v3846_v44 = vadd.f32 %v3756_v45, %v6813_v28  ;;  %v3877_v35 = vadd.f32 %v6884_v16, %v3843_v3 }
 0x22b   : > { %v5258_v13 = vpop.f32.mrf.mxu1  ;;  %v5046_v17 = vpop.f32.mrf.mxu0  ;;  %v5045_v51 = vadd.f32 %v5044_v11, %v5043_v21  ;;  %v3907_v39 = vmax.f32 %v3879_v38, 0.0 }
 0x22c   : > { %5292 = vmatprep.mubr.bf16.mxu1 %v3929_v52  ;;  %v3844_v2 = vadd.f32 %v3748_v14, %v6816_v42  ;;  %v3880_v56 = vadd.f32 %v6884_v16, %v3846_v44  ;;  %v3905_v8 = vmax.f32 %v3877_v35, 0.0 }
 0x22d   : > { %5293 = vmatmul.mubr.bf16.vlgmr.msra.gmra.mxu1 %v3930_v6  ;;  %v3760_v19 = vpop.f32.mrf.mxu1  ;;  %v5047_v12 = vpop.f32.mrf.mxu0 }
 0x22e   : > { %v3878_v36 = vadd.f32 %v6884_v16, %v3844_v2  ;;  %v3761_v55 = vadd.f32 %v5042_v25, %v3760_v19  ;;  %v5048_v49 = vadd.f32 %v5047_v12, %v5046_v17  ;;  %v3908_v31 = vmax.f32 %v3880_v56, 0.0 }
 0x22f   : > { %v5259_v28 = vpop.f32.mrf.mxu1  ;;  %v5049_v46 = vpop.f32.mrf.mxu0 }
 0x230   : > { %v3906_v0 = vmax.f32 %v3878_v36, 0.0  ;;  %v3847_v34 = vadd.f32 %v3761_v55, %v6821_v48  ;;  %v3769_v30 = vadd.f32 %v5258_v13, %v5048_v49  ;;  %v3932_v26 = vpack.c.bf16 %v3908_v31, %v3907_v39 }
 0x231   : > { %v3763_v42 = vpop.f32.mrf.mxu1  ;;  %v5050_v23 = vpop.f32.mrf.mxu0 }
 0x232   : > { %v3931_v58 = vpack.c.bf16 %v3906_v0, %v3905_v8  ;;  %v3764_v1 = vadd.f32 %v5045_v51, %v3763_v42  ;;  %v3849_v10 = vadd.f32 %v3769_v30, %v6818_v9  ;;  %v5051_v59 = vadd.f32 %v5050_v23, %v5049_v46 }
 0x233   : > { %v5052_v50 = vpop.f32.mrf.mxu0  ;;  %v5262_v37 = vpop.f32.mrf.mxu1  ;;  %v3881_v24 = vadd.f32 %v6884_v16, %v3847_v34 }
 0x234   : > { %5296 = vmatprep.mubr.bf16.mxu1 %v3931_v58  ;;  %v3848_v57 = vadd.f32 %v3764_v1, %v6828_v33  ;;  %v3772_v21 = vadd.f32 %v5259_v28, %v5051_v59  ;;  %v3883_v3 = vadd.f32 %v6884_v16, %v3849_v10 }
 0x235   : > { %5297 = vmatmul.mubr.bf16.gmra.mxu1 %v3932_v26  ;;  %v5053_v20 = vpop.f32.mrf.mxu0  ;;  %v3776_v48 = vpop.f32.mrf.mxu1  ;;  %v3909_v11 = vmax.f32 %v3881_v24, 0.0 }
 0x236   : > { %v3882_v32 = vadd.f32 %v6884_v16, %v3848_v57  ;;  %v5054_v6 = vadd.f32 %v5053_v20, %v5052_v50  ;;  %v3850_v60 = vadd.f32 %v3772_v21, %v6823_v40  ;;  %v3911_v35 = vmax.f32 %v3883_v3, 0.0 }
 0x237   : > { %v5055_v9 = vpop.f32.mrf.mxu0  ;;  %v5263_v45 = vpop.f32.mrf.mxu1 }
 0x238   : > { %v3910_v52 = vmax.f32 %v3882_v32, 0.0  ;;  %v3777_v14 = vadd.f32 %v5054_v6, %v3776_v48  ;;  %v3884_v25 = vadd.f32 %v6884_v16, %v3850_v60 }
 0x239   : > { %v5056_v38 = vpop.f32.mrf.mxu0  ;;  %v3779_v33 = vpop.f32.mrf.mxu1 }
 0x23a   : > { %v3933_v44 = vpack.c.bf16 %v3910_v52, %v3909_v11  ;;  %v3851_v13 = vadd.f32 %v3777_v14, %v6830_v4  ;;  %v5057_v17 = vadd.f32 %v5056_v38, %v5055_v9  ;;  %v3912_v2 = vmax.f32 %v3884_v25, 0.0 }
 0x23b   : > { %v5058_v56 = vpop.f32.mrf.mxu0  ;;  %v5266_v36 = vpop.f32.mrf.mxu1 }
 0x23c   : > { %5300 = vmatprep.mubr.bf16.mxu1 %v3933_v44  ;;  %v3780_v19 = vadd.f32 %v5057_v17, %v3779_v33  ;;  %v3934_v40 = vpack.c.bf16 %v3912_v2, %v3911_v35  ;;  %v3885_v55 = vadd.f32 %v6884_v16, %v3851_v13 }
 0x23d   : > { %v5059_v12 = vpop.f32.mrf.mxu0  ;;  %v3792_v46 = vpop.f32.mrf.mxu1 }
 0x23e   : > { %v3852_v51 = vadd.f32 %v3780_v19, %v6835_v22  ;;  %v5060_v49 = vadd.f32 %v5059_v12, %v5058_v56  ;;  %5301 = vmatmul.mubr.bf16.gmra.mxu1 %v3934_v40  ;;  %v3913_v8 = vmax.f32 %v3885_v55, 0.0 }
 0x23f   : > { %v5061_v39 = vpop.f32.mrf.mxu0  ;;  %v5267_v1 = vpop.f32.mrf.mxu1 }
 0x240   : > { %v3886_v31 = vadd.f32 %v6884_v16, %v3852_v51  ;;  %v3785_v28 = vadd.f32 %v5262_v37, %v5060_v49 }
 0x241   : > { %v5062_v4 = vpop.f32.mrf.mxu0  ;;  %v3795_v21 = vpop.f32.mrf.mxu1 }
 0x242   : > { %v3914_v0 = vmax.f32 %v3886_v31, 0.0  ;;  %v3853_v34 = vadd.f32 %v3785_v28, %v6833_v61  ;;  %v5063_v30 = vadd.f32 %v5062_v4, %v5061_v39 }
 0x243   : > { %v5064_v42 = vpop.f32.mrf.mxu0 }
 0x244   : > { %v3788_v26 = vadd.f32 %v5263_v45, %v5063_v30  ;;  %v3935_v23 = vpack.c.bf16 %v3914_v0, %v3913_v8  ;;  %v3887_v22 = vadd.f32 %v6884_v16, %v3853_v34  ;;  %v5270_v45 = vpop.f32.mrf.mxu1 }
 0x245   : > { %v5065_v58 = vpop.f32.mrf.mxu0 }
 0x246   : > { %v3854_v10 = vadd.f32 %v3788_v26, %v6838_v53  ;;  %v5066_v59 = vadd.f32 %v5065_v58, %v5064_v42  ;;  %5304 = vmatprep.mubr.bf16.mxu1 %v3935_v23  ;;  %v3915_v20 = vmax.f32 %v3887_v22, 0.0  ;;  %v3808_v44 = vpop.f32.mrf.mxu1 }
 0x247   : > { %v5067_v50 = vpop.f32.mrf.mxu0 }
 0x248   : > { %v3888_v37 = vadd.f32 %v6884_v16, %v3854_v10  ;;  %v3793_v24 = vadd.f32 %v5066_v59, %v3792_v46  ;;  %v5271_v40 = vpop.f32.mrf.mxu1 }
 0x249   : > { %v5068_v57 = vpop.f32.mrf.mxu0 }
 0x24a   : > { %v3916_v61 = vmax.f32 %v3888_v37, 0.0  ;;  %v3855_v48 = vadd.f32 %v3793_v24, %v6843_v5  ;;  %v5069_v32 = vadd.f32 %v5068_v57, %v5067_v50  ;;  %v3811_v28 = vpop.f32.mrf.mxu1 }
 0x24b   : > { %v5070_v6 = vpop.f32.mrf.mxu0 }
 0x24c   : > { %v3796_v3 = vadd.f32 %v5069_v32, %v3795_v21  ;;  %v3936_v60 = vpack.c.bf16 %v3916_v61, %v3915_v20  ;;  %v3889_v53 = vadd.f32 %v6884_v16, %v3855_v48  ;;  %v5274_v26 = vpop.f32.mrf.mxu1 }
 0x24d   : > { %v5071_v9 = vpop.f32.mrf.mxu0 }
 0x24e   : > { %v3856_v11 = vadd.f32 %v3796_v3, %v6845_v18  ;;  %v5072_v52 = vadd.f32 %v5071_v9, %v5070_v6  ;;  %5305 = vmatmul.mubr.bf16.gmra.mxu1 %v3936_v60  ;;  %v3917_v13 = vmax.f32 %v3889_v53, 0.0  ;;  %v3824_v50 = vpop.f32.mrf.mxu1 }
 0x24f   : > { %v5073_v14 = vpop.f32.mrf.mxu0 }
 0x250   : > { %v3890_v25 = vadd.f32 %v6884_v16, %v3856_v11  ;;  %v3801_v38 = vadd.f32 %v5266_v36, %v5072_v52  ;;  %v5275_v32 = vpop.f32.mrf.mxu1 }
 0x251   : > { %v5074_v33 = vpop.f32.mrf.mxu0 }
 0x252   : > { %v3918_v5 = vmax.f32 %v3890_v25, 0.0  ;;  %v3857_v17 = vadd.f32 %v3801_v38, %v6848_v54  ;;  %v5075_v35 = vadd.f32 %v5074_v33, %v5073_v14  ;;  %v3827_v11 = vpop.f32.mrf.mxu1 }
 0x253   : > { %v5076_v2 = vpop.f32.mrf.mxu0 }
 0x254   : > { %v3804_v56 = vadd.f32 %v5267_v1, %v5075_v35  ;;  %v3937_v19 = vpack.c.bf16 %v3918_v5, %v3917_v13  ;;  %v3891_v18 = vadd.f32 %v6884_v16, %v3857_v17 }
 0x255   : > { %v5077_v12 = vpop.f32.mrf.mxu0 }
 0x256   : > { %v3858_v55 = vadd.f32 %v3804_v56, %v6851_v7  ;;  %v5078_v51 = vadd.f32 %v5077_v12, %v5076_v2  ;;  %5308 = vmatprep.mubr.bf16.mxu1 %v3937_v19  ;;  %v3919_v4 = vmax.f32 %v3891_v18, 0.0 }
 0x257   : > { %v5079_v49 = vpop.f32.mrf.mxu0 }
 0x258   : > { %v3892_v36 = vadd.f32 %v6884_v16, %v3858_v55  ;;  %v3809_v39 = vadd.f32 %v5078_v51, %v3808_v44 }
 0x259   : > { %v5080_v31 = vpop.f32.mrf.mxu0 }
 0x25a   : > { %v3920_v54 = vmax.f32 %v3892_v36, 0.0  ;;  %v3859_v46 = vadd.f32 %v3809_v39, %v6856_v27  ;;  %v5081_v8 = vadd.f32 %v5080_v31, %v5079_v49 }
 0x25b   : > { %v5082_v0 = vpop.f32.mrf.mxu0 }
 0x25c   : > { %v3812_v34 = vadd.f32 %v5081_v8, %v3811_v28  ;;  %v3938_v30 = vpack.c.bf16 %v3920_v54, %v3919_v4  ;;  %v3893_v7 = vadd.f32 %v6884_v16, %v3859_v46  ;;  %v981_v4 = vld [vmem:[%s5922_s30] sm:$0xff]  ;;  %v982_v54 = vld [vmem:[%s5922_s30 + $0x8] sm:$0xff]  ;;  %v4450_v46 = vld [vmem:[%s5922_s30 + $0xf0] sm:$0xff] }
 0x25d   : > { %v5083_v42 = vpop.f32.mrf.mxu0 }
 0x25e   : > { %v3860_v23 = vadd.f32 %v3812_v34, %v6858_v62  ;;  %v5084_v58 = vadd.f32 %v5083_v42, %v5082_v0  ;;  %5309 = vmatmul.mubr.bf16.gmra.mxu1 %v3938_v30  ;;  %v3921_v37 = vmax.f32 %v3893_v7, 0.0  ;;  %v972_v30 = vlaneseq  ;;  %v4661_v7 = vld [vmem:[%s5922_s30 + $0x10] sm:$0xff] }
 0x25f   : > { %v5085_v1 = vpop.f32.mrf.mxu0 }
 0x260   : > { %v3894_v22 = vadd.f32 %v6884_v16, %v3860_v23  ;;  %v3817_v10 = vadd.f32 %v5270_v45, %v5084_v58  ;;  %v6961_v42 = vshrl.u32 %v972_v30, 7  ;;  %v4675_v30 = vld [vmem:[%s5922_s30 + $0x80] sm:$0xff] }
 0x261   : > { %v5086_v59 = vpop.f32.mrf.mxu0 }
 0x262   : > { %v3922_v27 = vmax.f32 %v3894_v22, 0.0  ;;  %v3861_v24 = vadd.f32 %v3817_v10, %v6861_v63  ;;  %v5087_v57 = vadd.f32 %v5086_v59, %v5085_v1  ;;  %vm975_vm11 = vcmp.ge.s32.totalorder %v6961_v42, 1  ;;  %v4664_v1 = vld [vmem:[%s5922_s30 + $0x28] sm:$0xff] }
 0x263   : > { %v5088_v21 = vpop.f32.mrf.mxu0  ;;  %v6968_v58 = vadd.s32 8, %v6961_v42 }
 0x264   : > { %v3820_v20 = vadd.f32 %v5271_v40, %v5087_v57  ;;  %v3939_v61 = vpack.c.bf16 %v3922_v27, %v3921_v37  ;;  %v3895_v62 = vadd.f32 %v6884_v16, %v3861_v24 }
 0x265   : > { %v5089_v48 = vpop.f32.mrf.mxu0  ;;  %vm978_vm12 = vcmp.le.s32.totalorder %v6968_v58, 14 }
 0x266   : > { %v3862_v6 = vadd.f32 %v3820_v20, %v6864_v15  ;;  %v5090_v3 = vadd.f32 %v5089_v48, %v5088_v21  ;;  %5312 = vmatprep.mubr.bf16.mxu1 %v3939_v61  ;;  %v3923_v52 = vmax.f32 %v3895_v62, 0.0  ;;  %v4667_v21 = vld [vmem:[%s5922_s30 + $0x40] sm:$0xff]  ;;  %v4665_v62 = vld [vmem:[%s5922_s30 + $0x30] sm:$0xff] }
 0x267   : > { %v5091_v60 = vpop.f32.mrf.mxu0 }
 0x268   : > { %v3896_v9 = vadd.f32 %v6884_v16, %v3862_v6  ;;  %v3825_v45 = vadd.f32 %v5090_v3, %v3824_v50  ;;  %v4662_v50 = vld [vmem:[%s5922_s30 + $0x18] sm:$0xff] }
 0x269   : > { %v5092_v53 = vpop.f32.mrf.mxu0 }
 0x26a   : > { %v3924_v63 = vmax.f32 %v3896_v9, 0.0  ;;  %v3863_v14 = vadd.f32 %v3825_v45, %v6869_v47  ;;  %v5093_v25 = vadd.f32 %v5092_v53, %v5091_v60  ;;  %v4668_v45 = vld [vmem:[%s5922_s30 + $0x48] sm:$0xff] }
 0x26b   : > { %v5094_v38 = vpop.f32.mrf.mxu0 }
 0x26c   : > { %v3828_v33 = vadd.f32 %v5093_v25, %v3827_v11  ;;  %v3940_v44 = vpack.c.bf16 %v3924_v63, %v3923_v52  ;;  %v3897_v5 = vadd.f32 %v6884_v16, %v3863_v14  ;;  %v4666_v14 = vld [vmem:[%s5922_s30 + $0x38] sm:$0xff] }
 0x26d   : > { %v5095_v13 = vpop.f32.mrf.mxu0 }
 0x26e   : > { %v3864_v15 = vadd.f32 %v3828_v33, %v6871_v41  ;;  %v5096_v17 = vadd.f32 %v5095_v13, %v5094_v38  ;;  %5313 = vmatmul.mubr.bf16.gmra.mxu1 %v3940_v44  ;;  %v3925_v12 = vmax.f32 %v3897_v5, 0.0 }
 0x26f   : > { %v5097_v35 = vpop.f32.mrf.mxu0 }
 0x270   : > { %v3898_v2 = vadd.f32 %v6884_v16, %v3864_v15  ;;  %v3833_v56 = vadd.f32 %v5274_v26, %v5096_v17  ;;  %v4663_v26 = vld [vmem:[%s5922_s30 + $0x20] sm:$0xff] }
 0x271   : > { %v5098_v19 = vpop.f32.mrf.mxu0 }
 0x272   : > { %v3926_v47 = vmax.f32 %v3898_v2, 0.0  ;;  %v3865_v40 = vadd.f32 %v3833_v56, %v6874_v29  ;;  %v5099_v18 = vadd.f32 %v5098_v19, %v5097_v35  ;;  %v6943_v29 = vld [vmem:[%s7162_s4] ss:$0 sm:$0xff] }
 0x273   : > { %v990_v8 = vadd.f32 %v6943_v29, %v982_v54  ;;  %v996_v0 = vadd.f32 %v4450_v46, %v6943_v29  ;;  %v4183_v23 = vadd.f32 %v4663_v26, %v6943_v29  ;;  %v4181_v10 = vadd.f32 %v4661_v7, %v6943_v29  ;;  %v4671_v35 = vld [vmem:[%s5922_s30 + $0x60] sm:$0xff]  ;;  %v4673_v26 = vld [vmem:[%s5922_s30 + $0x70] sm:$0xff] }
 0x274   : > { %v3836_v55 = vadd.f32 %v5275_v32, %v5099_v18  ;;  %v3941_v51 = vpack.c.bf16 %v3926_v47, %v3925_v12  ;;  %v3899_v41 = vadd.f32 %v6884_v16, %v3865_v40  ;;  %v4184_v24 = vadd.f32 %v4664_v1, %v6943_v29  ;;  %v4669_v12 = vld [vmem:[%s5922_s30 + $0x50] sm:$0xff]  ;;  %v4672_v18 = vld [vmem:[%s5922_s30 + $0x68] sm:$0xff] }
 0x275   : > { %992 = vst [vmem:[%s6955_s11 + $0x8] sm:$0xff] %v990_v8  ;;  %4452 = vst [vmem:[%s6955_s11 + $0xf0] sm:$0xff] %v996_v0  ;;  %v4182_v48 = vadd.f32 %v4662_v50, %v6943_v29  ;;  %v4187_v60 = vadd.f32 %v4667_v21, %v6943_v29  ;;  %v4185_v52 = vadd.f32 %v4665_v62, %v6943_v29 }
 0x276   : > { %v3866_v49 = vadd.f32 %v3836_v55, %v6877_v43  ;;  %5316 = vmatprep.mubr.bf16.mxu1 %v3941_v51  ;;  %v3927_v39 = vmax.f32 %v3899_v41, 0.0  ;;  %v989_v43 = vadd.f32 %v6943_v29, %v981_v4  ;;  %v4188_v33 = vadd.f32 %v4668_v45, %v6943_v29  ;;  %v4680_v45 = vld [vmem:[%s5922_s30 + $0xa8] sm:$0xff] }
 0x277   : > { %v4186_v15 = vadd.f32 %v4666_v14, %v6943_v29  ;;  %v4191_v40 = vadd.f32 %v4671_v35, %v6943_v29  ;;  %v4189_v51 = vadd.f32 %v4669_v12, %v6943_v29  ;;  %v4195_v7 = vadd.f32 %v4675_v30, %v6943_v29  ;;  %v4681_v12 = vld [vmem:[%s5922_s30 + $0xb0] sm:$0xff] }
 0x278   : > { %v3900_v36 = vadd.f32 %v6884_v16, %v3866_v49  ;;  %v4451_v16 = vld [vmem:[%s5922_s30 + $0xf8] sm:$0xff]  ;;  %991 = vst [vmem:[%s6955_s11] sm:$0xff] %v989_v43  ;;  %v4685_v30 = vld [vmem:[%s5922_s30 + $0xd0] sm:$0xff] }
 0x279   : > { %v997_v34 = vadd.f32 %v4451_v16, %v6943_v29  ;;  %v4670_v49 = vld [vmem:[%s5922_s30 + $0x58] sm:$0xff] }
 0x27a   : > { %v3928_v31 = vmax.f32 %v3900_v36, 0.0  ;;  %v4190_v46 = vadd.f32 %v4670_v49, %v6943_v29 }
 0x27b   : > { %4453 = vst [vmem:[%s6955_s11 + $0xf8] sm:$0xff] %v997_v34 }
 0x27c   : > { %v3942_v28 = vpack.c.bf16 %v3928_v31, %v3927_v39  ;;  %v4192_v31 = vadd.f32 %v4672_v18, %v6943_v29 }
 0x27e   : > { %5317 = vmatmul.mubr.bf16.gmra.mxu1 %v3942_v28 }
 0x2ed   : > { %v5294_v22 = vpop.f32.mrf.mxu1 }
 0x2ee   : > { %v4215_v59 = vsel %vm975_vm11, %v5294_v22, 0.0  ;;  %v4193_v22 = vadd.f32 %v4673_v26, %v6943_v29 }
 0x2ef   : > { %v4243_v37 = vadd.f32 %v4215_v59, %v4183_v23  ;;  %v4041_v27 = vpop.f32.mrf.mxu1  ;;  %v4676_v23 = vld [vmem:[%s5922_s30 + $0x88] sm:$0xff]  ;;  %v4674_v59 = vld [vmem:[%s5922_s30 + $0x78] sm:$0xff] }
 0x2f0   : > { %v4213_v57 = vsel %vm975_vm11, %v4041_v27, 0.0  ;;  %v4196_v27 = vadd.f32 %v4676_v23, %v6943_v29 }
 0x2f1   : > { %4691 = vst [vmem:[%s6955_s11 + $0x20] sm:$0xff] %v4243_v37  ;;  %v4241_v20 = vadd.f32 %v4213_v57, %v4181_v10  ;;  %v5295_v61 = vpop.f32.mrf.mxu1 }
 0x2f2   : > { %v4216_v32 = vsel %vm978_vm12, %v5295_v61, 0.0 }
 0x2f3   : > { %4689 = vst [vmem:[%s6955_s11 + $0x10] sm:$0xff] %v4241_v20  ;;  %v4244_v6 = vadd.f32 %v4216_v32, %v4184_v24  ;;  %v4044_v3 = vpop.f32.mrf.mxu1  ;;  %v4194_v20 = vadd.f32 %v4674_v59, %v6943_v29 }
 0x2f4   : > { %v4214_v9 = vsel %vm978_vm12, %v4044_v3, 0.0  ;;  %v4679_v3 = vld [vmem:[%s5922_s30 + $0xa0] sm:$0xff] }
 0x2f5   : > { %4692 = vst [vmem:[%s6955_s11 + $0x28] sm:$0xff] %v4244_v6  ;;  %v4242_v53 = vadd.f32 %v4214_v9, %v4182_v48  ;;  %v5298_v11 = vpop.f32.mrf.mxu1  ;;  %v4199_v9 = vadd.f32 %v4679_v3, %v6943_v29 }
 0x2f6   : > { %v4219_v63 = vsel %vm975_vm11, %v5298_v11, 0.0 }
 0x2f7   : > { %4690 = vst [vmem:[%s6955_s11 + $0x18] sm:$0xff] %v4242_v53  ;;  %v4247_v25 = vadd.f32 %v4219_v63, %v4187_v60  ;;  %v4057_v38 = vpop.f32.mrf.mxu1  ;;  %v4677_v60 = vld [vmem:[%s5922_s30 + $0x90] sm:$0xff]  ;;  %v4678_v63 = vld [vmem:[%s5922_s30 + $0x98] sm:$0xff] }
 0x2f8   : > { %v4217_v44 = vsel %vm975_vm11, %v4057_v38, 0.0  ;;  %v4197_v11 = vadd.f32 %v4677_v60, %v6943_v29  ;;  %v4200_v38 = vadd.f32 %v4680_v45, %v6943_v29 }
 0x2f9   : > { %4695 = vst [vmem:[%s6955_s11 + $0x40] sm:$0xff] %v4247_v25  ;;  %v4245_v13 = vadd.f32 %v4217_v44, %v4185_v52  ;;  %v5299_v5 = vpop.f32.mrf.mxu1 }
 0x2fa   : > { %v4220_v17 = vsel %vm978_vm12, %v5299_v5, 0.0  ;;  %v4198_v5 = vadd.f32 %v4678_v63, %v6943_v29 }
 0x2fb   : > { %4693 = vst [vmem:[%s6955_s11 + $0x30] sm:$0xff] %v4245_v13  ;;  %v4248_v2 = vadd.f32 %v4220_v17, %v4188_v33  ;;  %v4060_v56 = vpop.f32.mrf.mxu1 }
 0x2fc   : > { %v4218_v19 = vsel %vm978_vm12, %v4060_v56, 0.0 }
 0x2fd   : > { %4696 = vst [vmem:[%s6955_s11 + $0x48] sm:$0xff] %v4248_v2  ;;  %v4246_v47 = vadd.f32 %v4218_v19, %v4186_v15  ;;  %v4683_v19 = vld [vmem:[%s5922_s30 + $0xc0] sm:$0xff] }
 0x2fe   : > { %v5302_v55 = vpop.f32.mrf.mxu1 }
 0x2ff   : > { %4694 = vst [vmem:[%s6955_s11 + $0x38] sm:$0xff] %v4246_v47  ;;  %v4223_v41 = vsel %vm975_vm11, %v5302_v55, 0.0  ;;  %v4203_v47 = vadd.f32 %v4683_v19, %v6943_v29  ;;  %v4201_v55 = vadd.f32 %v4681_v12, %v6943_v29 }
 0x300   : > { %v4251_v36 = vadd.f32 %v4223_v41, %v4191_v40  ;;  %v4073_v39 = vpop.f32.mrf.mxu1  ;;  %v4684_v40 = vld [vmem:[%s5922_s30 + $0xc8] sm:$0xff]  ;;  %v4682_v41 = vld [vmem:[%s5922_s30 + $0xb8] sm:$0xff] }
 0x301   : > { %v4221_v28 = vsel %vm975_vm11, %v4073_v39, 0.0  ;;  %v4204_v39 = vadd.f32 %v4684_v40, %v6943_v29 }
 0x302   : > { %4699 = vst [vmem:[%s6955_s11 + $0x60] sm:$0xff] %v4251_v36  ;;  %v4249_v4 = vadd.f32 %v4221_v28, %v4189_v51  ;;  %v5303_v54 = vpop.f32.mrf.mxu1 }
 0x303   : > { %v4224_v43 = vsel %vm978_vm12, %v5303_v54, 0.0  ;;  %v4202_v54 = vadd.f32 %v4682_v41, %v6943_v29 }
 0x304   : > { %4697 = vst [vmem:[%s6955_s11 + $0x50] sm:$0xff] %v4249_v4  ;;  %v4252_v8 = vadd.f32 %v4224_v43, %v4192_v31  ;;  %v4076_v16 = vpop.f32.mrf.mxu1 }
 0x305   : > { %v4222_v0 = vsel %vm978_vm12, %v4076_v16, 0.0 }
 0x306   : > { %4700 = vst [vmem:[%s6955_s11 + $0x68] sm:$0xff] %v4252_v8  ;;  %v4250_v34 = vadd.f32 %v4222_v0, %v4190_v46 }
 0x308   : > { %4698 = vst [vmem:[%s6955_s11 + $0x58] sm:$0xff] %v4250_v34  ;;  %v4687_v34 = vld [vmem:[%s5922_s30 + $0xe0] sm:$0xff] }
 0x309   : > { %v4207_v26 = vadd.f32 %v4687_v34, %v6943_v29 }
 0x30e   : > { %v5306_v1 = vpop.f32.mrf.mxu1 }
 0x30f   : > { %v4227_v10 = vsel %vm975_vm11, %v5306_v1, 0.0  ;;  %v4205_v1 = vadd.f32 %v4685_v30, %v6943_v29 }
 0x310   : > { %v4255_v50 = vadd.f32 %v4227_v10, %v4195_v7  ;;  %v4089_v37 = vpop.f32.mrf.mxu1  ;;  %v4688_v7 = vld [vmem:[%s5922_s30 + $0xe8] sm:$0xff]  ;;  %v4686_v10 = vld [vmem:[%s5922_s30 + $0xd8] sm:$0xff] }
 0x311   : > { %v4225_v24 = vsel %vm975_vm11, %v4089_v37, 0.0  ;;  %v4208_v37 = vadd.f32 %v4688_v7, %v6943_v29 }
 0x312   : > { %4703 = vst [vmem:[%s6955_s11 + $0x80] sm:$0xff] %v4255_v50  ;;  %v4253_v57 = vadd.f32 %v4225_v24, %v4193_v22  ;;  %v5307_v21 = vpop.f32.mrf.mxu1 }
 0x313   : > { %v4228_v61 = vsel %vm978_vm12, %v5307_v21, 0.0  ;;  %v4206_v21 = vadd.f32 %v4686_v10, %v6943_v29 }
 0x314   : > { %4701 = vst [vmem:[%s6955_s11 + $0x70] sm:$0xff] %v4253_v57  ;;  %v4256_v48 = vadd.f32 %v4228_v61, %v4196_v27  ;;  %v4092_v32 = vpop.f32.mrf.mxu1 }
 0x315   : > { %v4226_v62 = vsel %vm978_vm12, %v4092_v32, 0.0 }
 0x316   : > { %4704 = vst [vmem:[%s6955_s11 + $0x88] sm:$0xff] %v4256_v48  ;;  %v4254_v6 = vadd.f32 %v4226_v62, %v4194_v20 }
 0x318   : > { %4702 = vst [vmem:[%s6955_s11 + $0x78] sm:$0xff] %v4254_v6 }
 0x31e   : > { %v5310_v53 = vpop.f32.mrf.mxu1 }
 0x31f   : > { %v4231_v52 = vsel %vm975_vm11, %v5310_v53, 0.0 }
 0x320   : > { %v4259_v14 = vadd.f32 %v4231_v52, %v4199_v9  ;;  %v4105_v25 = vpop.f32.mrf.mxu1 }
 0x321   : > { %v4229_v33 = vsel %vm975_vm11, %v4105_v25, 0.0 }
 0x322   : > { %4707 = vst [vmem:[%s6955_s11 + $0xa0] sm:$0xff] %v4259_v14  ;;  %v4257_v44 = vadd.f32 %v4229_v33, %v4197_v11  ;;  %v5311_v13 = vpop.f32.mrf.mxu1 }
 0x323   : > { %v4232_v15 = vsel %vm978_vm12, %v5311_v13, 0.0 }
 0x324   : > { %4705 = vst [vmem:[%s6955_s11 + $0x90] sm:$0xff] %v4257_v44  ;;  %v4260_v17 = vadd.f32 %v4232_v15, %v4200_v38  ;;  %v4108_v35 = vpop.f32.mrf.mxu1 }
 0x325   : > { %v4230_v2 = vsel %vm978_vm12, %v4108_v35, 0.0 }
 0x326   : > { %4708 = vst [vmem:[%s6955_s11 + $0xa8] sm:$0xff] %v4260_v17  ;;  %v4258_v56 = vadd.f32 %v4230_v2, %v4198_v5 }
 0x328   : > { %4706 = vst [vmem:[%s6955_s11 + $0x98] sm:$0xff] %v4258_v56 }
 0x32e   : > { %v5314_v18 = vpop.f32.mrf.mxu1 }
 0x32f   : > { %v4235_v51 = vsel %vm975_vm11, %v5314_v18, 0.0 }
 0x330   : > { %v4263_v49 = vadd.f32 %v4235_v51, %v4203_v47  ;;  %v4121_v36 = vpop.f32.mrf.mxu1 }
 0x331   : > { %v4233_v31 = vsel %vm975_vm11, %v4121_v36, 0.0 }
 0x332   : > { %4711 = vst [vmem:[%s6955_s11 + $0xc0] sm:$0xff] %v4263_v49  ;;  %v4261_v28 = vadd.f32 %v4233_v31, %v4201_v55  ;;  %v5315_v4 = vpop.f32.mrf.mxu1 }
 0x333   : > { %v4236_v46 = vsel %vm978_vm12, %v5315_v4, 0.0 }
 0x334   : > { %4709 = vst [vmem:[%s6955_s11 + $0xb0] sm:$0xff] %v4261_v28  ;;  %v4264_v43 = vadd.f32 %v4236_v46, %v4204_v39  ;;  %v4124_v8 = vpop.f32.mrf.mxu1 }
 0x335   : > { %v4234_v16 = vsel %vm978_vm12, %v4124_v8, 0.0 }
 0x336   : > { %4712 = vst [vmem:[%s6955_s11 + $0xc8] sm:$0xff] %v4264_v43  ;;  %v4262_v0 = vadd.f32 %v4234_v16, %v4202_v54 }
 0x338   : > { %4710 = vst [vmem:[%s6955_s11 + $0xb8] sm:$0xff] %v4262_v0 }
 0x33e   : > { %v5318_v23 = vpop.f32.mrf.mxu1 }
 0x33f   : > { %v4239_v22 = vsel %vm975_vm11, %v5318_v23, 0.0 }
 0x340   : > { %v4267_v59 = vadd.f32 %v4239_v22, %v4207_v26  ;;  %v4137_v50 = vpop.f32.mrf.mxu1 }
 0x341   : > { %v4237_v27 = vsel %vm975_vm11, %v4137_v50, 0.0 }
 0x342   : > { %4715 = vst [vmem:[%s6955_s11 + $0xe0] sm:$0xff] %v4267_v59  ;;  %v4265_v24 = vadd.f32 %v4237_v27, %v4205_v1  ;;  %v5319_v57 = vpop.f32.mrf.mxu1 }
 0x343   : > { %v4240_v20 = vsel %vm978_vm12, %v5319_v57, 0.0 }
 0x344   : > { %4713 = vst [vmem:[%s6955_s11 + $0xd0] sm:$0xff] %v4265_v24  ;;  %v4268_v61 = vadd.f32 %v4240_v20, %v4208_v37  ;;  %v4140_v48 = vpop.f32.mrf.mxu1 }
 0x345   : > { %v4238_v42 = vsel %vm978_vm12, %v4140_v48, 0.0 }
 0x346   : > { %4716 = vst [vmem:[%s6955_s11 + $0xe8] sm:$0xff] %v4268_v61  ;;  %v4266_v29 = vadd.f32 %v4238_v42, %v4206_v21 }
 0x348   : > { %4714 = vst [vmem:[%s6955_s11 + $0xd8] sm:$0xff] %v4266_v29 }
 0x349   : > { %5692 = shalt.err (!%p5689_p9)
}
 0x34a   : > { %s5693_s30 = scalar_lea.hbm %s7111_s9, 4096  ;;  %s5697_s8 = scalar_lea.hbm %s7163_s5, 8192 }
 0x34b   : > { %p5694_p13 = scmp.ne.s32.totalorder %s7111_s9, %s5693_s30  ;;  %p5698_p4 = scmp.lt.s32.totalorder %s7111_s9, %s7163_s5 }
 0x34c   : > { %p5699_p8 = scmp.lt.s32.totalorder %s5697_s8, %s5693_s30 }
 0x34d   : > { %p5695_p5 = pnand %p5694_p13, %p7187_p10 }
 0x34e   : > { %p5700_p3 = por %p5699_p8, %p5698_p4 }
 0x34f   : > { %p5696_p0 = pneg %p5695_p5 }
 0x351   : > { %p5701_p11 = pnand %p5700_p3, %p5696_p0 }
 0x353   : > { %5704 = shalt.err (!%p5701_p11)
}
 0x354   : > { %s5757_s12 = smov 128   ;;  %s5758_s6 = smov 8  }
 0x355   : > { %5330 = dma.vmem_to_hbm [thread:$0]  (%p7187_p10), %s7113_s28, 4096, %s7111_s9, %s4299_s22, %s5757_s12, %s5757_s12, %s5758_s6  }
 0x356 PF: > { %s4327_s7 = sand.u32 1, %s5735_s18   ;;  %p7188_p1 = scmp.ne.s32.totalorder %s7169_s25, 0 }
 0x357   : > { %p7189_p2 = scmp.ge.s32.totalorder %s5747_s21, 2  ;;  %s4328_s13 = scalar_lea.sflag [#allocation5], %s4327_s7 }
 0x359   : > { %p5344_p6 = pnand %p7189_p2, %p7188_p1 }
 0x35b   : > { %p5345_p12 = pneg %p5344_p6 }
 0x35d   : > { %5730 = dma.done.wait (%p5345_p12), %s4328_s13, 4096  }
 0x35e   : > { %5732 = vsyncadd (%p5345_p12), %s4328_s13, 4294963200  ;;  %p19_p7 = scmp.ge.s32.totalorder %s5861_s15, 4   ;;  %s7190_s18 = smov %s5739_s19 }
 0x35f   : > { %s7191_s19 = smov %s5743_s20  ;;  %s7192_s20 = smov %s5877_s27 }
 0x360   : > { %s7193_s21 = smov %s5861_s15  ;;  %21 = sbr.rel (!%p19_p7) target bundleno = 6 (0x6), region = 101 }
 0x365   :  { %4333 = vsyncpa [#allocation4], 1 }
 0x366   :  { %4335 = vsyncpa [#allocation4 + $0x1], 1 }
 0x367   :  { %4336 = vsyncpa [#allocation7], 1 }
 0x368   :  { %4337 = vsyncpa [#allocation5], 1 }
 0x369   :  { %4339 = vsyncpa [#allocation5 + $0x1], 1 }

</bundles_post_ra>
